<compile_context>
chip_gen: v5e
topology: v5e:2x2
jax: 0.10.0
libtpu: 0.0.40
codegen_flags: <defaults>
</compile_context>

<pallas_src>
import functools

import jax
import jax.numpy as jnp
import numpy as np
from jax.experimental import pallas as pl
from jax.experimental.pallas import tpu as pltpu


# ----------------------------- fused forward kernel -----------------------------
def _fused_rnn_kernel(*refs, T, B, H, ndir, num_layers, mm_dtype):
    x_ref = refs[0]                                  # (T*B, D_in) time-major rows
    layer_refs = refs[1:1 + 3 * num_layers]          # per layer: wih, whh, bias
    wout_ref, bout_ref, o_ref = refs[1 + 3 * num_layers:]

    G = 4 * H                      # gate width (i, f, g, o) -> 128 lanes for H=32
    R = ndir * B                   # rows per fused step (both directions stacked)

    # ---- constant masks, hoisted out of every loop ----
    gate_lane = jax.lax.broadcasted_iota(jnp.int32, (R, G), 1)
    tanh_sel = (gate_lane >= 2 * H) & (gate_lane < 3 * H)      # g-gate lanes
    if ndir == 2:
        row = jax.lax.broadcasted_iota(jnp.int32, (R, ndir * H), 0)
        lane = jax.lax.broadcasted_iota(jnp.int32, (R, ndir * H), 1)
        fwd_keep = (row < B) & (lane < H)
        rev_keep = (row >= B) & (lane >= H)
        dir_mask = fwd_keep | rev_keep            # block-diagonal h-state mask

    seq = x_ref[...]               # current layer input, (T*B, D_in), f32
    last = None
    for l in range(num_layers):
        wih = layer_refs[3 * l][...].astype(mm_dtype)        # (D_in, ndir*4H)
        whh = layer_refs[3 * l + 1][...].astype(mm_dtype)    # (ndir*H, 4H)
        bias = layer_refs[3 * l + 2][...]                    # (1, ndir*4H) f32

        # Hoisted input projection: all timesteps, both directions, one matmul.
        xp = jnp.dot(seq.astype(mm_dtype), wih,
                     preferred_element_type=jnp.float32) + bias   # (T*B, ndir*4H)

        # Per-step precomputed gate inputs, [fwd; rev] stacked along sublanes.
        gx = []
        for s in range(T):
            fwd_part = xp[s * B:(s + 1) * B, 0:G]
            if ndir == 2:
                rev_part = xp[(T - 1 - s) * B:(T - s) * B, G:2 * G]
                gx.append(jnp.concatenate([fwd_part, rev_part], axis=0))
            else:
                gx.append(fwd_part)

        # Serial recurrence (fully unrolled); only h @ W_hh is on the chain.
        h_state = jnp.zeros((R, ndir * H), jnp.float32)   # block-diag h layout
        c_state = jnp.zeros((R, H), jnp.float32)
        fwd_h, rev_h = [], []
        for s in range(T):
            gates = gx[s] + jnp.dot(h_state.astype(mm_dtype), whh,
                                    preferred_element_type=jnp.float32)  # (R,4H)
            # full-width activations + lane select instead of masked 32-lane ops
            act = jnp.where(tanh_sel, jnp.tanh(gates), jax.nn.sigmoid(gates))
            i_g = act[:, 0:H]
            f_g = act[:, H:2 * H]
            g_g = act[:, 2 * H:3 * H]
            o_g = act[:, 3 * H:4 * H]
            c_state = f_g * c_state + i_g * g_g
            h_n = o_g * jnp.tanh(c_state)                  # (R, H), f32
            if ndir == 2:
                h_state = jnp.where(dir_mask,
                                    jnp.concatenate([h_n, h_n], axis=1), 0.0)
                fwd_h.append(h_n[0:B])                     # fwd @ orig time s
                rev_h.append(h_n[B:2 * B])                 # rev @ orig time T-1-s
            else:
                h_state = h_n
                fwd_h.append(h_n)

        if l < num_layers - 1:
            # Assemble next layer's time-major input, (T*B, ndir*H).
            rows = []
            for t in range(T):
                if ndir == 2:
                    rows.append(jnp.concatenate([fwd_h[t], rev_h[T - 1 - t]],
                                                axis=1))
                else:
                    rows.append(fwd_h[t])
            seq = jnp.concatenate(rows, axis=0)
        else:
            # Head only needs the last original timestep of the final layer.
            if ndir == 2:
                last = jnp.concatenate([fwd_h[T - 1], rev_h[0]], axis=1)
            else:
                last = fwd_h[T - 1]

    # ---- fused head: Linear + log_softmax(dim=1) ----
    logits = (jnp.dot(last.astype(mm_dtype), wout_ref[...].astype(mm_dtype),
                      preferred_element_type=jnp.float32) + bout_ref[...])
    m = jnp.max(logits, axis=1, keepdims=True)
    shifted = logits - m
    lse = jnp.log(jnp.sum(jnp.exp(shifted), axis=1, keepdims=True))
    o_ref[...] = (shifted - lse).astype(o_ref.dtype)


# --------------------------------- wrapper ---------------------------------
def rnn_forward(x, params, *, matmul_dtype=jnp.float32):
    """x: (B, T, input_size), batch_first (PyTorch convention)."""
    B, T, D0 = x.shape
    layers = params["layers"]
    num_layers = len(layers)
    ndir = len(layers[0])
    H = layers[0][0]["w_hh_t"].shape[0]
    C = params["w_out_t"].shape[1]

    # Time-major, flattened to (T*B, D): row t*B + b == x[b, t, :].
    x2d = jnp.transpose(x, (1, 0, 2)).reshape(T * B, D0)

    args = [x2d]
    for dirs in layers:
        args.append(jnp.concatenate([p["w_ih_t"] for p in dirs], axis=1))  # (D_in, ndir*4H)
        args.append(jnp.concatenate([p["w_hh_t"] for p in dirs], axis=0))  # (ndir*H, 4H)
        args.append(jnp.concatenate([p["b"] for p in dirs], axis=1))       # (1, ndir*4H)
    args.append(params["w_out_t"])                                         # (ndir*H, C)
    args.append(params["b_out"])                                           # (1, C)

    kernel = functools.partial(
        _fused_rnn_kernel, T=T, B=B, H=H, ndir=ndir,
        num_layers=num_layers, mm_dtype=matmul_dtype)

    return pl.pallas_call(
        kernel,
        out_shape=jax.ShapeDtypeStruct((B, C), jnp.float32),
        in_specs=[pl.BlockSpec(memory_space=pltpu.MemorySpace.VMEM)
                  for _ in args],
        out_specs=pl.BlockSpec(memory_space=pltpu.MemorySpace.VMEM),
    )(*args)


# --------------------------------- params ---------------------------------
def init_params(key, input_size, hidden_size, n_class, bidirectional,
                num_layers=3):
    num_directions = 2 if bidirectional else 1
    scale = 1.0 / np.sqrt(hidden_size)
    layers = []
    for layer in range(num_layers):
        d_in = input_size if layer == 0 else hidden_size * num_directions
        dirs = []
        for _ in range(num_directions):
            key, k1, k2, k3, k4 = jax.random.split(key, 5)
            w_ih = jax.random.uniform(k1, (4 * hidden_size, d_in),
                                      jnp.float32, -scale, scale)
            w_hh = jax.random.uniform(k2, (4 * hidden_size, hidden_size),
                                      jnp.float32, -scale, scale)
            b_ih = jax.random.uniform(k3, (4 * hidden_size,),
                                      jnp.float32, -scale, scale)
            b_hh = jax.random.uniform(k4, (4 * hidden_size,),
                                      jnp.float32, -scale, scale)
            dirs.append({
                "w_ih_t": w_ih.T,                   # (d_in, 4H)
                "w_hh_t": w_hh.T,                   # (H, 4H)
                "b": (b_ih + b_hh)[None, :],        # (1, 4H)
            })
        layers.append(dirs)

    out_in = hidden_size * num_directions
    lin_scale = 1.0 / np.sqrt(out_in)
    key, k1, k2 = jax.random.split(key, 3)
    w_out = jax.random.uniform(k1, (n_class, out_in),
                               jnp.float32, -lin_scale, lin_scale)
    b_out = jax.random.uniform(k2, (n_class,),
                               jnp.float32, -lin_scale, lin_scale)
    return {"layers": layers, "w_out_t": w_out.T, "b_out": b_out[None, :]}


# ------------------------------ pure-JAX reference ----------------------------
def _rnn_forward_ref(x, params):
    h_seq = jnp.transpose(x, (1, 0, 2))
    for dirs in params["layers"]:
        outs = []
        for d, p in enumerate(dirs):
            seq = h_seq[::-1] if d == 1 else h_seq
            B = x.shape[0]
            H = p["w_hh_t"].shape[0]

            def step(carry, xt, p=p, H=H):
                h, c = carry
                gates = xt @ p["w_ih_t"] + h @ p["w_hh_t"] + p["b"]
                i = jax.nn.sigmoid(gates[:, :H])
                f = jax.nn.sigmoid(gates[:, H:2 * H])
                g = jnp.tanh(gates[:, 2 * H:3 * H])
                o = jax.nn.sigmoid(gates[:, 3 * H:])
                c = f * c + i * g
                h = o * jnp.tanh(c)
                return (h, c), h

            init = (jnp.zeros((B, H), jnp.float32), jnp.zeros((B, H), jnp.float32))
            _, ys = jax.lax.scan(step, init, seq)
            if d == 1:
                ys = ys[::-1]
            outs.append(ys)
        h_seq = jnp.concatenate(outs, axis=-1) if len(outs) > 1 else outs[0]
    logits = h_seq[-1] @ params["w_out_t"] + params["b_out"]
    return jax.nn.log_softmax(logits, axis=1)


# ------------------------------------ main ------------------------------------
if __name__ == "__main__":
    B, T, input_size, hidden_size, n_class = 2, 8, 16, 32, 10

    key = jax.random.PRNGKey(0)
    kx, kp_bi, kp_uni = jax.random.split(key, 3)
    x = jax.random.normal(kx, (B, T, input_size), jnp.float32)

    fwd = jax.jit(rnn_forward)

    # bidirectional=True (the module's example configuration)
    params_bi = init_params(kp_bi, input_size, hidden_size, n_class, True)
    out_bi = jax.block_until_ready(fwd(x, params_bi))
    ref_bi = _rnn_forward_ref(x, params_bi)
    np.testing.assert_allclose(np.asarray(out_bi), np.asarray(ref_bi),
                               rtol=1e-4, atol=1e-4)

    # bidirectional=False path exercised as well
    params_uni = init_params(kp_uni, input_size, hidden_size, n_class, False)
    out_uni = jax.block_until_ready(fwd(x, params_uni))
    ref_uni = _rnn_forward_ref(x, params_uni)
    np.testing.assert_allclose(np.asarray(out_uni), np.asarray(ref_uni),
                               rtol=1e-4, atol=1e-4)

    print("KERNEL_OK")
</pallas_src>

<mosaic_0001>
module attributes {stable_mosaic.version = 11 : i64} {
  func.func @_fused_rnn_kernel(%arg0: memref<16x16xf32, #tpu.memory_space<vmem>>, %arg1: memref<16x256xf32, #tpu.memory_space<vmem>>, %arg2: memref<64x128xf32, #tpu.memory_space<vmem>>, %arg3: memref<1x256xf32, #tpu.memory_space<vmem>>, %arg4: memref<64x256xf32, #tpu.memory_space<vmem>>, %arg5: memref<64x128xf32, #tpu.memory_space<vmem>>, %arg6: memref<1x256xf32, #tpu.memory_space<vmem>>, %arg7: memref<64x256xf32, #tpu.memory_space<vmem>>, %arg8: memref<64x128xf32, #tpu.memory_space<vmem>>, %arg9: memref<1x256xf32, #tpu.memory_space<vmem>>, %arg10: memref<64x10xf32, #tpu.memory_space<vmem>>, %arg11: memref<1x10xf32, #tpu.memory_space<vmem>>, %arg12: memref<2x10xf32, #tpu.memory_space<vmem>>) attributes {dimension_semantics = [], scalar_prefetch = 0 : i64, scratch_operands = 0 : i64, tpu.core_type = #tpu.core_type<tc>} {
    %0 = tpu.iota {dimensions = array<i32: 1>} : vector<4x128xi32>
    %c64_i32 = arith.constant 64 : i32
    %1 = vector.broadcast %c64_i32 : i32 to vector<4x128xi32>
    %2 = arith.cmpi sge, %0, %1 : vector<4x128xi32>
    %c96_i32 = arith.constant 96 : i32
    %3 = vector.broadcast %c96_i32 : i32 to vector<4x128xi32>
    %4 = arith.cmpi slt, %0, %3 : vector<4x128xi32>
    %5 = arith.andi %2, %4 : vector<4x128xi1>
    %6 = tpu.iota {dimensions = array<i32: 0>} : vector<4x64xi32>
    %7 = tpu.iota {dimensions = array<i32: 1>} : vector<4x64xi32>
    %c2_i32 = arith.constant 2 : i32
    %8 = vector.broadcast %c2_i32 : i32 to vector<4x64xi32>
    %9 = arith.cmpi slt, %6, %8 : vector<4x64xi32>
    %c32_i32 = arith.constant 32 : i32
    %10 = vector.broadcast %c32_i32 : i32 to vector<4x64xi32>
    %11 = arith.cmpi slt, %7, %10 : vector<4x64xi32>
    %12 = arith.andi %9, %11 : vector<4x64xi1>
    %c2_i32_0 = arith.constant 2 : i32
    %13 = vector.broadcast %c2_i32_0 : i32 to vector<4x64xi32>
    %14 = arith.cmpi sge, %6, %13 : vector<4x64xi32>
    %c32_i32_1 = arith.constant 32 : i32
    %15 = vector.broadcast %c32_i32_1 : i32 to vector<4x64xi32>
    %16 = arith.cmpi sge, %7, %15 : vector<4x64xi32>
    %17 = arith.andi %14, %16 : vector<4x64xi1>
    %18 = arith.ori %12, %17 : vector<4x64xi1>
    %c0 = arith.constant 0 : index
    %c0_2 = arith.constant 0 : index
    %19 = vector.load %arg0[%c0, %c0_2] : memref<16x16xf32, #tpu.memory_space<vmem>>, vector<16x16xf32>
    %c0_3 = arith.constant 0 : index
    %c0_4 = arith.constant 0 : index
    %20 = vector.load %arg1[%c0_3, %c0_4] : memref<16x256xf32, #tpu.memory_space<vmem>>, vector<16x256xf32>
    %c0_5 = arith.constant 0 : index
    %c0_6 = arith.constant 0 : index
    %21 = vector.load %arg2[%c0_5, %c0_6] : memref<64x128xf32, #tpu.memory_space<vmem>>, vector<64x128xf32>
    %c0_7 = arith.constant 0 : index
    %c0_8 = arith.constant 0 : index
    %22 = vector.load %arg3[%c0_7, %c0_8] : memref<1x256xf32, #tpu.memory_space<vmem>>, vector<1x256xf32>
    %cst = arith.constant dense<0.000000e+00> : vector<16x256xf32>
    %23 = tpu.matmul %19, %20, %cst {dimension_numbers = #tpu.dot_dimension_numbers<[1], [0], [0], [1], [0, 0, 1, 1], [], []>} : vector<16x16xf32>, vector<16x256xf32>, vector<16x256xf32> -> vector<16x256xf32>
    %24 = vector.broadcast %22 : vector<1x256xf32> to vector<16x256xf32>
    %25 = arith.addf %23, %24 : vector<16x256xf32>
    %26 = vector.extract_strided_slice %25 {offsets = [0, 0], sizes = [2, 128], strides = [1, 1]} : vector<16x256xf32> to vector<2x128xf32>
    %27 = vector.extract_strided_slice %25 {offsets = [14, 128], sizes = [2, 128], strides = [1, 1]} : vector<16x256xf32> to vector<2x128xf32>
    %28 = tpu.concatenate %26, %27 in 0 : vector<2x128xf32>, vector<2x128xf32> -> vector<4x128xf32>
    %29 = vector.extract_strided_slice %25 {offsets = [2, 0], sizes = [2, 128], strides = [1, 1]} : vector<16x256xf32> to vector<2x128xf32>
    %30 = vector.extract_strided_slice %25 {offsets = [12, 128], sizes = [2, 128], strides = [1, 1]} : vector<16x256xf32> to vector<2x128xf32>
    %31 = tpu.concatenate %29, %30 in 0 : vector<2x128xf32>, vector<2x128xf32> -> vector<4x128xf32>
    %32 = vector.extract_strided_slice %25 {offsets = [4, 0], sizes = [2, 128], strides = [1, 1]} : vector<16x256xf32> to vector<2x128xf32>
    %33 = vector.extract_strided_slice %25 {offsets = [10, 128], sizes = [2, 128], strides = [1, 1]} : vector<16x256xf32> to vector<2x128xf32>
    %34 = tpu.concatenate %32, %33 in 0 : vector<2x128xf32>, vector<2x128xf32> -> vector<4x128xf32>
    %35 = vector.extract_strided_slice %25 {offsets = [6, 0], sizes = [2, 128], strides = [1, 1]} : vector<16x256xf32> to vector<2x128xf32>
    %36 = vector.extract_strided_slice %25 {offsets = [8, 128], sizes = [2, 128], strides = [1, 1]} : vector<16x256xf32> to vector<2x128xf32>
    %37 = tpu.concatenate %35, %36 in 0 : vector<2x128xf32>, vector<2x128xf32> -> vector<4x128xf32>
    %38 = vector.extract_strided_slice %25 {offsets = [8, 0], sizes = [2, 128], strides = [1, 1]} : vector<16x256xf32> to vector<2x128xf32>
    %39 = vector.extract_strided_slice %25 {offsets = [6, 128], sizes = [2, 128], strides = [1, 1]} : vector<16x256xf32> to vector<2x128xf32>
    %40 = tpu.concatenate %38, %39 in 0 : vector<2x128xf32>, vector<2x128xf32> -> vector<4x128xf32>
    %41 = vector.extract_strided_slice %25 {offsets = [10, 0], sizes = [2, 128], strides = [1, 1]} : vector<16x256xf32> to vector<2x128xf32>
    %42 = vector.extract_strided_slice %25 {offsets = [4, 128], sizes = [2, 128], strides = [1, 1]} : vector<16x256xf32> to vector<2x128xf32>
    %43 = tpu.concatenate %41, %42 in 0 : vector<2x128xf32>, vector<2x128xf32> -> vector<4x128xf32>
    %44 = vector.extract_strided_slice %25 {offsets = [12, 0], sizes = [2, 128], strides = [1, 1]} : vector<16x256xf32> to vector<2x128xf32>
    %45 = vector.extract_strided_slice %25 {offsets = [2, 128], sizes = [2, 128], strides = [1, 1]} : vector<16x256xf32> to vector<2x128xf32>
    %46 = tpu.concatenate %44, %45 in 0 : vector<2x128xf32>, vector<2x128xf32> -> vector<4x128xf32>
    %47 = vector.extract_strided_slice %25 {offsets = [14, 0], sizes = [2, 128], strides = [1, 1]} : vector<16x256xf32> to vector<2x128xf32>
    %48 = vector.extract_strided_slice %25 {offsets = [0, 128], sizes = [2, 128], strides = [1, 1]} : vector<16x256xf32> to vector<2x128xf32>
    %49 = tpu.concatenate %47, %48 in 0 : vector<2x128xf32>, vector<2x128xf32> -> vector<4x128xf32>
    %cst_9 = arith.constant 0.000000e+00 : f32
    %50 = vector.broadcast %cst_9 : f32 to vector<4x64xf32>
    %cst_10 = arith.constant 0.000000e+00 : f32
    %51 = vector.broadcast %cst_10 : f32 to vector<4x32xf32>
    %cst_11 = arith.constant dense<0.000000e+00> : vector<4x128xf32>
    %52 = tpu.matmul %50, %21, %cst_11 {dimension_numbers = #tpu.dot_dimension_numbers<[1], [0], [0], [1], [0, 0, 1, 1], [], []>} : vector<4x64xf32>, vector<64x128xf32>, vector<4x128xf32> -> vector<4x128xf32>
    %53 = arith.addf %28, %52 : vector<4x128xf32>
    %54 = math.tanh %53 : vector<4x128xf32>
    %55 = arith.negf %53 : vector<4x128xf32>
    %56 = math.exp %55 : vector<4x128xf32>
    %cst_12 = arith.constant 1.000000e+00 : f32
    %57 = vector.broadcast %cst_12 : f32 to vector<4x128xf32>
    %58 = arith.addf %57, %56 : vector<4x128xf32>
    %59 = arith.divf %57, %58 : vector<4x128xf32>
    %60 = arith.select %5, %54, %59 : vector<4x128xi1>, vector<4x128xf32>
    %61 = vector.extract_strided_slice %60 {offsets = [0, 0], sizes = [4, 32], strides = [1, 1]} : vector<4x128xf32> to vector<4x32xf32>
    %62 = vector.extract_strided_slice %60 {offsets = [0, 32], sizes = [4, 32], strides = [1, 1]} : vector<4x128xf32> to vector<4x32xf32>
    %63 = vector.extract_strided_slice %60 {offsets = [0, 64], sizes = [4, 32], strides = [1, 1]} : vector<4x128xf32> to vector<4x32xf32>
    %64 = vector.extract_strided_slice %60 {offsets = [0, 96], sizes = [4, 32], strides = [1, 1]} : vector<4x128xf32> to vector<4x32xf32>
    %65 = arith.mulf %62, %51 : vector<4x32xf32>
    %66 = arith.mulf %61, %63 : vector<4x32xf32>
    %67 = arith.addf %65, %66 : vector<4x32xf32>
    %68 = math.tanh %67 : vector<4x32xf32>
    %69 = arith.mulf %64, %68 : vector<4x32xf32>
    %70 = tpu.concatenate %69, %69 in 1 : vector<4x32xf32>, vector<4x32xf32> -> vector<4x64xf32>
    %cst_13 = arith.constant 0.000000e+00 : f32
    %71 = vector.broadcast %cst_13 : f32 to vector<4x64xf32>
    %72 = arith.select %18, %70, %71 : vector<4x64xi1>, vector<4x64xf32>
    %73 = vector.extract_strided_slice %69 {offsets = [0, 0], sizes = [2, 32], strides = [1, 1]} : vector<4x32xf32> to vector<2x32xf32>
    %74 = vector.extract_strided_slice %69 {offsets = [2, 0], sizes = [2, 32], strides = [1, 1]} : vector<4x32xf32> to vector<2x32xf32>
    %cst_14 = arith.constant dense<0.000000e+00> : vector<4x128xf32>
    %75 = tpu.matmul %72, %21, %cst_14 {dimension_numbers = #tpu.dot_dimension_numbers<[1], [0], [0], [1], [0, 0, 1, 1], [], []>} : vector<4x64xf32>, vector<64x128xf32>, vector<4x128xf32> -> vector<4x128xf32>
    %76 = arith.addf %31, %75 : vector<4x128xf32>
    %77 = math.tanh %76 : vector<4x128xf32>
    %78 = arith.negf %76 : vector<4x128xf32>
    %79 = math.exp %78 : vector<4x128xf32>
    %cst_15 = arith.constant 1.000000e+00 : f32
    %80 = vector.broadcast %cst_15 : f32 to vector<4x128xf32>
    %81 = arith.addf %80, %79 : vector<4x128xf32>
    %82 = arith.divf %80, %81 : vector<4x128xf32>
    %83 = arith.select %5, %77, %82 : vector<4x128xi1>, vector<4x128xf32>
    %84 = vector.extract_strided_slice %83 {offsets = [0, 0], sizes = [4, 32], strides = [1, 1]} : vector<4x128xf32> to vector<4x32xf32>
    %85 = vector.extract_strided_slice %83 {offsets = [0, 32], sizes = [4, 32], strides = [1, 1]} : vector<4x128xf32> to vector<4x32xf32>
    %86 = vector.extract_strided_slice %83 {offsets = [0, 64], sizes = [4, 32], strides = [1, 1]} : vector<4x128xf32> to vector<4x32xf32>
    %87 = vector.extract_strided_slice %83 {offsets = [0, 96], sizes = [4, 32], strides = [1, 1]} : vector<4x128xf32> to vector<4x32xf32>
    %88 = arith.mulf %85, %67 : vector<4x32xf32>
    %89 = arith.mulf %84, %86 : vector<4x32xf32>
    %90 = arith.addf %88, %89 : vector<4x32xf32>
    %91 = math.tanh %90 : vector<4x32xf32>
    %92 = arith.mulf %87, %91 : vector<4x32xf32>
    %93 = tpu.concatenate %92, %92 in 1 : vector<4x32xf32>, vector<4x32xf32> -> vector<4x64xf32>
    %cst_16 = arith.constant 0.000000e+00 : f32
    %94 = vector.broadcast %cst_16 : f32 to vector<4x64xf32>
    %95 = arith.select %18, %93, %94 : vector<4x64xi1>, vector<4x64xf32>
    %96 = vector.extract_strided_slice %92 {offsets = [0, 0], sizes = [2, 32], strides = [1, 1]} : vector<4x32xf32> to vector<2x32xf32>
    %97 = vector.extract_strided_slice %92 {offsets = [2, 0], sizes = [2, 32], strides = [1, 1]} : vector<4x32xf32> to vector<2x32xf32>
    %cst_17 = arith.constant dense<0.000000e+00> : vector<4x128xf32>
    %98 = tpu.matmul %95, %21, %cst_17 {dimension_numbers = #tpu.dot_dimension_numbers<[1], [0], [0], [1], [0, 0, 1, 1], [], []>} : vector<4x64xf32>, vector<64x128xf32>, vector<4x128xf32> -> vector<4x128xf32>
    %99 = arith.addf %34, %98 : vector<4x128xf32>
    %100 = math.tanh %99 : vector<4x128xf32>
    %101 = arith.negf %99 : vector<4x128xf32>
    %102 = math.exp %101 : vector<4x128xf32>
    %cst_18 = arith.constant 1.000000e+00 : f32
    %103 = vector.broadcast %cst_18 : f32 to vector<4x128xf32>
    %104 = arith.addf %103, %102 : vector<4x128xf32>
    %105 = arith.divf %103, %104 : vector<4x128xf32>
    %106 = arith.select %5, %100, %105 : vector<4x128xi1>, vector<4x128xf32>
    %107 = vector.extract_strided_slice %106 {offsets = [0, 0], sizes = [4, 32], strides = [1, 1]} : vector<4x128xf32> to vector<4x32xf32>
    %108 = vector.extract_strided_slice %106 {offsets = [0, 32], sizes = [4, 32], strides = [1, 1]} : vector<4x128xf32> to vector<4x32xf32>
    %109 = vector.extract_strided_slice %106 {offsets = [0, 64], sizes = [4, 32], strides = [1, 1]} : vector<4x128xf32> to vector<4x32xf32>
    %110 = vector.extract_strided_slice %106 {offsets = [0, 96], sizes = [4, 32], strides = [1, 1]} : vector<4x128xf32> to vector<4x32xf32>
    %111 = arith.mulf %108, %90 : vector<4x32xf32>
    %112 = arith.mulf %107, %109 : vector<4x32xf32>
    %113 = arith.addf %111, %112 : vector<4x32xf32>
    %114 = math.tanh %113 : vector<4x32xf32>
    %115 = arith.mulf %110, %114 : vector<4x32xf32>
    %116 = tpu.concatenate %115, %115 in 1 : vector<4x32xf32>, vector<4x32xf32> -> vector<4x64xf32>
    %cst_19 = arith.constant 0.000000e+00 : f32
    %117 = vector.broadcast %cst_19 : f32 to vector<4x64xf32>
    %118 = arith.select %18, %116, %117 : vector<4x64xi1>, vector<4x64xf32>
    %119 = vector.extract_strided_slice %115 {offsets = [0, 0], sizes = [2, 32], strides = [1, 1]} : vector<4x32xf32> to vector<2x32xf32>
    %120 = vector.extract_strided_slice %115 {offsets = [2, 0], sizes = [2, 32], strides = [1, 1]} : vector<4x32xf32> to vector<2x32xf32>
    %cst_20 = arith.constant dense<0.000000e+00> : vector<4x128xf32>
    %121 = tpu.matmul %118, %21, %cst_20 {dimension_numbers = #tpu.dot_dimension_numbers<[1], [0], [0], [1], [0, 0, 1, 1], [], []>} : vector<4x64xf32>, vector<64x128xf32>, vector<4x128xf32> -> vector<4x128xf32>
    %122 = arith.addf %37, %121 : vector<4x128xf32>
    %123 = math.tanh %122 : vector<4x128xf32>
    %124 = arith.negf %122 : vector<4x128xf32>
    %125 = math.exp %124 : vector<4x128xf32>
    %cst_21 = arith.constant 1.000000e+00 : f32
    %126 = vector.broadcast %cst_21 : f32 to vector<4x128xf32>
    %127 = arith.addf %126, %125 : vector<4x128xf32>
    %128 = arith.divf %126, %127 : vector<4x128xf32>
    %129 = arith.select %5, %123, %128 : vector<4x128xi1>, vector<4x128xf32>
    %130 = vector.extract_strided_slice %129 {offsets = [0, 0], sizes = [4, 32], strides = [1, 1]} : vector<4x128xf32> to vector<4x32xf32>
    %131 = vector.extract_strided_slice %129 {offsets = [0, 32], sizes = [4, 32], strides = [1, 1]} : vector<4x128xf32> to vector<4x32xf32>
    %132 = vector.extract_strided_slice %129 {offsets = [0, 64], sizes = [4, 32], strides = [1, 1]} : vector<4x128xf32> to vector<4x32xf32>
    %133 = vector.extract_strided_slice %129 {offsets = [0, 96], sizes = [4, 32], strides = [1, 1]} : vector<4x128xf32> to vector<4x32xf32>
    %134 = arith.mulf %131, %113 : vector<4x32xf32>
    %135 = arith.mulf %130, %132 : vector<4x32xf32>
    %136 = arith.addf %134, %135 : vector<4x32xf32>
    %137 = math.tanh %136 : vector<4x32xf32>
    %138 = arith.mulf %133, %137 : vector<4x32xf32>
    %139 = tpu.concatenate %138, %138 in 1 : vector<4x32xf32>, vector<4x32xf32> -> vector<4x64xf32>
    %cst_22 = arith.constant 0.000000e+00 : f32
    %140 = vector.broadcast %cst_22 : f32 to vector<4x64xf32>
    %141 = arith.select %18, %139, %140 : vector<4x64xi1>, vector<4x64xf32>
    %142 = vector.extract_strided_slice %138 {offsets = [0, 0], sizes = [2, 32], strides = [1, 1]} : vector<4x32xf32> to vector<2x32xf32>
    %143 = vector.extract_strided_slice %138 {offsets = [2, 0], sizes = [2, 32], strides = [1, 1]} : vector<4x32xf32> to vector<2x32xf32>
    %cst_23 = arith.constant dense<0.000000e+00> : vector<4x128xf32>
    %144 = tpu.matmul %141, %21, %cst_23 {dimension_numbers = #tpu.dot_dimension_numbers<[1], [0], [0], [1], [0, 0, 1, 1], [], []>} : vector<4x64xf32>, vector<64x128xf32>, vector<4x128xf32> -> vector<4x128xf32>
    %145 = arith.addf %40, %144 : vector<4x128xf32>
    %146 = math.tanh %145 : vector<4x128xf32>
    %147 = arith.negf %145 : vector<4x128xf32>
    %148 = math.exp %147 : vector<4x128xf32>
    %cst_24 = arith.constant 1.000000e+00 : f32
    %149 = vector.broadcast %cst_24 : f32 to vector<4x128xf32>
    %150 = arith.addf %149, %148 : vector<4x128xf32>
    %151 = arith.divf %149, %150 : vector<4x128xf32>
    %152 = arith.select %5, %146, %151 : vector<4x128xi1>, vector<4x128xf32>
    %153 = vector.extract_strided_slice %152 {offsets = [0, 0], sizes = [4, 32], strides = [1, 1]} : vector<4x128xf32> to vector<4x32xf32>
    %154 = vector.extract_strided_slice %152 {offsets = [0, 32], sizes = [4, 32], strides = [1, 1]} : vector<4x128xf32> to vector<4x32xf32>
    %155 = vector.extract_strided_slice %152 {offsets = [0, 64], sizes = [4, 32], strides = [1, 1]} : vector<4x128xf32> to vector<4x32xf32>
    %156 = vector.extract_strided_slice %152 {offsets = [0, 96], sizes = [4, 32], strides = [1, 1]} : vector<4x128xf32> to vector<4x32xf32>
    %157 = arith.mulf %154, %136 : vector<4x32xf32>
    %158 = arith.mulf %153, %155 : vector<4x32xf32>
    %159 = arith.addf %157, %158 : vector<4x32xf32>
    %160 = math.tanh %159 : vector<4x32xf32>
    %161 = arith.mulf %156, %160 : vector<4x32xf32>
    %162 = tpu.concatenate %161, %161 in 1 : vector<4x32xf32>, vector<4x32xf32> -> vector<4x64xf32>
    %cst_25 = arith.constant 0.000000e+00 : f32
    %163 = vector.broadcast %cst_25 : f32 to vector<4x64xf32>
    %164 = arith.select %18, %162, %163 : vector<4x64xi1>, vector<4x64xf32>
    %165 = vector.extract_strided_slice %161 {offsets = [0, 0], sizes = [2, 32], strides = [1, 1]} : vector<4x32xf32> to vector<2x32xf32>
    %166 = vector.extract_strided_slice %161 {offsets = [2, 0], sizes = [2, 32], strides = [1, 1]} : vector<4x32xf32> to vector<2x32xf32>
    %cst_26 = arith.constant dense<0.000000e+00> : vector<4x128xf32>
    %167 = tpu.matmul %164, %21, %cst_26 {dimension_numbers = #tpu.dot_dimension_numbers<[1], [0], [0], [1], [0, 0, 1, 1], [], []>} : vector<4x64xf32>, vector<64x128xf32>, vector<4x128xf32> -> vector<4x128xf32>
    %168 = arith.addf %43, %167 : vector<4x128xf32>
    %169 = math.tanh %168 : vector<4x128xf32>
    %170 = arith.negf %168 : vector<4x128xf32>
    %171 = math.exp %170 : vector<4x128xf32>
    %cst_27 = arith.constant 1.000000e+00 : f32
    %172 = vector.broadcast %cst_27 : f32 to vector<4x128xf32>
    %173 = arith.addf %172, %171 : vector<4x128xf32>
    %174 = arith.divf %172, %173 : vector<4x128xf32>
    %175 = arith.select %5, %169, %174 : vector<4x128xi1>, vector<4x128xf32>
    %176 = vector.extract_strided_slice %175 {offsets = [0, 0], sizes = [4, 32], strides = [1, 1]} : vector<4x128xf32> to vector<4x32xf32>
    %177 = vector.extract_strided_slice %175 {offsets = [0, 32], sizes = [4, 32], strides = [1, 1]} : vector<4x128xf32> to vector<4x32xf32>
    %178 = vector.extract_strided_slice %175 {offsets = [0, 64], sizes = [4, 32], strides = [1, 1]} : vector<4x128xf32> to vector<4x32xf32>
    %179 = vector.extract_strided_slice %175 {offsets = [0, 96], sizes = [4, 32], strides = [1, 1]} : vector<4x128xf32> to vector<4x32xf32>
    %180 = arith.mulf %177, %159 : vector<4x32xf32>
    %181 = arith.mulf %176, %178 : vector<4x32xf32>
    %182 = arith.addf %180, %181 : vector<4x32xf32>
    %183 = math.tanh %182 : vector<4x32xf32>
    %184 = arith.mulf %179, %183 : vector<4x32xf32>
    %185 = tpu.concatenate %184, %184 in 1 : vector<4x32xf32>, vector<4x32xf32> -> vector<4x64xf32>
    %cst_28 = arith.constant 0.000000e+00 : f32
    %186 = vector.broadcast %cst_28 : f32 to vector<4x64xf32>
    %187 = arith.select %18, %185, %186 : vector<4x64xi1>, vector<4x64xf32>
    %188 = vector.extract_strided_slice %184 {offsets = [0, 0], sizes = [2, 32], strides = [1, 1]} : vector<4x32xf32> to vector<2x32xf32>
    %189 = vector.extract_strided_slice %184 {offsets = [2, 0], sizes = [2, 32], strides = [1, 1]} : vector<4x32xf32> to vector<2x32xf32>
    %cst_29 = arith.constant dense<0.000000e+00> : vector<4x128xf32>
    %190 = tpu.matmul %187, %21, %cst_29 {dimension_numbers = #tpu.dot_dimension_numbers<[1], [0], [0], [1], [0, 0, 1, 1], [], []>} : vector<4x64xf32>, vector<64x128xf32>, vector<4x128xf32> -> vector<4x128xf32>
    %191 = arith.addf %46, %190 : vector<4x128xf32>
    %192 = math.tanh %191 : vector<4x128xf32>
    %193 = arith.negf %191 : vector<4x128xf32>
    %194 = math.exp %193 : vector<4x128xf32>
    %cst_30 = arith.constant 1.000000e+00 : f32
    %195 = vector.broadcast %cst_30 : f32 to vector<4x128xf32>
    %196 = arith.addf %195, %194 : vector<4x128xf32>
    %197 = arith.divf %195, %196 : vector<4x128xf32>
    %198 = arith.select %5, %192, %197 : vector<4x128xi1>, vector<4x128xf32>
    %199 = vector.extract_strided_slice %198 {offsets = [0, 0], sizes = [4, 32], strides = [1, 1]} : vector<4x128xf32> to vector<4x32xf32>
    %200 = vector.extract_strided_slice %198 {offsets = [0, 32], sizes = [4, 32], strides = [1, 1]} : vector<4x128xf32> to vector<4x32xf32>
    %201 = vector.extract_strided_slice %198 {offsets = [0, 64], sizes = [4, 32], strides = [1, 1]} : vector<4x128xf32> to vector<4x32xf32>
    %202 = vector.extract_strided_slice %198 {offsets = [0, 96], sizes = [4, 32], strides = [1, 1]} : vector<4x128xf32> to vector<4x32xf32>
    %203 = arith.mulf %200, %182 : vector<4x32xf32>
    %204 = arith.mulf %199, %201 : vector<4x32xf32>
    %205 = arith.addf %203, %204 : vector<4x32xf32>
    %206 = math.tanh %205 : vector<4x32xf32>
    %207 = arith.mulf %202, %206 : vector<4x32xf32>
    %208 = tpu.concatenate %207, %207 in 1 : vector<4x32xf32>, vector<4x32xf32> -> vector<4x64xf32>
    %cst_31 = arith.constant 0.000000e+00 : f32
    %209 = vector.broadcast %cst_31 : f32 to vector<4x64xf32>
    %210 = arith.select %18, %208, %209 : vector<4x64xi1>, vector<4x64xf32>
    %211 = vector.extract_strided_slice %207 {offsets = [0, 0], sizes = [2, 32], strides = [1, 1]} : vector<4x32xf32> to vector<2x32xf32>
    %212 = vector.extract_strided_slice %207 {offsets = [2, 0], sizes = [2, 32], strides = [1, 1]} : vector<4x32xf32> to vector<2x32xf32>
    %cst_32 = arith.constant dense<0.000000e+00> : vector<4x128xf32>
    %213 = tpu.matmul %210, %21, %cst_32 {dimension_numbers = #tpu.dot_dimension_numbers<[1], [0], [0], [1], [0, 0, 1, 1], [], []>} : vector<4x64xf32>, vector<64x128xf32>, vector<4x128xf32> -> vector<4x128xf32>
    %214 = arith.addf %49, %213 : vector<4x128xf32>
    %215 = math.tanh %214 : vector<4x128xf32>
    %216 = arith.negf %214 : vector<4x128xf32>
    %217 = math.exp %216 : vector<4x128xf32>
    %cst_33 = arith.constant 1.000000e+00 : f32
    %218 = vector.broadcast %cst_33 : f32 to vector<4x128xf32>
    %219 = arith.addf %218, %217 : vector<4x128xf32>
    %220 = arith.divf %218, %219 : vector<4x128xf32>
    %221 = arith.select %5, %215, %220 : vector<4x128xi1>, vector<4x128xf32>
    %222 = vector.extract_strided_slice %221 {offsets = [0, 0], sizes = [4, 32], strides = [1, 1]} : vector<4x128xf32> to vector<4x32xf32>
    %223 = vector.extract_strided_slice %221 {offsets = [0, 32], sizes = [4, 32], strides = [1, 1]} : vector<4x128xf32> to vector<4x32xf32>
    %224 = vector.extract_strided_slice %221 {offsets = [0, 64], sizes = [4, 32], strides = [1, 1]} : vector<4x128xf32> to vector<4x32xf32>
    %225 = vector.extract_strided_slice %221 {offsets = [0, 96], sizes = [4, 32], strides = [1, 1]} : vector<4x128xf32> to vector<4x32xf32>
    %226 = arith.mulf %223, %205 : vector<4x32xf32>
    %227 = arith.mulf %222, %224 : vector<4x32xf32>
    %228 = arith.addf %226, %227 : vector<4x32xf32>
    %229 = math.tanh %228 : vector<4x32xf32>
    %230 = arith.mulf %225, %229 : vector<4x32xf32>
    %231 = vector.extract_strided_slice %230 {offsets = [0, 0], sizes = [2, 32], strides = [1, 1]} : vector<4x32xf32> to vector<2x32xf32>
    %232 = vector.extract_strided_slice %230 {offsets = [2, 0], sizes = [2, 32], strides = [1, 1]} : vector<4x32xf32> to vector<2x32xf32>
    %233 = tpu.concatenate %73, %232 in 1 : vector<2x32xf32>, vector<2x32xf32> -> vector<2x64xf32>
    %234 = tpu.concatenate %96, %212 in 1 : vector<2x32xf32>, vector<2x32xf32> -> vector<2x64xf32>
    %235 = tpu.concatenate %119, %189 in 1 : vector<2x32xf32>, vector<2x32xf32> -> vector<2x64xf32>
    %236 = tpu.concatenate %142, %166 in 1 : vector<2x32xf32>, vector<2x32xf32> -> vector<2x64xf32>
    %237 = tpu.concatenate %165, %143 in 1 : vector<2x32xf32>, vector<2x32xf32> -> vector<2x64xf32>
    %238 = tpu.concatenate %188, %120 in 1 : vector<2x32xf32>, vector<2x32xf32> -> vector<2x64xf32>
    %239 = tpu.concatenate %211, %97 in 1 : vector<2x32xf32>, vector<2x32xf32> -> vector<2x64xf32>
    %240 = tpu.concatenate %231, %74 in 1 : vector<2x32xf32>, vector<2x32xf32> -> vector<2x64xf32>
    %241 = tpu.concatenate %233, %234, %235, %236, %237, %238, %239, %240 in 0 : vector<2x64xf32>, vector<2x64xf32>, vector<2x64xf32>, vector<2x64xf32>, vector<2x64xf32>, vector<2x64xf32>, vector<2x64xf32>, vector<2x64xf32> -> vector<16x64xf32>
    %c0_34 = arith.constant 0 : index
    %c0_35 = arith.constant 0 : index
    %242 = vector.load %arg4[%c0_34, %c0_35] : memref<64x256xf32, #tpu.memory_space<vmem>>, vector<64x256xf32>
    %c0_36 = arith.constant 0 : index
    %c0_37 = arith.constant 0 : index
    %243 = vector.load %arg5[%c0_36, %c0_37] : memref<64x128xf32, #tpu.memory_space<vmem>>, vector<64x128xf32>
    %c0_38 = arith.constant 0 : index
    %c0_39 = arith.constant 0 : index
    %244 = vector.load %arg6[%c0_38, %c0_39] : memref<1x256xf32, #tpu.memory_space<vmem>>, vector<1x256xf32>
    %cst_40 = arith.constant dense<0.000000e+00> : vector<16x256xf32>
    %245 = tpu.matmul %241, %242, %cst_40 {dimension_numbers = #tpu.dot_dimension_numbers<[1], [0], [0], [1], [0, 0, 1, 1], [], []>} : vector<16x64xf32>, vector<64x256xf32>, vector<16x256xf32> -> vector<16x256xf32>
    %246 = vector.broadcast %244 : vector<1x256xf32> to vector<16x256xf32>
    %247 = arith.addf %245, %246 : vector<16x256xf32>
    %248 = vector.extract_strided_slice %247 {offsets = [0, 0], sizes = [2, 128], strides = [1, 1]} : vector<16x256xf32> to vector<2x128xf32>
    %249 = vector.extract_strided_slice %247 {offsets = [14, 128], sizes = [2, 128], strides = [1, 1]} : vector<16x256xf32> to vector<2x128xf32>
    %250 = tpu.concatenate %248, %249 in 0 : vector<2x128xf32>, vector<2x128xf32> -> vector<4x128xf32>
    %251 = vector.extract_strided_slice %247 {offsets = [2, 0], sizes = [2, 128], strides = [1, 1]} : vector<16x256xf32> to vector<2x128xf32>
    %252 = vector.extract_strided_slice %247 {offsets = [12, 128], sizes = [2, 128], strides = [1, 1]} : vector<16x256xf32> to vector<2x128xf32>
    %253 = tpu.concatenate %251, %252 in 0 : vector<2x128xf32>, vector<2x128xf32> -> vector<4x128xf32>
    %254 = vector.extract_strided_slice %247 {offsets = [4, 0], sizes = [2, 128], strides = [1, 1]} : vector<16x256xf32> to vector<2x128xf32>
    %255 = vector.extract_strided_slice %247 {offsets = [10, 128], sizes = [2, 128], strides = [1, 1]} : vector<16x256xf32> to vector<2x128xf32>
    %256 = tpu.concatenate %254, %255 in 0 : vector<2x128xf32>, vector<2x128xf32> -> vector<4x128xf32>
    %257 = vector.extract_strided_slice %247 {offsets = [6, 0], sizes = [2, 128], strides = [1, 1]} : vector<16x256xf32> to vector<2x128xf32>
    %258 = vector.extract_strided_slice %247 {offsets = [8, 128], sizes = [2, 128], strides = [1, 1]} : vector<16x256xf32> to vector<2x128xf32>
    %259 = tpu.concatenate %257, %258 in 0 : vector<2x128xf32>, vector<2x128xf32> -> vector<4x128xf32>
    %260 = vector.extract_strided_slice %247 {offsets = [8, 0], sizes = [2, 128], strides = [1, 1]} : vector<16x256xf32> to vector<2x128xf32>
    %261 = vector.extract_strided_slice %247 {offsets = [6, 128], sizes = [2, 128], strides = [1, 1]} : vector<16x256xf32> to vector<2x128xf32>
    %262 = tpu.concatenate %260, %261 in 0 : vector<2x128xf32>, vector<2x128xf32> -> vector<4x128xf32>
    %263 = vector.extract_strided_slice %247 {offsets = [10, 0], sizes = [2, 128], strides = [1, 1]} : vector<16x256xf32> to vector<2x128xf32>
    %264 = vector.extract_strided_slice %247 {offsets = [4, 128], sizes = [2, 128], strides = [1, 1]} : vector<16x256xf32> to vector<2x128xf32>
    %265 = tpu.concatenate %263, %264 in 0 : vector<2x128xf32>, vector<2x128xf32> -> vector<4x128xf32>
    %266 = vector.extract_strided_slice %247 {offsets = [12, 0], sizes = [2, 128], strides = [1, 1]} : vector<16x256xf32> to vector<2x128xf32>
    %267 = vector.extract_strided_slice %247 {offsets = [2, 128], sizes = [2, 128], strides = [1, 1]} : vector<16x256xf32> to vector<2x128xf32>
    %268 = tpu.concatenate %266, %267 in 0 : vector<2x128xf32>, vector<2x128xf32> -> vector<4x128xf32>
    %269 = vector.extract_strided_slice %247 {offsets = [14, 0], sizes = [2, 128], strides = [1, 1]} : vector<16x256xf32> to vector<2x128xf32>
    %270 = vector.extract_strided_slice %247 {offsets = [0, 128], sizes = [2, 128], strides = [1, 1]} : vector<16x256xf32> to vector<2x128xf32>
    %271 = tpu.concatenate %269, %270 in 0 : vector<2x128xf32>, vector<2x128xf32> -> vector<4x128xf32>
    %cst_41 = arith.constant 0.000000e+00 : f32
    %272 = vector.broadcast %cst_41 : f32 to vector<4x64xf32>
    %cst_42 = arith.constant 0.000000e+00 : f32
    %273 = vector.broadcast %cst_42 : f32 to vector<4x32xf32>
    %cst_43 = arith.constant dense<0.000000e+00> : vector<4x128xf32>
    %274 = tpu.matmul %272, %243, %cst_43 {dimension_numbers = #tpu.dot_dimension_numbers<[1], [0], [0], [1], [0, 0, 1, 1], [], []>} : vector<4x64xf32>, vector<64x128xf32>, vector<4x128xf32> -> vector<4x128xf32>
    %275 = arith.addf %250, %274 : vector<4x128xf32>
    %276 = math.tanh %275 : vector<4x128xf32>
    %277 = arith.negf %275 : vector<4x128xf32>
    %278 = math.exp %277 : vector<4x128xf32>
    %cst_44 = arith.constant 1.000000e+00 : f32
    %279 = vector.broadcast %cst_44 : f32 to vector<4x128xf32>
    %280 = arith.addf %279, %278 : vector<4x128xf32>
    %281 = arith.divf %279, %280 : vector<4x128xf32>
    %282 = arith.select %5, %276, %281 : vector<4x128xi1>, vector<4x128xf32>
    %283 = vector.extract_strided_slice %282 {offsets = [0, 0], sizes = [4, 32], strides = [1, 1]} : vector<4x128xf32> to vector<4x32xf32>
    %284 = vector.extract_strided_slice %282 {offsets = [0, 32], sizes = [4, 32], strides = [1, 1]} : vector<4x128xf32> to vector<4x32xf32>
    %285 = vector.extract_strided_slice %282 {offsets = [0, 64], sizes = [4, 32], strides = [1, 1]} : vector<4x128xf32> to vector<4x32xf32>
    %286 = vector.extract_strided_slice %282 {offsets = [0, 96], sizes = [4, 32], strides = [1, 1]} : vector<4x128xf32> to vector<4x32xf32>
    %287 = arith.mulf %284, %273 : vector<4x32xf32>
    %288 = arith.mulf %283, %285 : vector<4x32xf32>
    %289 = arith.addf %287, %288 : vector<4x32xf32>
    %290 = math.tanh %289 : vector<4x32xf32>
    %291 = arith.mulf %286, %290 : vector<4x32xf32>
    %292 = tpu.concatenate %291, %291 in 1 : vector<4x32xf32>, vector<4x32xf32> -> vector<4x64xf32>
    %cst_45 = arith.constant 0.000000e+00 : f32
    %293 = vector.broadcast %cst_45 : f32 to vector<4x64xf32>
    %294 = arith.select %18, %292, %293 : vector<4x64xi1>, vector<4x64xf32>
    %295 = vector.extract_strided_slice %291 {offsets = [0, 0], sizes = [2, 32], strides = [1, 1]} : vector<4x32xf32> to vector<2x32xf32>
    %296 = vector.extract_strided_slice %291 {offsets = [2, 0], sizes = [2, 32], strides = [1, 1]} : vector<4x32xf32> to vector<2x32xf32>
    %cst_46 = arith.constant dense<0.000000e+00> : vector<4x128xf32>
    %297 = tpu.matmul %294, %243, %cst_46 {dimension_numbers = #tpu.dot_dimension_numbers<[1], [0], [0], [1], [0, 0, 1, 1], [], []>} : vector<4x64xf32>, vector<64x128xf32>, vector<4x128xf32> -> vector<4x128xf32>
    %298 = arith.addf %253, %297 : vector<4x128xf32>
    %299 = math.tanh %298 : vector<4x128xf32>
    %300 = arith.negf %298 : vector<4x128xf32>
    %301 = math.exp %300 : vector<4x128xf32>
    %cst_47 = arith.constant 1.000000e+00 : f32
    %302 = vector.broadcast %cst_47 : f32 to vector<4x128xf32>
    %303 = arith.addf %302, %301 : vector<4x128xf32>
    %304 = arith.divf %302, %303 : vector<4x128xf32>
    %305 = arith.select %5, %299, %304 : vector<4x128xi1>, vector<4x128xf32>
    %306 = vector.extract_strided_slice %305 {offsets = [0, 0], sizes = [4, 32], strides = [1, 1]} : vector<4x128xf32> to vector<4x32xf32>
    %307 = vector.extract_strided_slice %305 {offsets = [0, 32], sizes = [4, 32], strides = [1, 1]} : vector<4x128xf32> to vector<4x32xf32>
    %308 = vector.extract_strided_slice %305 {offsets = [0, 64], sizes = [4, 32], strides = [1, 1]} : vector<4x128xf32> to vector<4x32xf32>
    %309 = vector.extract_strided_slice %305 {offsets = [0, 96], sizes = [4, 32], strides = [1, 1]} : vector<4x128xf32> to vector<4x32xf32>
    %310 = arith.mulf %307, %289 : vector<4x32xf32>
    %311 = arith.mulf %306, %308 : vector<4x32xf32>
    %312 = arith.addf %310, %311 : vector<4x32xf32>
    %313 = math.tanh %312 : vector<4x32xf32>
    %314 = arith.mulf %309, %313 : vector<4x32xf32>
    %315 = tpu.concatenate %314, %314 in 1 : vector<4x32xf32>, vector<4x32xf32> -> vector<4x64xf32>
    %cst_48 = arith.constant 0.000000e+00 : f32
    %316 = vector.broadcast %cst_48 : f32 to vector<4x64xf32>
    %317 = arith.select %18, %315, %316 : vector<4x64xi1>, vector<4x64xf32>
    %318 = vector.extract_strided_slice %314 {offsets = [0, 0], sizes = [2, 32], strides = [1, 1]} : vector<4x32xf32> to vector<2x32xf32>
    %319 = vector.extract_strided_slice %314 {offsets = [2, 0], sizes = [2, 32], strides = [1, 1]} : vector<4x32xf32> to vector<2x32xf32>
    %cst_49 = arith.constant dense<0.000000e+00> : vector<4x128xf32>
    %320 = tpu.matmul %317, %243, %cst_49 {dimension_numbers = #tpu.dot_dimension_numbers<[1], [0], [0], [1], [0, 0, 1, 1], [], []>} : vector<4x64xf32>, vector<64x128xf32>, vector<4x128xf32> -> vector<4x128xf32>
    %321 = arith.addf %256, %320 : vector<4x128xf32>
    %322 = math.tanh %321 : vector<4x128xf32>
    %323 = arith.negf %321 : vector<4x128xf32>
    %324 = math.exp %323 : vector<4x128xf32>
    %cst_50 = arith.constant 1.000000e+00 : f32
    %325 = vector.broadcast %cst_50 : f32 to vector<4x128xf32>
    %326 = arith.addf %325, %324 : vector<4x128xf32>
    %327 = arith.divf %325, %326 : vector<4x128xf32>
    %328 = arith.select %5, %322, %327 : vector<4x128xi1>, vector<4x128xf32>
    %329 = vector.extract_strided_slice %328 {offsets = [0, 0], sizes = [4, 32], strides = [1, 1]} : vector<4x128xf32> to vector<4x32xf32>
    %330 = vector.extract_strided_slice %328 {offsets = [0, 32], sizes = [4, 32], strides = [1, 1]} : vector<4x128xf32> to vector<4x32xf32>
    %331 = vector.extract_strided_slice %328 {offsets = [0, 64], sizes = [4, 32], strides = [1, 1]} : vector<4x128xf32> to vector<4x32xf32>
    %332 = vector.extract_strided_slice %328 {offsets = [0, 96], sizes = [4, 32], strides = [1, 1]} : vector<4x128xf32> to vector<4x32xf32>
    %333 = arith.mulf %330, %312 : vector<4x32xf32>
    %334 = arith.mulf %329, %331 : vector<4x32xf32>
    %335 = arith.addf %333, %334 : vector<4x32xf32>
    %336 = math.tanh %335 : vector<4x32xf32>
    %337 = arith.mulf %332, %336 : vector<4x32xf32>
    %338 = tpu.concatenate %337, %337 in 1 : vector<4x32xf32>, vector<4x32xf32> -> vector<4x64xf32>
    %cst_51 = arith.constant 0.000000e+00 : f32
    %339 = vector.broadcast %cst_51 : f32 to vector<4x64xf32>
    %340 = arith.select %18, %338, %339 : vector<4x64xi1>, vector<4x64xf32>
    %341 = vector.extract_strided_slice %337 {offsets = [0, 0], sizes = [2, 32], strides = [1, 1]} : vector<4x32xf32> to vector<2x32xf32>
    %342 = vector.extract_strided_slice %337 {offsets = [2, 0], sizes = [2, 32], strides = [1, 1]} : vector<4x32xf32> to vector<2x32xf32>
    %cst_52 = arith.constant dense<0.000000e+00> : vector<4x128xf32>
    %343 = tpu.matmul %340, %243, %cst_52 {dimension_numbers = #tpu.dot_dimension_numbers<[1], [0], [0], [1], [0, 0, 1, 1], [], []>} : vector<4x64xf32>, vector<64x128xf32>, vector<4x128xf32> -> vector<4x128xf32>
    %344 = arith.addf %259, %343 : vector<4x128xf32>
    %345 = math.tanh %344 : vector<4x128xf32>
    %346 = arith.negf %344 : vector<4x128xf32>
    %347 = math.exp %346 : vector<4x128xf32>
    %cst_53 = arith.constant 1.000000e+00 : f32
    %348 = vector.broadcast %cst_53 : f32 to vector<4x128xf32>
    %349 = arith.addf %348, %347 : vector<4x128xf32>
    %350 = arith.divf %348, %349 : vector<4x128xf32>
    %351 = arith.select %5, %345, %350 : vector<4x128xi1>, vector<4x128xf32>
    %352 = vector.extract_strided_slice %351 {offsets = [0, 0], sizes = [4, 32], strides = [1, 1]} : vector<4x128xf32> to vector<4x32xf32>
    %353 = vector.extract_strided_slice %351 {offsets = [0, 32], sizes = [4, 32], strides = [1, 1]} : vector<4x128xf32> to vector<4x32xf32>
    %354 = vector.extract_strided_slice %351 {offsets = [0, 64], sizes = [4, 32], strides = [1, 1]} : vector<4x128xf32> to vector<4x32xf32>
    %355 = vector.extract_strided_slice %351 {offsets = [0, 96], sizes = [4, 32], strides = [1, 1]} : vector<4x128xf32> to vector<4x32xf32>
    %356 = arith.mulf %353, %335 : vector<4x32xf32>
    %357 = arith.mulf %352, %354 : vector<4x32xf32>
    %358 = arith.addf %356, %357 : vector<4x32xf32>
    %359 = math.tanh %358 : vector<4x32xf32>
    %360 = arith.mulf %355, %359 : vector<4x32xf32>
    %361 = tpu.concatenate %360, %360 in 1 : vector<4x32xf32>, vector<4x32xf32> -> vector<4x64xf32>
    %cst_54 = arith.constant 0.000000e+00 : f32
    %362 = vector.broadcast %cst_54 : f32 to vector<4x64xf32>
    %363 = arith.select %18, %361, %362 : vector<4x64xi1>, vector<4x64xf32>
    %364 = vector.extract_strided_slice %360 {offsets = [0, 0], sizes = [2, 32], strides = [1, 1]} : vector<4x32xf32> to vector<2x32xf32>
    %365 = vector.extract_strided_slice %360 {offsets = [2, 0], sizes = [2, 32], strides = [1, 1]} : vector<4x32xf32> to vector<2x32xf32>
    %cst_55 = arith.constant dense<0.000000e+00> : vector<4x128xf32>
    %366 = tpu.matmul %363, %243, %cst_55 {dimension_numbers = #tpu.dot_dimension_numbers<[1], [0], [0], [1], [0, 0, 1, 1], [], []>} : vector<4x64xf32>, vector<64x128xf32>, vector<4x128xf32> -> vector<4x128xf32>
    %367 = arith.addf %262, %366 : vector<4x128xf32>
    %368 = math.tanh %367 : vector<4x128xf32>
    %369 = arith.negf %367 : vector<4x128xf32>
    %370 = math.exp %369 : vector<4x128xf32>
    %cst_56 = arith.constant 1.000000e+00 : f32
    %371 = vector.broadcast %cst_56 : f32 to vector<4x128xf32>
    %372 = arith.addf %371, %370 : vector<4x128xf32>
    %373 = arith.divf %371, %372 : vector<4x128xf32>
    %374 = arith.select %5, %368, %373 : vector<4x128xi1>, vector<4x128xf32>
    %375 = vector.extract_strided_slice %374 {offsets = [0, 0], sizes = [4, 32], strides = [1, 1]} : vector<4x128xf32> to vector<4x32xf32>
    %376 = vector.extract_strided_slice %374 {offsets = [0, 32], sizes = [4, 32], strides = [1, 1]} : vector<4x128xf32> to vector<4x32xf32>
    %377 = vector.extract_strided_slice %374 {offsets = [0, 64], sizes = [4, 32], strides = [1, 1]} : vector<4x128xf32> to vector<4x32xf32>
    %378 = vector.extract_strided_slice %374 {offsets = [0, 96], sizes = [4, 32], strides = [1, 1]} : vector<4x128xf32> to vector<4x32xf32>
    %379 = arith.mulf %376, %358 : vector<4x32xf32>
    %380 = arith.mulf %375, %377 : vector<4x32xf32>
    %381 = arith.addf %379, %380 : vector<4x32xf32>
    %382 = math.tanh %381 : vector<4x32xf32>
    %383 = arith.mulf %378, %382 : vector<4x32xf32>
    %384 = tpu.concatenate %383, %383 in 1 : vector<4x32xf32>, vector<4x32xf32> -> vector<4x64xf32>
    %cst_57 = arith.constant 0.000000e+00 : f32
    %385 = vector.broadcast %cst_57 : f32 to vector<4x64xf32>
    %386 = arith.select %18, %384, %385 : vector<4x64xi1>, vector<4x64xf32>
    %387 = vector.extract_strided_slice %383 {offsets = [0, 0], sizes = [2, 32], strides = [1, 1]} : vector<4x32xf32> to vector<2x32xf32>
    %388 = vector.extract_strided_slice %383 {offsets = [2, 0], sizes = [2, 32], strides = [1, 1]} : vector<4x32xf32> to vector<2x32xf32>
    %cst_58 = arith.constant dense<0.000000e+00> : vector<4x128xf32>
    %389 = tpu.matmul %386, %243, %cst_58 {dimension_numbers = #tpu.dot_dimension_numbers<[1], [0], [0], [1], [0, 0, 1, 1], [], []>} : vector<4x64xf32>, vector<64x128xf32>, vector<4x128xf32> -> vector<4x128xf32>
    %390 = arith.addf %265, %389 : vector<4x128xf32>
    %391 = math.tanh %390 : vector<4x128xf32>
    %392 = arith.negf %390 : vector<4x128xf32>
    %393 = math.exp %392 : vector<4x128xf32>
    %cst_59 = arith.constant 1.000000e+00 : f32
    %394 = vector.broadcast %cst_59 : f32 to vector<4x128xf32>
    %395 = arith.addf %394, %393 : vector<4x128xf32>
    %396 = arith.divf %394, %395 : vector<4x128xf32>
    %397 = arith.select %5, %391, %396 : vector<4x128xi1>, vector<4x128xf32>
    %398 = vector.extract_strided_slice %397 {offsets = [0, 0], sizes = [4, 32], strides = [1, 1]} : vector<4x128xf32> to vector<4x32xf32>
    %399 = vector.extract_strided_slice %397 {offsets = [0, 32], sizes = [4, 32], strides = [1, 1]} : vector<4x128xf32> to vector<4x32xf32>
    %400 = vector.extract_strided_slice %397 {offsets = [0, 64], sizes = [4, 32], strides = [1, 1]} : vector<4x128xf32> to vector<4x32xf32>
    %401 = vector.extract_strided_slice %397 {offsets = [0, 96], sizes = [4, 32], strides = [1, 1]} : vector<4x128xf32> to vector<4x32xf32>
    %402 = arith.mulf %399, %381 : vector<4x32xf32>
    %403 = arith.mulf %398, %400 : vector<4x32xf32>
    %404 = arith.addf %402, %403 : vector<4x32xf32>
    %405 = math.tanh %404 : vector<4x32xf32>
    %406 = arith.mulf %401, %405 : vector<4x32xf32>
    %407 = tpu.concatenate %406, %406 in 1 : vector<4x32xf32>, vector<4x32xf32> -> vector<4x64xf32>
    %cst_60 = arith.constant 0.000000e+00 : f32
    %408 = vector.broadcast %cst_60 : f32 to vector<4x64xf32>
    %409 = arith.select %18, %407, %408 : vector<4x64xi1>, vector<4x64xf32>
    %410 = vector.extract_strided_slice %406 {offsets = [0, 0], sizes = [2, 32], strides = [1, 1]} : vector<4x32xf32> to vector<2x32xf32>
    %411 = vector.extract_strided_slice %406 {offsets = [2, 0], sizes = [2, 32], strides = [1, 1]} : vector<4x32xf32> to vector<2x32xf32>
    %cst_61 = arith.constant dense<0.000000e+00> : vector<4x128xf32>
    %412 = tpu.matmul %409, %243, %cst_61 {dimension_numbers = #tpu.dot_dimension_numbers<[1], [0], [0], [1], [0, 0, 1, 1], [], []>} : vector<4x64xf32>, vector<64x128xf32>, vector<4x128xf32> -> vector<4x128xf32>
    %413 = arith.addf %268, %412 : vector<4x128xf32>
    %414 = math.tanh %413 : vector<4x128xf32>
    %415 = arith.negf %413 : vector<4x128xf32>
    %416 = math.exp %415 : vector<4x128xf32>
    %cst_62 = arith.constant 1.000000e+00 : f32
    %417 = vector.broadcast %cst_62 : f32 to vector<4x128xf32>
    %418 = arith.addf %417, %416 : vector<4x128xf32>
    %419 = arith.divf %417, %418 : vector<4x128xf32>
    %420 = arith.select %5, %414, %419 : vector<4x128xi1>, vector<4x128xf32>
    %421 = vector.extract_strided_slice %420 {offsets = [0, 0], sizes = [4, 32], strides = [1, 1]} : vector<4x128xf32> to vector<4x32xf32>
    %422 = vector.extract_strided_slice %420 {offsets = [0, 32], sizes = [4, 32], strides = [1, 1]} : vector<4x128xf32> to vector<4x32xf32>
    %423 = vector.extract_strided_slice %420 {offsets = [0, 64], sizes = [4, 32], strides = [1, 1]} : vector<4x128xf32> to vector<4x32xf32>
    %424 = vector.extract_strided_slice %420 {offsets = [0, 96], sizes = [4, 32], strides = [1, 1]} : vector<4x128xf32> to vector<4x32xf32>
    %425 = arith.mulf %422, %404 : vector<4x32xf32>
    %426 = arith.mulf %421, %423 : vector<4x32xf32>
    %427 = arith.addf %425, %426 : vector<4x32xf32>
    %428 = math.tanh %427 : vector<4x32xf32>
    %429 = arith.mulf %424, %428 : vector<4x32xf32>
    %430 = tpu.concatenate %429, %429 in 1 : vector<4x32xf32>, vector<4x32xf32> -> vector<4x64xf32>
    %cst_63 = arith.constant 0.000000e+00 : f32
    %431 = vector.broadcast %cst_63 : f32 to vector<4x64xf32>
    %432 = arith.select %18, %430, %431 : vector<4x64xi1>, vector<4x64xf32>
    %433 = vector.extract_strided_slice %429 {offsets = [0, 0], sizes = [2, 32], strides = [1, 1]} : vector<4x32xf32> to vector<2x32xf32>
    %434 = vector.extract_strided_slice %429 {offsets = [2, 0], sizes = [2, 32], strides = [1, 1]} : vector<4x32xf32> to vector<2x32xf32>
    %cst_64 = arith.constant dense<0.000000e+00> : vector<4x128xf32>
    %435 = tpu.matmul %432, %243, %cst_64 {dimension_numbers = #tpu.dot_dimension_numbers<[1], [0], [0], [1], [0, 0, 1, 1], [], []>} : vector<4x64xf32>, vector<64x128xf32>, vector<4x128xf32> -> vector<4x128xf32>
    %436 = arith.addf %271, %435 : vector<4x128xf32>
    %437 = math.tanh %436 : vector<4x128xf32>
    %438 = arith.negf %436 : vector<4x128xf32>
    %439 = math.exp %438 : vector<4x128xf32>
    %cst_65 = arith.constant 1.000000e+00 : f32
    %440 = vector.broadcast %cst_65 : f32 to vector<4x128xf32>
    %441 = arith.addf %440, %439 : vector<4x128xf32>
    %442 = arith.divf %440, %441 : vector<4x128xf32>
    %443 = arith.select %5, %437, %442 : vector<4x128xi1>, vector<4x128xf32>
    %444 = vector.extract_strided_slice %443 {offsets = [0, 0], sizes = [4, 32], strides = [1, 1]} : vector<4x128xf32> to vector<4x32xf32>
    %445 = vector.extract_strided_slice %443 {offsets = [0, 32], sizes = [4, 32], strides = [1, 1]} : vector<4x128xf32> to vector<4x32xf32>
    %446 = vector.extract_strided_slice %443 {offsets = [0, 64], sizes = [4, 32], strides = [1, 1]} : vector<4x128xf32> to vector<4x32xf32>
    %447 = vector.extract_strided_slice %443 {offsets = [0, 96], sizes = [4, 32], strides = [1, 1]} : vector<4x128xf32> to vector<4x32xf32>
    %448 = arith.mulf %445, %427 : vector<4x32xf32>
    %449 = arith.mulf %444, %446 : vector<4x32xf32>
    %450 = arith.addf %448, %449 : vector<4x32xf32>
    %451 = math.tanh %450 : vector<4x32xf32>
    %452 = arith.mulf %447, %451 : vector<4x32xf32>
    %453 = vector.extract_strided_slice %452 {offsets = [0, 0], sizes = [2, 32], strides = [1, 1]} : vector<4x32xf32> to vector<2x32xf32>
    %454 = vector.extract_strided_slice %452 {offsets = [2, 0], sizes = [2, 32], strides = [1, 1]} : vector<4x32xf32> to vector<2x32xf32>
    %455 = tpu.concatenate %295, %454 in 1 : vector<2x32xf32>, vector<2x32xf32> -> vector<2x64xf32>
    %456 = tpu.concatenate %318, %434 in 1 : vector<2x32xf32>, vector<2x32xf32> -> vector<2x64xf32>
    %457 = tpu.concatenate %341, %411 in 1 : vector<2x32xf32>, vector<2x32xf32> -> vector<2x64xf32>
    %458 = tpu.concatenate %364, %388 in 1 : vector<2x32xf32>, vector<2x32xf32> -> vector<2x64xf32>
    %459 = tpu.concatenate %387, %365 in 1 : vector<2x32xf32>, vector<2x32xf32> -> vector<2x64xf32>
    %460 = tpu.concatenate %410, %342 in 1 : vector<2x32xf32>, vector<2x32xf32> -> vector<2x64xf32>
    %461 = tpu.concatenate %433, %319 in 1 : vector<2x32xf32>, vector<2x32xf32> -> vector<2x64xf32>
    %462 = tpu.concatenate %453, %296 in 1 : vector<2x32xf32>, vector<2x32xf32> -> vector<2x64xf32>
    %463 = tpu.concatenate %455, %456, %457, %458, %459, %460, %461, %462 in 0 : vector<2x64xf32>, vector<2x64xf32>, vector<2x64xf32>, vector<2x64xf32>, vector<2x64xf32>, vector<2x64xf32>, vector<2x64xf32>, vector<2x64xf32> -> vector<16x64xf32>
    %c0_66 = arith.constant 0 : index
    %c0_67 = arith.constant 0 : index
    %464 = vector.load %arg7[%c0_66, %c0_67] : memref<64x256xf32, #tpu.memory_space<vmem>>, vector<64x256xf32>
    %c0_68 = arith.constant 0 : index
    %c0_69 = arith.constant 0 : index
    %465 = vector.load %arg8[%c0_68, %c0_69] : memref<64x128xf32, #tpu.memory_space<vmem>>, vector<64x128xf32>
    %c0_70 = arith.constant 0 : index
    %c0_71 = arith.constant 0 : index
    %466 = vector.load %arg9[%c0_70, %c0_71] : memref<1x256xf32, #tpu.memory_space<vmem>>, vector<1x256xf32>
    %cst_72 = arith.constant dense<0.000000e+00> : vector<16x256xf32>
    %467 = tpu.matmul %463, %464, %cst_72 {dimension_numbers = #tpu.dot_dimension_numbers<[1], [0], [0], [1], [0, 0, 1, 1], [], []>} : vector<16x64xf32>, vector<64x256xf32>, vector<16x256xf32> -> vector<16x256xf32>
    %468 = vector.broadcast %466 : vector<1x256xf32> to vector<16x256xf32>
    %469 = arith.addf %467, %468 : vector<16x256xf32>
    %470 = vector.extract_strided_slice %469 {offsets = [0, 0], sizes = [2, 128], strides = [1, 1]} : vector<16x256xf32> to vector<2x128xf32>
    %471 = vector.extract_strided_slice %469 {offsets = [14, 128], sizes = [2, 128], strides = [1, 1]} : vector<16x256xf32> to vector<2x128xf32>
    %472 = tpu.concatenate %470, %471 in 0 : vector<2x128xf32>, vector<2x128xf32> -> vector<4x128xf32>
    %473 = vector.extract_strided_slice %469 {offsets = [2, 0], sizes = [2, 128], strides = [1, 1]} : vector<16x256xf32> to vector<2x128xf32>
    %474 = vector.extract_strided_slice %469 {offsets = [12, 128], sizes = [2, 128], strides = [1, 1]} : vector<16x256xf32> to vector<2x128xf32>
    %475 = tpu.concatenate %473, %474 in 0 : vector<2x128xf32>, vector<2x128xf32> -> vector<4x128xf32>
    %476 = vector.extract_strided_slice %469 {offsets = [4, 0], sizes = [2, 128], strides = [1, 1]} : vector<16x256xf32> to vector<2x128xf32>
    %477 = vector.extract_strided_slice %469 {offsets = [10, 128], sizes = [2, 128], strides = [1, 1]} : vector<16x256xf32> to vector<2x128xf32>
    %478 = tpu.concatenate %476, %477 in 0 : vector<2x128xf32>, vector<2x128xf32> -> vector<4x128xf32>
    %479 = vector.extract_strided_slice %469 {offsets = [6, 0], sizes = [2, 128], strides = [1, 1]} : vector<16x256xf32> to vector<2x128xf32>
    %480 = vector.extract_strided_slice %469 {offsets = [8, 128], sizes = [2, 128], strides = [1, 1]} : vector<16x256xf32> to vector<2x128xf32>
    %481 = tpu.concatenate %479, %480 in 0 : vector<2x128xf32>, vector<2x128xf32> -> vector<4x128xf32>
    %482 = vector.extract_strided_slice %469 {offsets = [8, 0], sizes = [2, 128], strides = [1, 1]} : vector<16x256xf32> to vector<2x128xf32>
    %483 = vector.extract_strided_slice %469 {offsets = [6, 128], sizes = [2, 128], strides = [1, 1]} : vector<16x256xf32> to vector<2x128xf32>
    %484 = tpu.concatenate %482, %483 in 0 : vector<2x128xf32>, vector<2x128xf32> -> vector<4x128xf32>
    %485 = vector.extract_strided_slice %469 {offsets = [10, 0], sizes = [2, 128], strides = [1, 1]} : vector<16x256xf32> to vector<2x128xf32>
    %486 = vector.extract_strided_slice %469 {offsets = [4, 128], sizes = [2, 128], strides = [1, 1]} : vector<16x256xf32> to vector<2x128xf32>
    %487 = tpu.concatenate %485, %486 in 0 : vector<2x128xf32>, vector<2x128xf32> -> vector<4x128xf32>
    %488 = vector.extract_strided_slice %469 {offsets = [12, 0], sizes = [2, 128], strides = [1, 1]} : vector<16x256xf32> to vector<2x128xf32>
    %489 = vector.extract_strided_slice %469 {offsets = [2, 128], sizes = [2, 128], strides = [1, 1]} : vector<16x256xf32> to vector<2x128xf32>
    %490 = tpu.concatenate %488, %489 in 0 : vector<2x128xf32>, vector<2x128xf32> -> vector<4x128xf32>
    %491 = vector.extract_strided_slice %469 {offsets = [14, 0], sizes = [2, 128], strides = [1, 1]} : vector<16x256xf32> to vector<2x128xf32>
    %492 = vector.extract_strided_slice %469 {offsets = [0, 128], sizes = [2, 128], strides = [1, 1]} : vector<16x256xf32> to vector<2x128xf32>
    %493 = tpu.concatenate %491, %492 in 0 : vector<2x128xf32>, vector<2x128xf32> -> vector<4x128xf32>
    %cst_73 = arith.constant 0.000000e+00 : f32
    %494 = vector.broadcast %cst_73 : f32 to vector<4x64xf32>
    %cst_74 = arith.constant 0.000000e+00 : f32
    %495 = vector.broadcast %cst_74 : f32 to vector<4x32xf32>
    %cst_75 = arith.constant dense<0.000000e+00> : vector<4x128xf32>
    %496 = tpu.matmul %494, %465, %cst_75 {dimension_numbers = #tpu.dot_dimension_numbers<[1], [0], [0], [1], [0, 0, 1, 1], [], []>} : vector<4x64xf32>, vector<64x128xf32>, vector<4x128xf32> -> vector<4x128xf32>
    %497 = arith.addf %472, %496 : vector<4x128xf32>
    %498 = math.tanh %497 : vector<4x128xf32>
    %499 = arith.negf %497 : vector<4x128xf32>
    %500 = math.exp %499 : vector<4x128xf32>
    %cst_76 = arith.constant 1.000000e+00 : f32
    %501 = vector.broadcast %cst_76 : f32 to vector<4x128xf32>
    %502 = arith.addf %501, %500 : vector<4x128xf32>
    %503 = arith.divf %501, %502 : vector<4x128xf32>
    %504 = arith.select %5, %498, %503 : vector<4x128xi1>, vector<4x128xf32>
    %505 = vector.extract_strided_slice %504 {offsets = [0, 0], sizes = [4, 32], strides = [1, 1]} : vector<4x128xf32> to vector<4x32xf32>
    %506 = vector.extract_strided_slice %504 {offsets = [0, 32], sizes = [4, 32], strides = [1, 1]} : vector<4x128xf32> to vector<4x32xf32>
    %507 = vector.extract_strided_slice %504 {offsets = [0, 64], sizes = [4, 32], strides = [1, 1]} : vector<4x128xf32> to vector<4x32xf32>
    %508 = vector.extract_strided_slice %504 {offsets = [0, 96], sizes = [4, 32], strides = [1, 1]} : vector<4x128xf32> to vector<4x32xf32>
    %509 = arith.mulf %506, %495 : vector<4x32xf32>
    %510 = arith.mulf %505, %507 : vector<4x32xf32>
    %511 = arith.addf %509, %510 : vector<4x32xf32>
    %512 = math.tanh %511 : vector<4x32xf32>
    %513 = arith.mulf %508, %512 : vector<4x32xf32>
    %514 = tpu.concatenate %513, %513 in 1 : vector<4x32xf32>, vector<4x32xf32> -> vector<4x64xf32>
    %cst_77 = arith.constant 0.000000e+00 : f32
    %515 = vector.broadcast %cst_77 : f32 to vector<4x64xf32>
    %516 = arith.select %18, %514, %515 : vector<4x64xi1>, vector<4x64xf32>
    %517 = vector.extract_strided_slice %513 {offsets = [2, 0], sizes = [2, 32], strides = [1, 1]} : vector<4x32xf32> to vector<2x32xf32>
    %cst_78 = arith.constant dense<0.000000e+00> : vector<4x128xf32>
    %518 = tpu.matmul %516, %465, %cst_78 {dimension_numbers = #tpu.dot_dimension_numbers<[1], [0], [0], [1], [0, 0, 1, 1], [], []>} : vector<4x64xf32>, vector<64x128xf32>, vector<4x128xf32> -> vector<4x128xf32>
    %519 = arith.addf %475, %518 : vector<4x128xf32>
    %520 = math.tanh %519 : vector<4x128xf32>
    %521 = arith.negf %519 : vector<4x128xf32>
    %522 = math.exp %521 : vector<4x128xf32>
    %cst_79 = arith.constant 1.000000e+00 : f32
    %523 = vector.broadcast %cst_79 : f32 to vector<4x128xf32>
    %524 = arith.addf %523, %522 : vector<4x128xf32>
    %525 = arith.divf %523, %524 : vector<4x128xf32>
    %526 = arith.select %5, %520, %525 : vector<4x128xi1>, vector<4x128xf32>
    %527 = vector.extract_strided_slice %526 {offsets = [0, 0], sizes = [4, 32], strides = [1, 1]} : vector<4x128xf32> to vector<4x32xf32>
    %528 = vector.extract_strided_slice %526 {offsets = [0, 32], sizes = [4, 32], strides = [1, 1]} : vector<4x128xf32> to vector<4x32xf32>
    %529 = vector.extract_strided_slice %526 {offsets = [0, 64], sizes = [4, 32], strides = [1, 1]} : vector<4x128xf32> to vector<4x32xf32>
    %530 = vector.extract_strided_slice %526 {offsets = [0, 96], sizes = [4, 32], strides = [1, 1]} : vector<4x128xf32> to vector<4x32xf32>
    %531 = arith.mulf %528, %511 : vector<4x32xf32>
    %532 = arith.mulf %527, %529 : vector<4x32xf32>
    %533 = arith.addf %531, %532 : vector<4x32xf32>
    %534 = math.tanh %533 : vector<4x32xf32>
    %535 = arith.mulf %530, %534 : vector<4x32xf32>
    %536 = tpu.concatenate %535, %535 in 1 : vector<4x32xf32>, vector<4x32xf32> -> vector<4x64xf32>
    %cst_80 = arith.constant 0.000000e+00 : f32
    %537 = vector.broadcast %cst_80 : f32 to vector<4x64xf32>
    %538 = arith.select %18, %536, %537 : vector<4x64xi1>, vector<4x64xf32>
    %cst_81 = arith.constant dense<0.000000e+00> : vector<4x128xf32>
    %539 = tpu.matmul %538, %465, %cst_81 {dimension_numbers = #tpu.dot_dimension_numbers<[1], [0], [0], [1], [0, 0, 1, 1], [], []>} : vector<4x64xf32>, vector<64x128xf32>, vector<4x128xf32> -> vector<4x128xf32>
    %540 = arith.addf %478, %539 : vector<4x128xf32>
    %541 = math.tanh %540 : vector<4x128xf32>
    %542 = arith.negf %540 : vector<4x128xf32>
    %543 = math.exp %542 : vector<4x128xf32>
    %cst_82 = arith.constant 1.000000e+00 : f32
    %544 = vector.broadcast %cst_82 : f32 to vector<4x128xf32>
    %545 = arith.addf %544, %543 : vector<4x128xf32>
    %546 = arith.divf %544, %545 : vector<4x128xf32>
    %547 = arith.select %5, %541, %546 : vector<4x128xi1>, vector<4x128xf32>
    %548 = vector.extract_strided_slice %547 {offsets = [0, 0], sizes = [4, 32], strides = [1, 1]} : vector<4x128xf32> to vector<4x32xf32>
    %549 = vector.extract_strided_slice %547 {offsets = [0, 32], sizes = [4, 32], strides = [1, 1]} : vector<4x128xf32> to vector<4x32xf32>
    %550 = vector.extract_strided_slice %547 {offsets = [0, 64], sizes = [4, 32], strides = [1, 1]} : vector<4x128xf32> to vector<4x32xf32>
    %551 = vector.extract_strided_slice %547 {offsets = [0, 96], sizes = [4, 32], strides = [1, 1]} : vector<4x128xf32> to vector<4x32xf32>
    %552 = arith.mulf %549, %533 : vector<4x32xf32>
    %553 = arith.mulf %548, %550 : vector<4x32xf32>
    %554 = arith.addf %552, %553 : vector<4x32xf32>
    %555 = math.tanh %554 : vector<4x32xf32>
    %556 = arith.mulf %551, %555 : vector<4x32xf32>
    %557 = tpu.concatenate %556, %556 in 1 : vector<4x32xf32>, vector<4x32xf32> -> vector<4x64xf32>
    %cst_83 = arith.constant 0.000000e+00 : f32
    %558 = vector.broadcast %cst_83 : f32 to vector<4x64xf32>
    %559 = arith.select %18, %557, %558 : vector<4x64xi1>, vector<4x64xf32>
    %cst_84 = arith.constant dense<0.000000e+00> : vector<4x128xf32>
    %560 = tpu.matmul %559, %465, %cst_84 {dimension_numbers = #tpu.dot_dimension_numbers<[1], [0], [0], [1], [0, 0, 1, 1], [], []>} : vector<4x64xf32>, vector<64x128xf32>, vector<4x128xf32> -> vector<4x128xf32>
    %561 = arith.addf %481, %560 : vector<4x128xf32>
    %562 = math.tanh %561 : vector<4x128xf32>
    %563 = arith.negf %561 : vector<4x128xf32>
    %564 = math.exp %563 : vector<4x128xf32>
    %cst_85 = arith.constant 1.000000e+00 : f32
    %565 = vector.broadcast %cst_85 : f32 to vector<4x128xf32>
    %566 = arith.addf %565, %564 : vector<4x128xf32>
    %567 = arith.divf %565, %566 : vector<4x128xf32>
    %568 = arith.select %5, %562, %567 : vector<4x128xi1>, vector<4x128xf32>
    %569 = vector.extract_strided_slice %568 {offsets = [0, 0], sizes = [4, 32], strides = [1, 1]} : vector<4x128xf32> to vector<4x32xf32>
    %570 = vector.extract_strided_slice %568 {offsets = [0, 32], sizes = [4, 32], strides = [1, 1]} : vector<4x128xf32> to vector<4x32xf32>
    %571 = vector.extract_strided_slice %568 {offsets = [0, 64], sizes = [4, 32], strides = [1, 1]} : vector<4x128xf32> to vector<4x32xf32>
    %572 = vector.extract_strided_slice %568 {offsets = [0, 96], sizes = [4, 32], strides = [1, 1]} : vector<4x128xf32> to vector<4x32xf32>
    %573 = arith.mulf %570, %554 : vector<4x32xf32>
    %574 = arith.mulf %569, %571 : vector<4x32xf32>
    %575 = arith.addf %573, %574 : vector<4x32xf32>
    %576 = math.tanh %575 : vector<4x32xf32>
    %577 = arith.mulf %572, %576 : vector<4x32xf32>
    %578 = tpu.concatenate %577, %577 in 1 : vector<4x32xf32>, vector<4x32xf32> -> vector<4x64xf32>
    %cst_86 = arith.constant 0.000000e+00 : f32
    %579 = vector.broadcast %cst_86 : f32 to vector<4x64xf32>
    %580 = arith.select %18, %578, %579 : vector<4x64xi1>, vector<4x64xf32>
    %cst_87 = arith.constant dense<0.000000e+00> : vector<4x128xf32>
    %581 = tpu.matmul %580, %465, %cst_87 {dimension_numbers = #tpu.dot_dimension_numbers<[1], [0], [0], [1], [0, 0, 1, 1], [], []>} : vector<4x64xf32>, vector<64x128xf32>, vector<4x128xf32> -> vector<4x128xf32>
    %582 = arith.addf %484, %581 : vector<4x128xf32>
    %583 = math.tanh %582 : vector<4x128xf32>
    %584 = arith.negf %582 : vector<4x128xf32>
    %585 = math.exp %584 : vector<4x128xf32>
    %cst_88 = arith.constant 1.000000e+00 : f32
    %586 = vector.broadcast %cst_88 : f32 to vector<4x128xf32>
    %587 = arith.addf %586, %585 : vector<4x128xf32>
    %588 = arith.divf %586, %587 : vector<4x128xf32>
    %589 = arith.select %5, %583, %588 : vector<4x128xi1>, vector<4x128xf32>
    %590 = vector.extract_strided_slice %589 {offsets = [0, 0], sizes = [4, 32], strides = [1, 1]} : vector<4x128xf32> to vector<4x32xf32>
    %591 = vector.extract_strided_slice %589 {offsets = [0, 32], sizes = [4, 32], strides = [1, 1]} : vector<4x128xf32> to vector<4x32xf32>
    %592 = vector.extract_strided_slice %589 {offsets = [0, 64], sizes = [4, 32], strides = [1, 1]} : vector<4x128xf32> to vector<4x32xf32>
    %593 = vector.extract_strided_slice %589 {offsets = [0, 96], sizes = [4, 32], strides = [1, 1]} : vector<4x128xf32> to vector<4x32xf32>
    %594 = arith.mulf %591, %575 : vector<4x32xf32>
    %595 = arith.mulf %590, %592 : vector<4x32xf32>
    %596 = arith.addf %594, %595 : vector<4x32xf32>
    %597 = math.tanh %596 : vector<4x32xf32>
    %598 = arith.mulf %593, %597 : vector<4x32xf32>
    %599 = tpu.concatenate %598, %598 in 1 : vector<4x32xf32>, vector<4x32xf32> -> vector<4x64xf32>
    %cst_89 = arith.constant 0.000000e+00 : f32
    %600 = vector.broadcast %cst_89 : f32 to vector<4x64xf32>
    %601 = arith.select %18, %599, %600 : vector<4x64xi1>, vector<4x64xf32>
    %cst_90 = arith.constant dense<0.000000e+00> : vector<4x128xf32>
    %602 = tpu.matmul %601, %465, %cst_90 {dimension_numbers = #tpu.dot_dimension_numbers<[1], [0], [0], [1], [0, 0, 1, 1], [], []>} : vector<4x64xf32>, vector<64x128xf32>, vector<4x128xf32> -> vector<4x128xf32>
    %603 = arith.addf %487, %602 : vector<4x128xf32>
    %604 = math.tanh %603 : vector<4x128xf32>
    %605 = arith.negf %603 : vector<4x128xf32>
    %606 = math.exp %605 : vector<4x128xf32>
    %cst_91 = arith.constant 1.000000e+00 : f32
    %607 = vector.broadcast %cst_91 : f32 to vector<4x128xf32>
    %608 = arith.addf %607, %606 : vector<4x128xf32>
    %609 = arith.divf %607, %608 : vector<4x128xf32>
    %610 = arith.select %5, %604, %609 : vector<4x128xi1>, vector<4x128xf32>
    %611 = vector.extract_strided_slice %610 {offsets = [0, 0], sizes = [4, 32], strides = [1, 1]} : vector<4x128xf32> to vector<4x32xf32>
    %612 = vector.extract_strided_slice %610 {offsets = [0, 32], sizes = [4, 32], strides = [1, 1]} : vector<4x128xf32> to vector<4x32xf32>
    %613 = vector.extract_strided_slice %610 {offsets = [0, 64], sizes = [4, 32], strides = [1, 1]} : vector<4x128xf32> to vector<4x32xf32>
    %614 = vector.extract_strided_slice %610 {offsets = [0, 96], sizes = [4, 32], strides = [1, 1]} : vector<4x128xf32> to vector<4x32xf32>
    %615 = arith.mulf %612, %596 : vector<4x32xf32>
    %616 = arith.mulf %611, %613 : vector<4x32xf32>
    %617 = arith.addf %615, %616 : vector<4x32xf32>
    %618 = math.tanh %617 : vector<4x32xf32>
    %619 = arith.mulf %614, %618 : vector<4x32xf32>
    %620 = tpu.concatenate %619, %619 in 1 : vector<4x32xf32>, vector<4x32xf32> -> vector<4x64xf32>
    %cst_92 = arith.constant 0.000000e+00 : f32
    %621 = vector.broadcast %cst_92 : f32 to vector<4x64xf32>
    %622 = arith.select %18, %620, %621 : vector<4x64xi1>, vector<4x64xf32>
    %cst_93 = arith.constant dense<0.000000e+00> : vector<4x128xf32>
    %623 = tpu.matmul %622, %465, %cst_93 {dimension_numbers = #tpu.dot_dimension_numbers<[1], [0], [0], [1], [0, 0, 1, 1], [], []>} : vector<4x64xf32>, vector<64x128xf32>, vector<4x128xf32> -> vector<4x128xf32>
    %624 = arith.addf %490, %623 : vector<4x128xf32>
    %625 = math.tanh %624 : vector<4x128xf32>
    %626 = arith.negf %624 : vector<4x128xf32>
    %627 = math.exp %626 : vector<4x128xf32>
    %cst_94 = arith.constant 1.000000e+00 : f32
    %628 = vector.broadcast %cst_94 : f32 to vector<4x128xf32>
    %629 = arith.addf %628, %627 : vector<4x128xf32>
    %630 = arith.divf %628, %629 : vector<4x128xf32>
    %631 = arith.select %5, %625, %630 : vector<4x128xi1>, vector<4x128xf32>
    %632 = vector.extract_strided_slice %631 {offsets = [0, 0], sizes = [4, 32], strides = [1, 1]} : vector<4x128xf32> to vector<4x32xf32>
    %633 = vector.extract_strided_slice %631 {offsets = [0, 32], sizes = [4, 32], strides = [1, 1]} : vector<4x128xf32> to vector<4x32xf32>
    %634 = vector.extract_strided_slice %631 {offsets = [0, 64], sizes = [4, 32], strides = [1, 1]} : vector<4x128xf32> to vector<4x32xf32>
    %635 = vector.extract_strided_slice %631 {offsets = [0, 96], sizes = [4, 32], strides = [1, 1]} : vector<4x128xf32> to vector<4x32xf32>
    %636 = arith.mulf %633, %617 : vector<4x32xf32>
    %637 = arith.mulf %632, %634 : vector<4x32xf32>
    %638 = arith.addf %636, %637 : vector<4x32xf32>
    %639 = math.tanh %638 : vector<4x32xf32>
    %640 = arith.mulf %635, %639 : vector<4x32xf32>
    %641 = tpu.concatenate %640, %640 in 1 : vector<4x32xf32>, vector<4x32xf32> -> vector<4x64xf32>
    %cst_95 = arith.constant 0.000000e+00 : f32
    %642 = vector.broadcast %cst_95 : f32 to vector<4x64xf32>
    %643 = arith.select %18, %641, %642 : vector<4x64xi1>, vector<4x64xf32>
    %cst_96 = arith.constant dense<0.000000e+00> : vector<4x128xf32>
    %644 = tpu.matmul %643, %465, %cst_96 {dimension_numbers = #tpu.dot_dimension_numbers<[1], [0], [0], [1], [0, 0, 1, 1], [], []>} : vector<4x64xf32>, vector<64x128xf32>, vector<4x128xf32> -> vector<4x128xf32>
    %645 = arith.addf %493, %644 : vector<4x128xf32>
    %646 = math.tanh %645 : vector<4x128xf32>
    %647 = arith.negf %645 : vector<4x128xf32>
    %648 = math.exp %647 : vector<4x128xf32>
    %cst_97 = arith.constant 1.000000e+00 : f32
    %649 = vector.broadcast %cst_97 : f32 to vector<4x128xf32>
    %650 = arith.addf %649, %648 : vector<4x128xf32>
    %651 = arith.divf %649, %650 : vector<4x128xf32>
    %652 = arith.select %5, %646, %651 : vector<4x128xi1>, vector<4x128xf32>
    %653 = vector.extract_strided_slice %652 {offsets = [0, 0], sizes = [4, 32], strides = [1, 1]} : vector<4x128xf32> to vector<4x32xf32>
    %654 = vector.extract_strided_slice %652 {offsets = [0, 32], sizes = [4, 32], strides = [1, 1]} : vector<4x128xf32> to vector<4x32xf32>
    %655 = vector.extract_strided_slice %652 {offsets = [0, 64], sizes = [4, 32], strides = [1, 1]} : vector<4x128xf32> to vector<4x32xf32>
    %656 = vector.extract_strided_slice %652 {offsets = [0, 96], sizes = [4, 32], strides = [1, 1]} : vector<4x128xf32> to vector<4x32xf32>
    %657 = arith.mulf %654, %638 : vector<4x32xf32>
    %658 = arith.mulf %653, %655 : vector<4x32xf32>
    %659 = arith.addf %657, %658 : vector<4x32xf32>
    %660 = math.tanh %659 : vector<4x32xf32>
    %661 = arith.mulf %656, %660 : vector<4x32xf32>
    %662 = vector.extract_strided_slice %661 {offsets = [0, 0], sizes = [2, 32], strides = [1, 1]} : vector<4x32xf32> to vector<2x32xf32>
    %663 = tpu.concatenate %662, %517 in 1 : vector<2x32xf32>, vector<2x32xf32> -> vector<2x64xf32>
    %c0_98 = arith.constant 0 : index
    %c0_99 = arith.constant 0 : index
    %664 = vector.load %arg10[%c0_98, %c0_99] : memref<64x10xf32, #tpu.memory_space<vmem>>, vector<64x10xf32>
    %cst_100 = arith.constant dense<0.000000e+00> : vector<2x10xf32>
    %665 = tpu.matmul %663, %664, %cst_100 {dimension_numbers = #tpu.dot_dimension_numbers<[1], [0], [0], [1], [0, 0, 1, 1], [], []>} : vector<2x64xf32>, vector<64x10xf32>, vector<2x10xf32> -> vector<2x10xf32>
    %c0_101 = arith.constant 0 : index
    %c0_102 = arith.constant 0 : index
    %666 = vector.load %arg11[%c0_101, %c0_102] : memref<1x10xf32, #tpu.memory_space<vmem>>, vector<1x10xf32>
    %667 = vector.broadcast %666 : vector<1x10xf32> to vector<2x10xf32>
    %668 = arith.addf %665, %667 : vector<2x10xf32>
    %cst_103 = arith.constant dense<0xFF800000> : vector<2xf32>
    %669 = vector.multi_reduction <maximumf>, %668, %cst_103 [1] : vector<2x10xf32> to vector<2xf32>
    %670 = vector.shape_cast %669 : vector<2xf32> to vector<2x1xf32>
    %671 = vector.broadcast %670 : vector<2x1xf32> to vector<2x10xf32>
    %672 = arith.subf %668, %671 : vector<2x10xf32>
    %673 = math.exp %672 : vector<2x10xf32>
    %cst_104 = arith.constant dense<0.000000e+00> : vector<2xf32>
    %674 = vector.multi_reduction <add>, %673, %cst_104 [1] : vector<2x10xf32> to vector<2xf32>
    %675 = vector.shape_cast %674 : vector<2xf32> to vector<2x1xf32>
    %676 = math.log %675 : vector<2x1xf32>
    %677 = vector.broadcast %676 : vector<2x1xf32> to vector<2x10xf32>
    %678 = arith.subf %672, %677 : vector<2x10xf32>
    %c0_105 = arith.constant 0 : index
    %c0_106 = arith.constant 0 : index
    %679 = vector.load %arg12[%c0_105, %c0_106] : memref<2x10xf32, #tpu.memory_space<vmem>>, vector<2x10xf32>
    tpu.vector_store %arg12[%c0_105, %c0_106], %678 {strides = array<i32>} : memref<2x10xf32, #tpu.memory_space<vmem>>, vector<2x10xf32>,
    return
  }
}

</mosaic_0001>

<bundles_post_ra>
// kernel: rnn_forward.1
= control target key start
LH: loop header
LB: loop body
LE: loop exit
PB: predicated region body
PF: predicated region fallthrough
CT: control target
= control target key end

     0   :  { %vm76_vm0 = vcmask 130048   ;;  %s3590_s0 = inlined_call_operand.vmem [shape: f32[16,16], index: 0, kind: input, shape index: {}]   ;;  %s3591_s1 = inlined_call_operand.vmem [shape: f32[16,256], index: 1, kind: input, shape index: {}]   ;;  %s3592_s2 = inlined_call_operand.vmem [shape: f32[64,128], index: 2, kind: input, shape index: {}]   ;;  %s3593_s3 = inlined_call_operand.vmem [shape: f32[1,256], index: 3, kind: input, shape index: {}]   ;;  %s3594_s4 = inlined_call_operand.vmem [shape: f32[64,256], index: 4, kind: input, shape index: {}]   ;;  %s3595_s5 = inlined_call_operand.vmem [shape: f32[64,128], index: 5, kind: input, shape index: {}]   ;;  %s3596_s6 = inlined_call_operand.vmem [shape: f32[1,256], index: 6, kind: input, shape index: {}]   ;;  %s3597_s7 = inlined_call_operand.vmem [shape: f32[64,256], index: 7, kind: input, shape index: {}]   ;;  %s3598_s8 = inlined_call_operand.vmem [shape: f32[64,128], index: 8, kind: input, shape index: {}]   ;;  %s3599_s9 = inlined_call_operand.vmem [shape: f32[1,256], index: 9, kind: input, shape index: {}]   ;;  %s3600_s10 = inlined_call_operand.vmem [shape: f32[64,10], index: 10, kind: input, shape index: {}]   ;;  %s3601_s11 = inlined_call_operand.vmem [shape: f32[1,10], index: 11, kind: input, shape index: {}]   ;;  %s3602_s12 = inlined_call_operand.hbm [shape: f32[2,10], index: 12, kind: output, shape index: {}]  }
   0x1   :  { %v60_v0 = vld [vmem:[%s3591_s1 + $0x10] sm:$0xff]  ;;  %v2647_v1 = vld [vmem:[%s3592_s2 + $0x38] sm:$0xff]  ;;  %v58_v2 = vld [vmem:[%s3591_s1] sm:$0xff] }
   0x2   :  { %97 = vmatpush.msra.mxu0 %v60_v0  ;;  %178 = vmatpush.msra.mxu2 %v2647_v1  ;;  %v2656_v3 = vld [vmem:[%s3592_s2 + $0x30] sm:$0xff]  ;;  %v56_v4 = vld [vmem:[%s3590_s0] sm:$0xff]  ;;  %v2664_v5 = vld [vmem:[%s3592_s2 + $0x28] sm:$0xff] }
   0x3   :  { %v61_v6 = vld [vmem:[%s3591_s1 + $0x18] sm:$0xff]  ;;  %250 = vmatpush.msra.mxu3 %v2647_v1  ;;  %v59_v7 = vld [vmem:[%s3591_s1 + $0x8] sm:$0xff]  ;;  %v2678_v8 = vld [vmem:[%s3592_s2 + $0x20] sm:$0xff] }
   0x4   :  { %98 = vmatpush.msra.mxu0 %v58_v2  ;;  %179 = vmatpush.msra.mxu2 %v2656_v3 }
   0x5   :  { %2287 = vmatmul.msk.f32.vlgmr.msra.gmra.mxu0 %vm76_vm0, %v56_v4  ;;  %120 = vmatpush.msra.mxu1 %v61_v6 }
   0x6   :  { %180 = vmatpush.msra.mxu2 %v2664_v5  ;;  %251 = vmatpush.msra.mxu3 %v2656_v3 }
   0x7   :  { %17 = vsyncpa [#allocation3], 0  ;;  %121 = vmatpush.msra.mxu1 %v59_v7  ;;  %v65_v9 = vld [vmem:[%s3592_s2 + $0x18] sm:$0xff]  ;;  %321 = vmatpush.msrb.mxu0 %v2647_v1  ;;  %v64_v10 = vld [vmem:[%s3592_s2 + $0x10] sm:$0xff]  ;;  %v2572_v14 = vmov 0.0   ;;  %vm132_vm1 = vcmask 1041408   ;;  %v42_v51 = vlaneseq }
   0x8   :  { %181 = vmatpush.msra.mxu2 %v2678_v8  ;;  %2289 = vmatmul.msk.f32.vlgmr.msra.gmra.mxu1 %vm76_vm0, %v56_v4  ;;  %v57_v11 = vld [vmem:[%s3590_s0 + $0x8] sm:$0xff]  ;;  %v62_v13 = vld [vmem:[%s3592_s2] sm:$0xff]  ;;  %s2574_s30 = smov 32   ;;  %vm236_vm15 = vcmask 261120   ;;  %v2229_v59 = vld [vmem:[%s3600_s10 + $0x38] sm:$0xff]  ;;  %s2278_s18 = sshll.u32 %s3602_s12, 4  ;;  %s2279_s18 = int_to_ptr.hbm [resolvable:$true] %s2278_s18 }
   0x9   :  { %252 = vmatpush.msra.mxu3 %v2664_v5  ;;  %322 = vmatpush.msrb.mxu0 %v2656_v3  ;;  %v63_v12 = vld [vmem:[%s3592_s2 + $0x8] sm:$0xff]  ;;  %v70_v15 = vld [vmem:[%s3593_s3] sm:$0x3]  ;;  %v43_v53 = vand.u32 127, %v42_v51  ;;  %s2573_s3 = smov 64  }
   0xa   :  { %182 = vmatpush.msra.mxu2 %v65_v9  ;;  %392 = vmatpush.msrb.mxu1 %v2647_v1  ;;  %v73_v17 = vperm.slane %v70_v15, 1  ;;  %v72_v19 = vperm.slane %v70_v15, 0 }
   0xb   :  { %253 = vmatpush.msra.mxu3 %v2678_v8  ;;  %323 = vmatpush.msrb.mxu0 %v2664_v5  ;;  %vm44_vm2 = vcmp.ge.s32.totalorder %v43_v53, 64  ;;  %vm45_vm3 = vcmp.lt.s32.totalorder %v43_v53, 96  ;;  %vm50_vm10 = vcmp.lt.s32.totalorder %v43_v53, 32  ;;  %vm53_vm12 = vcmp.ge.s32.totalorder %v43_v53, 32 }
   0xc   :  { %183 = vmatpush.msra.mxu2 %v64_v10  ;;  %393 = vmatpush.msrb.mxu1 %v2656_v3  ;;  %vm2753_vm5 = vmand %vm44_vm2, %vm45_vm3  ;;  %vm166_vm2 = vcmask 523264  }
   0xd   :  { %2288 = vmatmul.msk.f32.gmra.mxu0 %vm76_vm0, %v57_v11  ;;  %254 = vmatpush.msra.mxu3 %v65_v9 }
   0xe   :  { %184 = vmatpush.msra.mxu2 %v63_v12  ;;  %324 = vmatpush.msrb.mxu0 %v2678_v8 }
   0xf   :  { %255 = vmatpush.msra.mxu3 %v64_v10  ;;  %394 = vmatpush.msrb.mxu1 %v2664_v5 }
  0x10   :  { %185 = vmatpush.msra.mxu2 %v62_v13  ;;  %2290 = vmatmul.msk.f32.gmra.mxu1 %vm76_vm0, %v57_v11 }
  0x11   :  { %186 = vmatmul.f32.vlgmr.msra.gmra.mxu2 %v2572_v14  ;;  %256 = vmatpush.msra.mxu3 %v63_v12 }
  0x12   :  { %325 = vmatpush.msrb.mxu0 %v65_v9  ;;  %395 = vmatpush.msrb.mxu1 %v2678_v8 }
  0x13   :  { %257 = vmatpush.msra.mxu3 %v62_v13  ;;  %463 = vmatpush.msrb.mxu2 %v2647_v1 }
  0x14   :  { %326 = vmatpush.msrb.mxu0 %v64_v10  ;;  %396 = vmatpush.msrb.mxu1 %v65_v9 }
  0x15   :  { %464 = vmatpush.msrb.mxu2 %v2656_v3  ;;  %534 = vmatpush.msrb.mxu3 %v2647_v1 }
  0x16   :  { %327 = vmatpush.msrb.mxu0 %v63_v12  ;;  %397 = vmatpush.msrb.mxu1 %v64_v10 }
  0x17   :  { %465 = vmatpush.msrb.mxu2 %v2664_v5  ;;  %535 = vmatpush.msrb.mxu3 %v2656_v3 }
  0x18   :  { %328 = vmatpush.msrb.mxu0 %v62_v13  ;;  %398 = vmatpush.msrb.mxu1 %v63_v12 }
  0x19   :  { %466 = vmatpush.msrb.mxu2 %v2678_v8  ;;  %536 = vmatpush.msrb.mxu3 %v2664_v5 }
  0x1a   :  { %399 = vmatpush.msrb.mxu1 %v62_v13  ;;  %605 = vmatpush.msra.mxu0 %v2647_v1 }
  0x1b   :  { %467 = vmatpush.msrb.mxu2 %v65_v9  ;;  %537 = vmatpush.msrb.mxu3 %v2678_v8 }
  0x1c   :  { %606 = vmatpush.msra.mxu0 %v2656_v3  ;;  %676 = vmatpush.msra.mxu1 %v2647_v1 }
  0x1d   :  { %468 = vmatpush.msrb.mxu2 %v64_v10  ;;  %538 = vmatpush.msrb.mxu3 %v65_v9 }
  0x1e   :  { %607 = vmatpush.msra.mxu0 %v2664_v5  ;;  %677 = vmatpush.msra.mxu1 %v2656_v3 }
  0x1f   :  { %469 = vmatpush.msrb.mxu2 %v63_v12  ;;  %539 = vmatpush.msrb.mxu3 %v64_v10 }
  0x20   :  { %608 = vmatpush.msra.mxu0 %v2678_v8  ;;  %678 = vmatpush.msra.mxu1 %v2664_v5 }
  0x21   :  { %470 = vmatpush.msrb.mxu2 %v62_v13  ;;  %540 = vmatpush.msrb.mxu3 %v63_v12 }
  0x22   :  { %609 = vmatpush.msra.mxu0 %v65_v9  ;;  %679 = vmatpush.msra.mxu1 %v2678_v8 }
  0x23   :  { %541 = vmatpush.msrb.mxu3 %v62_v13 }
  0x24   :  { %610 = vmatpush.msra.mxu0 %v64_v10  ;;  %680 = vmatpush.msra.mxu1 %v65_v9 }
  0x26   :  { %611 = vmatpush.msra.mxu0 %v63_v12  ;;  %681 = vmatpush.msra.mxu1 %v64_v10  ;;  %v48_v10 = vshrl.u32 %v42_v51, 7 }
  0x28   :  { %612 = vmatpush.msra.mxu0 %v62_v13  ;;  %682 = vmatpush.msra.mxu1 %v63_v12  ;;  %vm49_vm9 = vcmp.lt.s32.totalorder %v48_v10, 2  ;;  %vm52_vm11 = vcmp.ge.s32.totalorder %v48_v10, 2 }
  0x29   :  { %vm51_vm13 = vmand %vm49_vm9, %vm50_vm10 }
  0x2a   :  { %683 = vmatpush.msra.mxu1 %v62_v13  ;;  %vm54_vm14 = vmand %vm52_vm11, %vm53_vm12 }
  0x2b   :  { %vm2768_vm0 = vmor %vm51_vm13, %vm54_vm14 }
  0x82   :  { %v100_v16 = vpop.f32.mrf.mxu0 }
  0x83   :  { %v101_v21 = vadd.f32 %v100_v16, %v72_v19 }
  0x85   :  { %v123_v18 = vpop.f32.mrf.mxu1  ;;  %v140_v25 = vrot.slane %v101_v21, 4  ;;  %v135_v34 = vrot.slane %v101_v21, 2  ;;  %v143_v35 = vrot.slane %v101_v21, 6 }
  0x86   :  { %v124_v20 = vadd.f32 %v123_v18, %v73_v17 }
  0x88   :  { %v149_v22 = vrot.slane %v124_v20, 4  ;;  %v155_v26 = vrot.slane %v124_v20, 2  ;;  %v163_v27 = vrot.slane %v124_v20, 6 }
  0x8a   :  { %v103_v23 = vpop.f32.mrf.mxu0 }
  0x8b   :  { %v104_v24 = vadd.f32 %v103_v23, %v72_v19 }
  0x8d   :  { %v126_v28 = vpop.f32.mrf.mxu1  ;;  %v2732_v29 = vsel %vm132_vm1, %v104_v24, %v149_v22  ;;  %v153_v30 = vrot.slane %v104_v24, 2  ;;  %v158_v31 = vrot.slane %v104_v24, 4  ;;  %v161_v32 = vrot.slane %v104_v24, 6 }
  0x8e   :  { %v127_v33 = vadd.f32 %v126_v28, %v73_v17 }
  0x8f   :  { %v2735_v36 = vsel %vm132_vm1, %v153_v30, %v155_v26  ;;  %v2738_v37 = vsel %vm132_vm1, %v158_v31, %v124_v20  ;;  %v2741_v38 = vsel %vm132_vm1, %v161_v32, %v163_v27 }
  0x90   :  { %v130_v39 = vrot.slane %v127_v33, 4  ;;  %v137_v40 = vrot.slane %v127_v33, 2  ;;  %v2744_v41 = vsel %vm132_vm1, %v140_v25, %v127_v33  ;;  %v145_v42 = vrot.slane %v127_v33, 6 }
  0x92   :  { %v133_v43 = vsel %vm132_vm1, %v101_v21, %v130_v39  ;;  %v2748_v44 = vsel %vm132_vm1, %v135_v34, %v137_v40  ;;  %v2751_v45 = vsel %vm132_vm1, %v143_v35, %v145_v42 }
  0x94   :  { %v187_v46 = vpop.f32.mrf.mxu2 }
  0x95   :  { %v190_v47 = vadd.f32 %v187_v46, %v133_v43 }
  0x97   :  { %v2291_v48 = vmul.f32 -1.442695, %v190_v47 }
  0x99   :  { %2350 = vpow2.f32 %v2291_v48 }
  0x9f   :  { %v2351_v49 = vpop.eup %2350 }
  0xa0   :  { %v195_v50 = vadd.f32 1.0, %v2351_v49 }
  0xa2   :  { %2352 = vrcp.f32 %v195_v50  ;;  %v207_v56 = vand.u32 2147483648, %v195_v50  ;;  %v205_v58 = vand.u32 2147483647, %v195_v50  ;;  %vm201_vm6 = vweird.f32 %v195_v50 }
  0xa3   :  { %2354 = vtanh.f32 %v190_v47 }
  0xa4   :  { %v208_v61 = vor.u32 1.1754944e-38, %v207_v56  ;;  %vm206_vm8 = vcmp.eq.f32.partialorder %v205_v58, 8.507059e+37 }
  0xa8   :  { %v2353_v52 = vpop.eup %2352 }
  0xa9   :  { %v197_v54 = vmul.f32 %v2353_v52, %v195_v50  ;;  %vm202_vm4 = vweird.f32 %v2353_v52  ;;  %v2355_v63 = vpop.eup %2354 }
  0xaa   :  { %vm203_vm7 = vmor %vm201_vm6, %vm202_vm4 }
  0xab   :  { %v198_v55 = vsub.f32 1.0, %v197_v54 }
  0xad   :  { %v199_v57 = vmul.f32 %v2353_v52, %v198_v55 }
  0xaf   :  { %v200_v60 = vadd.f32 %v2353_v52, %v199_v57 }
  0xb1   :  { %v204_v62 = vsel %vm203_vm7, %v2353_v52, %v200_v60 }
  0xb2   :  { %v209_v0 = vsel %vm206_vm8, %v208_v61, %v204_v62 }
  0xb3   :  { %v211_v1 = vsel %vm2753_vm5, %v2355_v63, %v209_v0 }
  0xb4   :  { %214 = vrot.lane.b32.xlu0 %v211_v1, %s2573_s3  ;;  %v212_v4 = vmul.f32 0.0, %v211_v1 }
 0x126   :  { %v215_v2 = vpop.permute.xlu0 %214 }
 0x127   :  { %v217_v3 = vmul.f32 %v215_v2, %v211_v1 }
 0x129   :  { %219 = vrot.lane.b32.xlu0 %v217_v3, %s2574_s30 }
 0x19b   :  { %v220_v5 = vpop.permute.xlu0 %219 }
 0x19c   :  { %v222_v6 = vadd.f32 %v220_v5, %v212_v4 }
 0x19e   :  { %2356 = vtanh.f32 %v222_v6 }
 0x1a4   :  { %v2357_v7 = vpop.eup %2356 }
 0x1a5   :  { %225 = vrot.lane.b32.xlu1 %v2357_v7, %s2573_s3 }
 0x217   :  { %v226_v8 = vpop.permute.xlu1 %225 }
 0x218   :  { %v2762_v9 = vmul.f32 %v226_v8, %v211_v1 }
 0x21a   :  { %233 = vrot.lane.b32.xlu2 %v2762_v9, %s2573_s3  ;;  %230 = vrot.lane.b32.xlu1 %v2762_v9, %s2574_s30 }
 0x274   :  { %v234_v12 = vpop.permute.xlu2 %233 }
 0x28c   :  { %v2772_v13 = vpop.permute.xlu1 %230 }
 0x28d   :  { %v237_v15 = vsel %vm236_vm15, %v2772_v13, %v234_v12 }
 0x28e   :  { %v238_v16 = vsel %vm2768_vm0, %v237_v15, 0.0 }
 0x28f   :  { %2292 = vmatmul.msk.f32.vlgmr.msra.gmra.mxu3 %vm166_vm2, %v238_v16 }
 0x312   :  { %v259_v17 = vpop.f32.mrf.mxu3 }
 0x313   :  { %v262_v18 = vadd.f32 %v259_v17, %v2748_v44 }
 0x315   :  { %v2293_v19 = vmul.f32 -1.442695, %v262_v18 }
 0x317   :  { %2358 = vpow2.f32 %v2293_v19 }
 0x31d   :  { %v2359_v20 = vpop.eup %2358 }
 0x31e   :  { %v267_v21 = vadd.f32 1.0, %v2359_v20 }
 0x320   :  { %2360 = vrcp.f32 %v267_v21  ;;  %v279_v25 = vand.u32 2147483648, %v267_v21  ;;  %v277_v27 = vand.u32 2147483647, %v267_v21  ;;  %vm273_vm4 = vweird.f32 %v267_v21 }
 0x321   :  { %2362 = vtanh.f32 %v262_v18 }
 0x322   :  { %v280_v30 = vor.u32 1.1754944e-38, %v279_v25  ;;  %vm278_vm7 = vcmp.eq.f32.partialorder %v277_v27, 8.507059e+37 }
 0x326   :  { %v2361_v22 = vpop.eup %2360 }
 0x327   :  { %v269_v23 = vmul.f32 %v2361_v22, %v267_v21  ;;  %vm274_vm3 = vweird.f32 %v2361_v22  ;;  %v2363_v32 = vpop.eup %2362 }
 0x328   :  { %vm275_vm6 = vmor %vm273_vm4, %vm274_vm3 }
 0x329   :  { %v270_v24 = vsub.f32 1.0, %v269_v23 }
 0x32b   :  { %v271_v26 = vmul.f32 %v2361_v22, %v270_v24 }
 0x32d   :  { %v272_v28 = vadd.f32 %v2361_v22, %v271_v26 }
 0x32f   :  { %v276_v31 = vsel %vm275_vm6, %v2361_v22, %v272_v28 }
 0x330   :  { %v281_v33 = vsel %vm278_vm7, %v280_v30, %v276_v31 }
 0x331   :  { %v283_v34 = vsel %vm2753_vm5, %v2363_v32, %v281_v33 }
 0x332   :  { %286 = vrot.lane.b32.xlu2 %v283_v34, %s2573_s3  ;;  %v284_v40 = vmul.f32 %v283_v34, %v222_v6 }
 0x38c   :  { %v287_v35 = vpop.permute.xlu2 %286 }
 0x38d   :  { %v289_v39 = vmul.f32 %v287_v35, %v283_v34 }
 0x38f   :  { %291 = vrot.lane.b32.xlu0 %v289_v39, %s2574_s30 }
 0x401   :  { %v292_v42 = vpop.permute.xlu0 %291 }
 0x402   :  { %v294_v43 = vadd.f32 %v292_v42, %v284_v40 }
 0x404   :  { %2364 = vtanh.f32 %v294_v43 }
 0x40a   :  { %v2365_v44 = vpop.eup %2364 }
 0x40b   :  { %297 = vrot.lane.b32.xlu1 %v2365_v44, %s2573_s3 }
 0x47d   :  { %v298_v46 = vpop.permute.xlu1 %297 }
 0x47e   :  { %v2785_v47 = vmul.f32 %v298_v46, %v283_v34 }
 0x480   :  { %305 = vrot.lane.b32.xlu0 %v2785_v47, %s2573_s3  ;;  %302 = vrot.lane.b32.xlu2 %v2785_v47, %s2574_s30 }
 0x4da   :  { %v2791_v48 = vpop.permute.xlu2 %302 }
 0x4f2   :  { %v306_v49 = vpop.permute.xlu0 %305 }
 0x4f3   :  { %v308_v50 = vsel %vm236_vm15, %v2791_v48, %v306_v49 }
 0x4f4   :  { %v309_v51 = vsel %vm2768_vm0, %v308_v50, 0.0 }
 0x4f5   :  { %2294 = vmatmul.msk.f32.vlgmr.msrb.gmra.mxu0 %vm166_vm2, %v309_v51 }
 0x572   :  { %v330_v52 = vpop.f32.mrf.mxu0 }
 0x573   :  { %v333_v53 = vadd.f32 %v330_v52, %v2744_v41 }
 0x575   :  { %v2295_v54 = vmul.f32 -1.442695, %v333_v53 }
 0x577   :  { %2366 = vpow2.f32 %v2295_v54 }
 0x57d   :  { %v2367_v55 = vpop.eup %2366 }
 0x57e   :  { %v338_v56 = vadd.f32 1.0, %v2367_v55 }
 0x580   :  { %2368 = vrcp.f32 %v338_v56  ;;  %v350_v61 = vand.u32 2147483648, %v338_v56  ;;  %v348_v63 = vand.u32 2147483647, %v338_v56  ;;  %vm344_vm9 = vweird.f32 %v338_v56 }
 0x581   :  { %2370 = vtanh.f32 %v333_v53 }
 0x582   :  { %v351_v1 = vor.u32 1.1754944e-38, %v350_v61  ;;  %vm349_vm11 = vcmp.eq.f32.partialorder %v348_v63, 8.507059e+37 }
 0x586   :  { %v2369_v57 = vpop.eup %2368 }
 0x587   :  { %v340_v58 = vmul.f32 %v2369_v57, %v338_v56  ;;  %vm345_vm8 = vweird.f32 %v2369_v57  ;;  %v2371_v41 = vpop.eup %2370 }
 0x588   :  { %vm346_vm10 = vmor %vm344_vm9, %vm345_vm8 }
 0x589   :  { %v341_v60 = vsub.f32 1.0, %v340_v58 }
 0x58b   :  { %v342_v62 = vmul.f32 %v2369_v57, %v341_v60 }
 0x58d   :  { %v343_v0 = vadd.f32 %v2369_v57, %v342_v62 }
 0x58f   :  { %v347_v2 = vsel %vm346_vm10, %v2369_v57, %v343_v0 }
 0x590   :  { %v352_v3 = vsel %vm349_vm11, %v351_v1, %v347_v2 }
 0x591   :  { %v354_v4 = vsel %vm2753_vm5, %v2371_v41, %v352_v3 }
 0x592   :  { %357 = vrot.lane.b32.xlu1 %v354_v4, %s2573_s3  ;;  %v355_v7 = vmul.f32 %v354_v4, %v294_v43 }
 0x604   :  { %v358_v5 = vpop.permute.xlu1 %357 }
 0x605   :  { %v360_v6 = vmul.f32 %v358_v5, %v354_v4 }
 0x607   :  { %362 = vrot.lane.b32.xlu2 %v360_v6, %s2574_s30 }
 0x661   :  { %v363_v8 = vpop.permute.xlu2 %362 }
 0x662   :  { %v365_v10 = vadd.f32 %v363_v8, %v355_v7 }
 0x664   :  { %2372 = vtanh.f32 %v365_v10 }
 0x66a   :  { %v2373_v12 = vpop.eup %2372 }
 0x66b   :  { %368 = vrot.lane.b32.xlu0 %v2373_v12, %s2573_s3 }
 0x6dd   :  { %v369_v15 = vpop.permute.xlu0 %368 }
 0x6de   :  { %v2804_v16 = vmul.f32 %v369_v15, %v354_v4 }
 0x6e0   :  { %376 = vrot.lane.b32.xlu2 %v2804_v16, %s2573_s3  ;;  %373 = vrot.lane.b32.xlu1 %v2804_v16, %s2574_s30 }
 0x73a   :  { %v377_v17 = vpop.permute.xlu2 %376 }
 0x752   :  { %v2810_v18 = vpop.permute.xlu1 %373 }
 0x753   :  { %v379_v19 = vsel %vm236_vm15, %v2810_v18, %v377_v17 }
 0x754   :  { %v380_v20 = vsel %vm2768_vm0, %v379_v19, 0.0 }
 0x755   :  { %2296 = vmatmul.msk.f32.vlgmr.msrb.gmra.mxu1 %vm166_vm2, %v380_v20 }
 0x7d2   :  { %v401_v21 = vpop.f32.mrf.mxu1 }
 0x7d3   :  { %v404_v22 = vadd.f32 %v401_v21, %v2751_v45 }
 0x7d5   :  { %v2297_v23 = vmul.f32 -1.442695, %v404_v22 }
 0x7d7   :  { %2374 = vpow2.f32 %v2297_v23 }
 0x7dd   :  { %v2375_v24 = vpop.eup %2374 }
 0x7de   :  { %v409_v25 = vadd.f32 1.0, %v2375_v24 }
 0x7e0   :  { %2376 = vrcp.f32 %v409_v25  ;;  %v421_v30 = vand.u32 2147483648, %v409_v25  ;;  %v419_v32 = vand.u32 2147483647, %v409_v25  ;;  %vm415_vm13 = vweird.f32 %v409_v25 }
 0x7e1   :  { %2378 = vtanh.f32 %v404_v22 }
 0x7e2   :  { %v422_v34 = vor.u32 1.1754944e-38, %v421_v30  ;;  %vm420_vm3 = vcmp.eq.f32.partialorder %v419_v32, 8.507059e+37 }
 0x7e6   :  { %v2377_v26 = vpop.eup %2376 }
 0x7e7   :  { %v411_v27 = vmul.f32 %v2377_v26, %v409_v25  ;;  %vm416_vm12 = vweird.f32 %v2377_v26  ;;  %v2379_v45 = vpop.eup %2378 }
 0x7e8   :  { %vm417_vm14 = vmor %vm415_vm13, %vm416_vm12 }
 0x7e9   :  { %v412_v28 = vsub.f32 1.0, %v411_v27 }
 0x7eb   :  { %v413_v31 = vmul.f32 %v2377_v26, %v412_v28 }
 0x7ed   :  { %v414_v33 = vadd.f32 %v2377_v26, %v413_v31 }
 0x7ef   :  { %v418_v35 = vsel %vm417_vm14, %v2377_v26, %v414_v33 }
 0x7f0   :  { %v423_v39 = vsel %vm420_vm3, %v422_v34, %v418_v35 }
 0x7f1   :  { %v425_v40 = vsel %vm2753_vm5, %v2379_v45, %v423_v39 }
 0x7f2   :  { %428 = vrot.lane.b32.xlu0 %v425_v40, %s2573_s3  ;;  %v426_v44 = vmul.f32 %v425_v40, %v365_v10 }
 0x864   :  { %v429_v42 = vpop.permute.xlu0 %428 }
 0x865   :  { %v431_v43 = vmul.f32 %v429_v42, %v425_v40 }
 0x867   :  { %433 = vrot.lane.b32.xlu1 %v431_v43, %s2574_s30 }
 0x8d9   :  { %v434_v46 = vpop.permute.xlu1 %433 }
 0x8da   :  { %v436_v49 = vadd.f32 %v434_v46, %v426_v44 }
 0x8dc   :  { %2380 = vtanh.f32 %v436_v49 }
 0x8e2   :  { %v2381_v50 = vpop.eup %2380 }
 0x8e3   :  { %439 = vrot.lane.b32.xlu2 %v2381_v50, %s2573_s3 }
 0x93d   :  { %v440_v51 = vpop.permute.xlu2 %439 }
 0x93e   :  { %v2823_v52 = vmul.f32 %v440_v51, %v425_v40 }
 0x940   :  { %447 = vrot.lane.b32.xlu1 %v2823_v52, %s2573_s3  ;;  %444 = vrot.lane.b32.xlu0 %v2823_v52, %s2574_s30 }
 0x9b2   :  { %v448_v53 = vpop.permute.xlu1 %447  ;;  %v2829_v54 = vpop.permute.xlu0 %444 }
 0x9b3   :  { %v450_v55 = vsel %vm236_vm15, %v2829_v54, %v448_v53 }
 0x9b4   :  { %v451_v56 = vsel %vm2768_vm0, %v450_v55, 0.0 }
 0x9b5   :  { %2298 = vmatmul.msk.f32.vlgmr.msrb.gmra.mxu2 %vm166_vm2, %v451_v56 }
 0xa38   :  { %v472_v57 = vpop.f32.mrf.mxu2 }
 0xa39   :  { %v475_v58 = vadd.f32 %v472_v57, %v2732_v29 }
 0xa3b   :  { %v2299_v60 = vmul.f32 -1.442695, %v475_v58 }
 0xa3d   :  { %2382 = vpow2.f32 %v2299_v60 }
 0xa43   :  { %v2383_v61 = vpop.eup %2382 }
 0xa44   :  { %v480_v62 = vadd.f32 1.0, %v2383_v61 }
 0xa46   :  { %2384 = vrcp.f32 %v480_v62  ;;  %v492_v2 = vand.u32 2147483648, %v480_v62  ;;  %v490_v3 = vand.u32 2147483647, %v480_v62  ;;  %vm486_vm6 = vweird.f32 %v480_v62 }
 0xa47   :  { %2386 = vtanh.f32 %v475_v58 }
 0xa48   :  { %v493_v5 = vor.u32 1.1754944e-38, %v492_v2  ;;  %vm491_vm8 = vcmp.eq.f32.partialorder %v490_v3, 8.507059e+37 }
 0xa4c   :  { %v2385_v63 = vpop.eup %2384 }
 0xa4d   :  { %v482_v0 = vmul.f32 %v2385_v63, %v480_v62  ;;  %vm487_vm4 = vweird.f32 %v2385_v63  ;;  %v2387_v29 = vpop.eup %2386 }
 0xa4e   :  { %vm488_vm7 = vmor %vm486_vm6, %vm487_vm4 }
 0xa4f   :  { %v483_v1 = vsub.f32 1.0, %v482_v0 }
 0xa51   :  { %v484_v41 = vmul.f32 %v2385_v63, %v483_v1 }
 0xa53   :  { %v485_v4 = vadd.f32 %v2385_v63, %v484_v41 }
 0xa55   :  { %v489_v6 = vsel %vm488_vm7, %v2385_v63, %v485_v4 }
 0xa56   :  { %v494_v7 = vsel %vm491_vm8, %v493_v5, %v489_v6 }
 0xa57   :  { %v496_v8 = vsel %vm2753_vm5, %v2387_v29, %v494_v7 }
 0xa58   :  { %499 = vrot.lane.b32.xlu2 %v496_v8, %s2573_s3  ;;  %v497_v15 = vmul.f32 %v496_v8, %v436_v49 }
 0xab2   :  { %v500_v10 = vpop.permute.xlu2 %499 }
 0xab3   :  { %v502_v12 = vmul.f32 %v500_v10, %v496_v8 }
 0xab5   :  { %504 = vrot.lane.b32.xlu0 %v502_v12, %s2574_s30 }
 0xb27   :  { %v505_v17 = vpop.permute.xlu0 %504 }
 0xb28   :  { %v507_v19 = vadd.f32 %v505_v17, %v497_v15 }
 0xb2a   :  { %2388 = vtanh.f32 %v507_v19 }
 0xb30   :  { %v2389_v20 = vpop.eup %2388 }
 0xb31   :  { %510 = vrot.lane.b32.xlu1 %v2389_v20, %s2573_s3 }
 0xba3   :  { %v511_v21 = vpop.permute.xlu1 %510 }
 0xba4   :  { %v2842_v22 = vmul.f32 %v511_v21, %v496_v8 }
 0xba6   :  { %518 = vrot.lane.b32.xlu0 %v2842_v22, %s2573_s3  ;;  %515 = vrot.lane.b32.xlu2 %v2842_v22, %s2574_s30 }
 0xc00   :  { %v2848_v23 = vpop.permute.xlu2 %515 }
 0xc18   :  { %v519_v24 = vpop.permute.xlu0 %518 }
 0xc19   :  { %v521_v25 = vsel %vm236_vm15, %v2848_v23, %v519_v24 }
 0xc1a   :  { %v522_v26 = vsel %vm2768_vm0, %v521_v25, 0.0 }
 0xc1b   :  { %2300 = vmatmul.msk.f32.vlgmr.msrb.gmra.mxu3 %vm166_vm2, %v522_v26 }
 0xc9e   :  { %v543_v27 = vpop.f32.mrf.mxu3 }
 0xc9f   :  { %v546_v28 = vadd.f32 %v543_v27, %v2735_v36 }
 0xca1   :  { %v2301_v30 = vmul.f32 -1.442695, %v546_v28 }
 0xca3   :  { %2390 = vpow2.f32 %v2301_v30 }
 0xca9   :  { %v2391_v31 = vpop.eup %2390 }
 0xcaa   :  { %v551_v32 = vadd.f32 1.0, %v2391_v31 }
 0xcac   :  { %2392 = vrcp.f32 %v551_v32  ;;  %v563_v45 = vand.u32 2147483648, %v551_v32  ;;  %v561_v40 = vand.u32 2147483647, %v551_v32  ;;  %vm557_vm10 = vweird.f32 %v551_v32 }
 0xcad   :  { %2394 = vtanh.f32 %v546_v28 }
 0xcae   :  { %v564_v43 = vor.u32 1.1754944e-38, %v563_v45  ;;  %vm562_vm12 = vcmp.eq.f32.partialorder %v561_v40, 8.507059e+37 }
 0xcb2   :  { %v2393_v33 = vpop.eup %2392 }
 0xcb3   :  { %v553_v34 = vmul.f32 %v2393_v33, %v551_v32  ;;  %vm558_vm9 = vweird.f32 %v2393_v33  ;;  %v2395_v36 = vpop.eup %2394 }
 0xcb4   :  { %vm559_vm11 = vmor %vm557_vm10, %vm558_vm9  ;;  %vm792_vm10 = vcmask 1045504  }
 0xcb5   :  { %v554_v35 = vsub.f32 1.0, %v553_v34 }
 0xcb7   :  { %v555_v39 = vmul.f32 %v2393_v33, %v554_v35 }
 0xcb9   :  { %v556_v42 = vadd.f32 %v2393_v33, %v555_v39 }
 0xcbb   :  { %v560_v44 = vsel %vm559_vm11, %v2393_v33, %v556_v42  ;;  %vm790_vm11 = vcmask 1043456  }
 0xcbc   :  { %v565_v46 = vsel %vm562_vm12, %v564_v43, %v560_v44 }
 0xcbd   :  { %v567_v49 = vsel %vm2753_vm5, %v2395_v36, %v565_v46 }
 0xcbe   :  { %570 = vrot.lane.b32.xlu1 %v567_v49, %s2573_s3  ;;  %v568_v53 = vmul.f32 %v567_v49, %v507_v19 }
 0xd30   :  { %v571_v50 = vpop.permute.xlu1 %570 }
 0xd31   :  { %v573_v51 = vmul.f32 %v571_v50, %v567_v49 }
 0xd33   :  { %575 = vrot.lane.b32.xlu2 %v573_v51, %s2574_s30 }
 0xd8d   :  { %v576_v55 = vpop.permute.xlu2 %575 }
 0xd8e   :  { %v578_v56 = vadd.f32 %v576_v55, %v568_v53 }
 0xd90   :  { %2396 = vtanh.f32 %v578_v56 }
 0xd96   :  { %v2397_v57 = vpop.eup %2396 }
 0xd97   :  { %581 = vrot.lane.b32.xlu0 %v2397_v57, %s2573_s3 }
 0xe09   :  { %v582_v58 = vpop.permute.xlu0 %581 }
 0xe0a   :  { %v2861_v60 = vmul.f32 %v582_v58, %v567_v49 }
 0xe0c   :  { %589 = vrot.lane.b32.xlu2 %v2861_v60, %s2573_s3  ;;  %586 = vrot.lane.b32.xlu1 %v2861_v60, %s2574_s30 }
 0xe66   :  { %v590_v61 = vpop.permute.xlu2 %589 }
 0xe7e   :  { %v2867_v62 = vpop.permute.xlu1 %586 }
 0xe7f   :  { %v592_v63 = vsel %vm236_vm15, %v2867_v62, %v590_v61 }
 0xe80   :  { %v593_v0 = vsel %vm2768_vm0, %v592_v63, 0.0  ;;  %v743_v63 = vrot.slane %v2842_v22, 2 }
 0xe81   :  { %2302 = vmatmul.msk.f32.vlgmr.msra.gmra.mxu0 %vm166_vm2, %v593_v0  ;;  %v748_v0 = vrot.slane %v2823_v52, 2  ;;  %v758_v52 = vrot.slane %v2785_v47, 2  ;;  %v810_v47 = vld [vmem:[%s3594_s4 + $0x68] sm:$0xff] }
 0xefe   :  { %v614_v1 = vpop.f32.mrf.mxu0 }
 0xeff   :  { %v617_v2 = vadd.f32 %v614_v1, %v2738_v37 }
 0xf01   :  { %v2303_v41 = vmul.f32 -1.442695, %v617_v2 }
 0xf03   :  { %2398 = vpow2.f32 %v2303_v41  ;;  %v738_v41 = vrot.slane %v2861_v60, 2  ;;  %v811_v60 = vld [vmem:[%s3594_s4 + $0x70] sm:$0xff] }
 0xf04   :  { %841 = vmatpush.msra.mxu2 %v811_v60 }
 0xf09   :  { %v2399_v3 = vpop.eup %2398 }
 0xf0a   :  { %v622_v4 = vadd.f32 1.0, %v2399_v3  ;;  %v753_v3 = vrot.slane %v2804_v16, 2  ;;  %v812_v16 = vld [vmem:[%s3594_s4 + $0x78] sm:$0xff] }
 0xf0b   :  { %864 = vmatpush.msra.mxu3 %v812_v16 }
 0xf0c   :  { %2400 = vrcp.f32 %v622_v4  ;;  %v634_v7 = vand.u32 2147483648, %v622_v4  ;;  %v632_v10 = vand.u32 2147483647, %v622_v4  ;;  %vm628_vm14 = vweird.f32 %v622_v4 }
 0xf0d   :  { %2402 = vtanh.f32 %v617_v2  ;;  %865 = vmatpush.msra.mxu3 %v810_v47 }
 0xf0e   :  { %v635_v15 = vor.u32 1.1754944e-38, %v634_v7  ;;  %vm633_vm4 = vcmp.eq.f32.partialorder %v632_v10, 8.507059e+37  ;;  %v807_v7 = vld [vmem:[%s3594_s4 + $0x50] sm:$0xff]  ;;  %v805_v10 = vld [vmem:[%s3594_s4 + $0x40] sm:$0xff] }
 0xf12   :  { %v2401_v5 = vpop.eup %2400 }
 0xf13   :  { %v624_v6 = vmul.f32 %v2401_v5, %v622_v4  ;;  %vm629_vm13 = vweird.f32 %v2401_v5  ;;  %v2403_v37 = vpop.eup %2402 }
 0xf14   :  { %vm630_vm3 = vmor %vm628_vm14, %vm629_vm13 }
 0xf15   :  { %v625_v29 = vsub.f32 1.0, %v624_v6 }
 0xf17   :  { %v626_v8 = vmul.f32 %v2401_v5, %v625_v29  ;;  %v809_v29 = vld [vmem:[%s3594_s4 + $0x60] sm:$0xff] }
 0xf18   :  { %842 = vmatpush.msra.mxu2 %v809_v29 }
 0xf19   :  { %v627_v12 = vadd.f32 %v2401_v5, %v626_v8  ;;  %v808_v8 = vld [vmem:[%s3594_s4 + $0x58] sm:$0xff] }
 0xf1a   :  { %843 = vmatpush.msra.mxu2 %v807_v7  ;;  %866 = vmatpush.msra.mxu3 %v808_v8 }
 0xf1b   :  { %v631_v17 = vsel %vm630_vm3, %v2401_v5, %v627_v12  ;;  %v806_v12 = vld [vmem:[%s3594_s4 + $0x48] sm:$0xff] }
 0xf1c   :  { %v636_v19 = vsel %vm633_vm4, %v635_v15, %v631_v17  ;;  %v803_v15 = vld [vmem:[%s3594_s4 + $0x30] sm:$0xff]  ;;  %v804_v17 = vld [vmem:[%s3594_s4 + $0x38] sm:$0xff]  ;;  %844 = vmatpush.msra.mxu2 %v805_v10  ;;  %867 = vmatpush.msra.mxu3 %v806_v12 }
 0xf1d   :  { %v638_v20 = vsel %vm2753_vm5, %v2403_v37, %v636_v19 }
 0xf1e   :  { %641 = vrot.lane.b32.xlu0 %v638_v20, %s2573_s3  ;;  %v639_v25 = vmul.f32 %v638_v20, %v578_v56  ;;  %845 = vmatpush.msra.mxu2 %v803_v15 }
 0xf1f   :  { %868 = vmatpush.msra.mxu3 %v804_v17 }
 0xf90   :  { %v642_v21 = vpop.permute.xlu0 %641 }
 0xf91   :  { %v644_v24 = vmul.f32 %v642_v21, %v638_v20  ;;  %v766_v21 = vrot.slane %v2762_v9, 2  ;;  %v800_v9 = vld [vmem:[%s3594_s4 + $0x18] sm:$0xff] }
 0xf93   :  { %646 = vrot.lane.b32.xlu1 %v644_v24, %s2574_s30  ;;  %v801_v24 = vld [vmem:[%s3594_s4 + $0x20] sm:$0xff] }
 0xf94   :  { %846 = vmatpush.msra.mxu2 %v801_v24 }
0x1005   :  { %v647_v26 = vpop.permute.xlu1 %646 }
0x1006   :  { %v649_v27 = vadd.f32 %v647_v26, %v639_v25  ;;  %v802_v25 = vld [vmem:[%s3594_s4 + $0x28] sm:$0xff]  ;;  %v799_v26 = vld [vmem:[%s3594_s4 + $0x10] sm:$0xff] }
0x1007   :  { %869 = vmatpush.msra.mxu3 %v802_v25  ;;  %847 = vmatpush.msra.mxu2 %v799_v26 }
0x1008   :  { %2404 = vtanh.f32 %v649_v27 }
0x1009   :  { %870 = vmatpush.msra.mxu3 %v800_v9 }
0x100e   :  { %v2405_v28 = vpop.eup %2404 }
0x100f   :  { %652 = vrot.lane.b32.xlu2 %v2405_v28, %s2573_s3  ;;  %v798_v28 = vld [vmem:[%s3594_s4 + $0x8] sm:$0xff] }
0x1010   :  { %871 = vmatpush.msra.mxu3 %v798_v28 }
0x1069   :  { %v653_v30 = vpop.permute.xlu2 %652 }
0x106a   :  { %v655_v31 = vmul.f32 %v653_v30, %v638_v20  ;;  %v2961_v30 = vld [vmem:[%s3595_s5 + $0x38] sm:$0xff] }
0x106b   :  { %923 = vmatpush.msrb.mxu0 %v2961_v30  ;;  %994 = vmatpush.msrb.mxu1 %v2961_v30 }
0x106c   :  { %660 = vrot.lane.b32.xlu1 %v655_v31, %s2573_s3  ;;  %657 = vrot.lane.b32.xlu0 %v655_v31, %s2574_s30  ;;  %v733_v61 = vrot.slane %v655_v31, 2  ;;  %v2968_v31 = vld [vmem:[%s3595_s5 + $0x30] sm:$0xff] }
0x106d   :  { %1136 = vmatpush.msrb.mxu3 %v2961_v30  ;;  %924 = vmatpush.msrb.mxu0 %v2968_v31 }
0x106e   :  { %995 = vmatpush.msrb.mxu1 %v2968_v31 }
0x106f   :  { %1137 = vmatpush.msrb.mxu3 %v2968_v31 }
0x10de   :  { %v661_v32 = vpop.permute.xlu1 %660  ;;  %v2882_v33 = vpop.permute.xlu0 %657 }
0x10df   :  { %v663_v34 = vsel %vm236_vm15, %v2882_v33, %v661_v32  ;;  %v2977_v32 = vld [vmem:[%s3595_s5 + $0x28] sm:$0xff] }
0x10e0   :  { %v664_v35 = vsel %vm2768_vm0, %v663_v34, 0.0  ;;  %925 = vmatpush.msrb.mxu0 %v2977_v32  ;;  %v2985_v34 = vld [vmem:[%s3595_s5 + $0x20] sm:$0xff]  ;;  %996 = vmatpush.msrb.mxu1 %v2977_v32 }
0x10e1   :  { %2304 = vmatmul.msk.f32.vlgmr.msra.gmra.mxu1 %vm166_vm2, %v664_v35  ;;  %v2991_v35 = vld [vmem:[%s3595_s5 + $0x18] sm:$0xff]  ;;  %1138 = vmatpush.msrb.mxu3 %v2977_v32 }
0x10e2   :  { %926 = vmatpush.msrb.mxu0 %v2985_v34  ;;  %997 = vmatpush.msrb.mxu1 %v2985_v34 }
0x10e3   :  { %1139 = vmatpush.msrb.mxu3 %v2985_v34 }
0x10e4   :  { %927 = vmatpush.msrb.mxu0 %v2991_v35  ;;  %998 = vmatpush.msrb.mxu1 %v2991_v35 }
0x10e5   :  { %1140 = vmatpush.msrb.mxu3 %v2991_v35 }
0x115e   :  { %v685_v45 = vpop.f32.mrf.mxu1 }
0x115f   :  { %v688_v39 = vadd.f32 %v685_v45, %v2741_v38  ;;  %v3000_v45 = vld [vmem:[%s3595_s5 + $0x10] sm:$0xff] }
0x1160   :  { %928 = vmatpush.msrb.mxu0 %v3000_v45  ;;  %999 = vmatpush.msrb.mxu1 %v3000_v45 }
0x1161   :  { %v2305_v40 = vmul.f32 -1.442695, %v688_v39  ;;  %1141 = vmatpush.msrb.mxu3 %v3000_v45 }
0x1163   :  { %2406 = vpow2.f32 %v2305_v40  ;;  %v3009_v40 = vld [vmem:[%s3595_s5 + $0x8] sm:$0xff] }
0x1164   :  { %929 = vmatpush.msrb.mxu0 %v3009_v40  ;;  %1000 = vmatpush.msrb.mxu1 %v3009_v40 }
0x1165   :  { %1142 = vmatpush.msrb.mxu3 %v3009_v40 }
0x1169   :  { %v2407_v42 = vpop.eup %2406 }
0x116a   :  { %v693_v43 = vadd.f32 1.0, %v2407_v42  ;;  %v3018_v42 = vld [vmem:[%s3595_s5] sm:$0xff] }
0x116b   :  { %930 = vmatpush.msrb.mxu0 %v3018_v42  ;;  %1001 = vmatpush.msrb.mxu1 %v3018_v42 }
0x116c   :  { %2408 = vrcp.f32 %v693_v43  ;;  %v705_v49 = vand.u32 2147483648, %v693_v43  ;;  %v703_v51 = vand.u32 2147483647, %v693_v43  ;;  %vm699_vm7 = vweird.f32 %v693_v43  ;;  %931 = vmatmul.f32.vlgmr.msrb.gmra.mxu0 %v2572_v14  ;;  %1143 = vmatpush.msrb.mxu3 %v3018_v42 }
0x116d   :  { %2410 = vtanh.f32 %v688_v39  ;;  %1207 = vmatpush.msra.mxu0 %v2961_v30  ;;  %1278 = vmatpush.msra.mxu1 %v2961_v30 }
0x116e   :  { %v706_v55 = vor.u32 1.1754944e-38, %v705_v49  ;;  %vm704_vm9 = vcmp.eq.f32.partialorder %v703_v51, 8.507059e+37 }
0x116f   :  { %1208 = vmatpush.msra.mxu0 %v2968_v31  ;;  %1279 = vmatpush.msra.mxu1 %v2968_v31 }
0x1171   :  { %1209 = vmatpush.msra.mxu0 %v2977_v32  ;;  %1280 = vmatpush.msra.mxu1 %v2977_v32 }
0x1172   :  { %v2409_v44 = vpop.eup %2408 }
0x1173   :  { %v695_v36 = vmul.f32 %v2409_v44, %v693_v43  ;;  %vm700_vm6 = vweird.f32 %v2409_v44  ;;  %v2411_v38 = vpop.eup %2410  ;;  %1210 = vmatpush.msra.mxu0 %v2985_v34  ;;  %1281 = vmatpush.msra.mxu1 %v2985_v34 }
0x1174   :  { %vm701_vm8 = vmor %vm699_vm7, %vm700_vm6 }
0x1175   :  { %v696_v46 = vsub.f32 1.0, %v695_v36  ;;  %1211 = vmatpush.msra.mxu0 %v2991_v35  ;;  %1282 = vmatpush.msra.mxu1 %v2991_v35 }
0x1177   :  { %v697_v50 = vmul.f32 %v2409_v44, %v696_v46  ;;  %1212 = vmatpush.msra.mxu0 %v3000_v45  ;;  %1283 = vmatpush.msra.mxu1 %v3000_v45 }
0x1179   :  { %v698_v53 = vadd.f32 %v2409_v44, %v697_v50  ;;  %1213 = vmatpush.msra.mxu0 %v3009_v40  ;;  %1284 = vmatpush.msra.mxu1 %v3009_v40 }
0x117b   :  { %v702_v56 = vsel %vm701_vm8, %v2409_v44, %v698_v53  ;;  %1214 = vmatpush.msra.mxu0 %v3018_v42  ;;  %1285 = vmatpush.msra.mxu1 %v3018_v42 }
0x117c   :  { %v707_v57 = vsel %vm704_vm9, %v706_v55, %v702_v56 }
0x117d   :  { %v709_v58 = vsel %vm2753_vm5, %v2411_v38, %v707_v57 }
0x117e   :  { %712 = vrot.lane.b32.xlu2 %v709_v58, %s2573_s3  ;;  %v710_v4 = vmul.f32 %v709_v58, %v649_v27  ;;  %v797_v27 = vld [vmem:[%s3594_s4] sm:$0xff] }
0x117f   :  { %848 = vmatpush.msra.mxu2 %v797_v27 }
0x1181   :  { %1065 = vmatpush.msrb.mxu2 %v2961_v30 }
0x1183   :  { %1066 = vmatpush.msrb.mxu2 %v2968_v31 }
0x1185   :  { %1067 = vmatpush.msrb.mxu2 %v2977_v32 }
0x1186   :  { %734 = vrot.lane.b32.xlu2 %v733_v61, %s2573_s3 }
0x1187   :  { %1068 = vmatpush.msrb.mxu2 %v2985_v34 }
0x1189   :  { %1069 = vmatpush.msrb.mxu2 %v2991_v35 }
0x118b   :  { %1070 = vmatpush.msrb.mxu2 %v3000_v45 }
0x118d   :  { %1071 = vmatpush.msrb.mxu2 %v3009_v40 }
0x118e   :  { %744 = vrot.lane.b32.xlu2 %v743_v63, %s2573_s3 }
0x118f   :  { %1072 = vmatpush.msrb.mxu2 %v3018_v42 }
0x1196   :  { %749 = vrot.lane.b32.xlu2 %v748_v0, %s2573_s3 }
0x11d8   :  { %v713_v1 = vpop.permute.xlu2 %712 }
0x11d9   :  { %v715_v2 = vmul.f32 %v713_v1, %v709_v58 }
0x11db   :  { %717 = vrot.lane.b32.xlu0 %v715_v2, %s2574_s30 }
0x11e0   :  { %v735_v39 = vpop.permute.xlu2 %734 }
0x11e1   :  { %v737_v46 = vsel %vm236_vm15, %v2791_v48, %v735_v39 }
0x11e2   :  { %v772_v51 = vrot.slane %v737_v46, 6 }
0x11e3   :  { %739 = vrot.lane.b32.xlu0 %v738_v41, %s2573_s3 }
0x11e8   :  { %v745_v36 = vpop.permute.xlu2 %744 }
0x11e9   :  { %v747_v50 = vsel %vm236_vm15, %v2829_v54, %v745_v36  ;;  %v932_v24 = vpop.f32.mrf.mxu0 }
0x11eb   :  { %754 = vrot.lane.b32.xlu0 %v753_v3, %s2573_s3 }
0x11f0   :  { %v750_v61 = vpop.permute.xlu2 %749 }
0x11f1   :  { %v752_v1 = vsel %vm236_vm15, %v2848_v23, %v750_v61  ;;  %v821_v23 = vld [vmem:[%s3596_s6] sm:$0x3] }
0x11f2   :  { %v823_v60 = vperm.slane %v821_v23, 0 }
0x124d   :  { %v718_v22 = vpop.permute.xlu0 %717 }
0x124e   :  { %v720_v5 = vadd.f32 %v718_v22, %v710_v4 }
0x1250   :  { %2412 = vtanh.f32 %v720_v5  ;;  %v824_v5 = vperm.slane %v821_v23, 1 }
0x1255   :  { %v740_v43 = vpop.permute.xlu0 %739 }
0x1256   :  { %v2413_v6 = vpop.eup %2412  ;;  %v742_v49 = vsel %vm236_vm15, %v2810_v18, %v740_v43  ;;  %v778_v18 = vrot.slane %v747_v50, 2 }
0x1257   :  { %723 = vrot.lane.b32.xlu1 %v2413_v6, %s2573_s3  ;;  %v775_v56 = vrot.slane %v742_v49, 4 }
0x125d   :  { %v755_v53 = vpop.permute.xlu0 %754 }
0x125e   :  { %v757_v54 = vsel %vm236_vm15, %v2867_v62, %v755_v53 }
0x125f   :  { %759 = vrot.lane.b32.xlu1 %v758_v52, %s2573_s3  ;;  %v781_v63 = vrot.slane %v757_v54, 6 }
0x1261   :  { %v794_v3 = vsel %vm132_vm1, %v752_v1, %v781_v63 }
0x12c9   :  { %v724_v37 = vpop.permute.xlu1 %723 }
0x12ca   :  { %v726_v19 = vmul.f32 %v724_v37, %v709_v58 }
0x12cc   :  { %v728_v20 = vrot.slane %v726_v19, 2  ;;  %763 = vrot.lane.b32.xlu0 %v726_v19, %s2574_s30 }
0x12ce   :  { %729 = vrot.lane.b32.xlu1 %v728_v20, %s2573_s3 }
0x12d1   :  { %v760_v44 = vpop.permute.xlu1 %759 }
0x12d2   :  { %v762_v58 = vsel %vm236_vm15, %v2882_v33, %v760_v44 }
0x12d3   :  { %v784_v62 = vrot.slane %v762_v58, 4 }
0x12d5   :  { %v795_v4 = vsel %vm790_vm11, %v794_v3, %v784_v62 }
0x12d6   :  { %767 = vrot.lane.b32.xlu1 %v766_v21, %s2573_s3 }
0x133e   :  { %v764_v33 = vpop.permute.xlu0 %763 }
0x1340   :  { %v730_v55 = vpop.permute.xlu1 %729 }
0x1341   :  { %v732_v48 = vsel %vm236_vm15, %v2772_v13, %v730_v55 }
0x1342   :  { %v789_v38 = vsel %vm132_vm1, %v732_v48, %v772_v51 }
0x1343   :  { %v791_v57 = vsel %vm790_vm11, %v789_v38, %v775_v56 }
0x1344   :  { %v793_v13 = vsel %vm792_vm10, %v791_v57, %v778_v18 }
0x1345   :  { %2306 = vmatmul.msk.f32.vlgmr.msra.gmra.mxu2 %vm166_vm2, %v793_v13  ;;  %2308 = vmatmul.msk.f32.vlgmr.msra.gmra.mxu3 %vm166_vm2, %v793_v13 }
0x1346   :  { %1349 = vmatpush.msra.mxu2 %v2961_v30  ;;  %1420 = vmatpush.msra.mxu3 %v2961_v30 }
0x1348   :  { %v768_v0 = vpop.permute.xlu1 %767  ;;  %1350 = vmatpush.msra.mxu2 %v2968_v31  ;;  %1421 = vmatpush.msra.mxu3 %v2968_v31 }
0x1349   :  { %v770_v2 = vsel %vm236_vm15, %v764_v33, %v768_v0 }
0x134a   :  { %v787_v41 = vrot.slane %v770_v2, 2  ;;  %1351 = vmatpush.msra.mxu2 %v2977_v32  ;;  %1422 = vmatpush.msra.mxu3 %v2977_v32 }
0x134c   :  { %v796_v22 = vsel %vm792_vm10, %v795_v4, %v787_v41  ;;  %1352 = vmatpush.msra.mxu2 %v2985_v34  ;;  %1423 = vmatpush.msra.mxu3 %v2985_v34 }
0x134d   :  { %2307 = vmatmul.msk.f32.gmra.mxu2 %vm166_vm2, %v796_v22  ;;  %2309 = vmatmul.msk.f32.gmra.mxu3 %vm166_vm2, %v796_v22 }
0x134e   :  { %1353 = vmatpush.msra.mxu2 %v2991_v35  ;;  %1424 = vmatpush.msra.mxu3 %v2991_v35 }
0x1350   :  { %1354 = vmatpush.msra.mxu2 %v3000_v45  ;;  %1425 = vmatpush.msra.mxu3 %v3000_v45 }
0x1352   :  { %1355 = vmatpush.msra.mxu2 %v3009_v40  ;;  %1426 = vmatpush.msra.mxu3 %v3009_v40 }
0x1354   :  { %1356 = vmatpush.msra.mxu2 %v3018_v42  ;;  %1427 = vmatpush.msra.mxu3 %v3018_v42 }
0x13c8   :  { %v850_v6 = vpop.f32.mrf.mxu2  ;;  %v873_v52 = vpop.f32.mrf.mxu3 }
0x13c9   :  { %v874_v16 = vadd.f32 %v873_v52, %v824_v5  ;;  %v851_v29 = vadd.f32 %v850_v6, %v823_v60 }
0x13cb   :  { %v884_v12 = vrot.slane %v851_v29, 2  ;;  %v889_v15 = vrot.slane %v851_v29, 4  ;;  %v892_v17 = vrot.slane %v851_v29, 6  ;;  %v898_v37 = vrot.slane %v874_v16, 4 }
0x13cc   :  { %v904_v19 = vrot.slane %v874_v16, 2  ;;  %v912_v20 = vrot.slane %v874_v16, 6 }
0x13d0   :  { %v853_v47 = vpop.f32.mrf.mxu2  ;;  %v876_v7 = vpop.f32.mrf.mxu3 }
0x13d1   :  { %v854_v8 = vadd.f32 %v853_v47, %v823_v60  ;;  %v877_v10 = vadd.f32 %v876_v7, %v824_v5 }
0x13d3   :  { %v880_v21 = vrot.slane %v877_v10, 4  ;;  %v886_v25 = vrot.slane %v877_v10, 2  ;;  %v3092_v26 = vsel %vm132_vm1, %v889_v15, %v877_v10  ;;  %v894_v9 = vrot.slane %v877_v10, 6 }
0x13d4   :  { %v3095_v27 = vsel %vm132_vm1, %v854_v8, %v898_v37  ;;  %v902_v28 = vrot.slane %v854_v8, 2  ;;  %v907_v30 = vrot.slane %v854_v8, 4  ;;  %v910_v31 = vrot.slane %v854_v8, 6 }
0x13d5   :  { %v882_v32 = vsel %vm132_vm1, %v851_v29, %v880_v21  ;;  %v888_v34 = vsel %vm132_vm1, %v884_v12, %v886_v25  ;;  %v3100_v35 = vsel %vm132_vm1, %v892_v17, %v894_v9 }
0x13d6   :  { %v935_v45 = vadd.f32 %v932_v24, %v882_v32  ;;  %v3103_v39 = vsel %vm132_vm1, %v902_v28, %v904_v19  ;;  %v3106_v40 = vsel %vm132_vm1, %v907_v30, %v874_v16  ;;  %v3109_v42 = vsel %vm132_vm1, %v910_v31, %v912_v20 }
0x13d8   :  { %v2310_v43 = vmul.f32 -1.442695, %v935_v45 }
0x13da   :  { %2414 = vpow2.f32 %v2310_v43 }
0x13e0   :  { %v2415_v44 = vpop.eup %2414 }
0x13e1   :  { %v940_v36 = vadd.f32 1.0, %v2415_v44 }
0x13e3   :  { %2416 = vrcp.f32 %v940_v36  ;;  %v952_v51 = vand.u32 2147483648, %v940_v36  ;;  %v950_v55 = vand.u32 2147483647, %v940_v36  ;;  %vm946_vm13 = vweird.f32 %v940_v36 }
0x13e4   :  { %2418 = vtanh.f32 %v935_v45 }
0x13e5   :  { %v953_v48 = vor.u32 1.1754944e-38, %v952_v51  ;;  %vm951_vm3 = vcmp.eq.f32.partialorder %v950_v55, 8.507059e+37 }
0x13e9   :  { %v2417_v46 = vpop.eup %2416 }
0x13ea   :  { %v942_v49 = vmul.f32 %v2417_v46, %v940_v36  ;;  %vm947_vm12 = vweird.f32 %v2417_v46  ;;  %v2419_v38 = vpop.eup %2418 }
0x13eb   :  { %vm948_vm14 = vmor %vm946_vm13, %vm947_vm12 }
0x13ec   :  { %v943_v50 = vsub.f32 1.0, %v942_v49 }
0x13ee   :  { %v944_v53 = vmul.f32 %v2417_v46, %v943_v50 }
0x13f0   :  { %v945_v56 = vadd.f32 %v2417_v46, %v944_v53 }
0x13f2   :  { %v949_v18 = vsel %vm948_vm14, %v2417_v46, %v945_v56 }
0x13f3   :  { %v954_v54 = vsel %vm951_vm3, %v953_v48, %v949_v18 }
0x13f4   :  { %v956_v57 = vsel %vm2753_vm5, %v2419_v38, %v954_v54 }
0x13f5   :  { %959 = vrot.lane.b32.xlu2 %v956_v57, %s2573_s3  ;;  %v957_v61 = vmul.f32 0.0, %v956_v57 }
0x144f   :  { %v960_v58 = vpop.permute.xlu2 %959 }
0x1450   :  { %v962_v13 = vmul.f32 %v960_v58, %v956_v57 }
0x1452   :  { %964 = vrot.lane.b32.xlu0 %v962_v13, %s2574_s30 }
0x14c4   :  { %v965_v63 = vpop.permute.xlu0 %964 }
0x14c5   :  { %v967_v62 = vadd.f32 %v965_v63, %v957_v61 }
0x14c7   :  { %2420 = vtanh.f32 %v967_v62 }
0x14cd   :  { %v2421_v33 = vpop.eup %2420 }
0x14ce   :  { %970 = vrot.lane.b32.xlu1 %v2421_v33, %s2573_s3 }
0x1540   :  { %v971_v0 = vpop.permute.xlu1 %970 }
0x1541   :  { %v3116_v1 = vmul.f32 %v971_v0, %v956_v57 }
0x1543   :  { %978 = vrot.lane.b32.xlu0 %v3116_v1, %s2573_s3  ;;  %975 = vrot.lane.b32.xlu2 %v3116_v1, %s2574_s30 }
0x159d   :  { %v3122_v2 = vpop.permute.xlu2 %975 }
0x15b5   :  { %v979_v41 = vpop.permute.xlu0 %978 }
0x15b6   :  { %v981_v3 = vsel %vm236_vm15, %v3122_v2, %v979_v41 }
0x15b7   :  { %v982_v4 = vsel %vm2768_vm0, %v981_v3, 0.0 }
0x15b8   :  { %2311 = vmatmul.msk.f32.vlgmr.msrb.gmra.mxu1 %vm166_vm2, %v982_v4 }
0x1635   :  { %v1003_v22 = vpop.f32.mrf.mxu1 }
0x1636   :  { %v1006_v23 = vadd.f32 %v1003_v22, %v888_v34 }
0x1638   :  { %v2312_v5 = vmul.f32 -1.442695, %v1006_v23 }
0x163a   :  { %2422 = vpow2.f32 %v2312_v5 }
0x1640   :  { %v2423_v6 = vpop.eup %2422 }
0x1641   :  { %v1011_v52 = vadd.f32 1.0, %v2423_v6 }
0x1643   :  { %2424 = vrcp.f32 %v1011_v52  ;;  %v1023_v47 = vand.u32 2147483648, %v1011_v52  ;;  %v1021_v8 = vand.u32 2147483647, %v1011_v52  ;;  %vm1017_vm6 = vweird.f32 %v1011_v52 }
0x1644   :  { %2426 = vtanh.f32 %v1006_v23 }
0x1645   :  { %v1024_v12 = vor.u32 1.1754944e-38, %v1023_v47  ;;  %vm1022_vm8 = vcmp.eq.f32.partialorder %v1021_v8, 8.507059e+37 }
0x1649   :  { %v2425_v60 = vpop.eup %2424 }
0x164a   :  { %v1013_v16 = vmul.f32 %v2425_v60, %v1011_v52  ;;  %vm1018_vm4 = vweird.f32 %v2425_v60  ;;  %v2427_v17 = vpop.eup %2426 }
0x164b   :  { %vm1019_vm7 = vmor %vm1017_vm6, %vm1018_vm4 }
0x164c   :  { %v1014_v29 = vsub.f32 1.0, %v1013_v16 }
0x164e   :  { %v1015_v7 = vmul.f32 %v2425_v60, %v1014_v29 }
0x1650   :  { %v1016_v10 = vadd.f32 %v2425_v60, %v1015_v7 }
0x1652   :  { %v1020_v15 = vsel %vm1019_vm7, %v2425_v60, %v1016_v10 }
0x1653   :  { %v1025_v37 = vsel %vm1022_vm8, %v1024_v12, %v1020_v15 }
0x1654   :  { %v1027_v19 = vsel %vm2753_vm5, %v2427_v17, %v1025_v37 }
0x1655   :  { %1030 = vrot.lane.b32.xlu1 %v1027_v19, %s2573_s3  ;;  %v1028_v24 = vmul.f32 %v1027_v19, %v967_v62 }
0x16c7   :  { %v1031_v20 = vpop.permute.xlu1 %1030 }
0x16c8   :  { %v1033_v21 = vmul.f32 %v1031_v20, %v1027_v19 }
0x16ca   :  { %1035 = vrot.lane.b32.xlu2 %v1033_v21, %s2574_s30 }
0x1724   :  { %v1036_v25 = vpop.permute.xlu2 %1035 }
0x1725   :  { %v1038_v9 = vadd.f32 %v1036_v25, %v1028_v24 }
0x1727   :  { %2428 = vtanh.f32 %v1038_v9 }
0x172d   :  { %v2429_v28 = vpop.eup %2428 }
0x172e   :  { %1041 = vrot.lane.b32.xlu0 %v2429_v28, %s2573_s3 }
0x17a0   :  { %v1042_v30 = vpop.permute.xlu0 %1041 }
0x17a1   :  { %v3134_v31 = vmul.f32 %v1042_v30, %v1027_v19 }
0x17a3   :  { %1049 = vrot.lane.b32.xlu2 %v3134_v31, %s2573_s3  ;;  %1046 = vrot.lane.b32.xlu1 %v3134_v31, %s2574_s30 }
0x17fd   :  { %v1050_v32 = vpop.permute.xlu2 %1049 }
0x1815   :  { %v3140_v34 = vpop.permute.xlu1 %1046 }
0x1816   :  { %v1052_v45 = vsel %vm236_vm15, %v3140_v34, %v1050_v32 }
0x1817   :  { %v1053_v43 = vsel %vm2768_vm0, %v1052_v45, 0.0 }
0x1818   :  { %2313 = vmatmul.msk.f32.vlgmr.msrb.gmra.mxu2 %vm166_vm2, %v1053_v43 }
0x189b   :  { %v1074_v44 = vpop.f32.mrf.mxu2 }
0x189c   :  { %v1077_v36 = vadd.f32 %v1074_v44, %v3092_v26 }
0x189e   :  { %v2314_v46 = vmul.f32 -1.442695, %v1077_v36 }
0x18a0   :  { %2430 = vpow2.f32 %v2314_v46 }
0x18a6   :  { %v2431_v49 = vpop.eup %2430 }
0x18a7   :  { %v1082_v50 = vadd.f32 1.0, %v2431_v49 }
0x18a9   :  { %2432 = vrcp.f32 %v1082_v50  ;;  %v1094_v56 = vand.u32 2147483648, %v1082_v50  ;;  %v1092_v18 = vand.u32 2147483647, %v1082_v50  ;;  %vm1088_vm12 = vweird.f32 %v1082_v50 }
0x18aa   :  { %2434 = vtanh.f32 %v1077_v36 }
0x18ab   :  { %v1095_v54 = vor.u32 1.1754944e-38, %v1094_v56  ;;  %vm1093_vm14 = vcmp.eq.f32.partialorder %v1092_v18, 8.507059e+37 }
0x18af   :  { %v2433_v51 = vpop.eup %2432 }
0x18b0   :  { %v1084_v53 = vmul.f32 %v2433_v51, %v1082_v50  ;;  %vm1089_vm9 = vweird.f32 %v2433_v51  ;;  %v2435_v26 = vpop.eup %2434 }
0x18b1   :  { %vm1090_vm13 = vmor %vm1088_vm12, %vm1089_vm9 }
0x18b2   :  { %v1085_v55 = vsub.f32 1.0, %v1084_v53 }
0x18b4   :  { %v1086_v48 = vmul.f32 %v2433_v51, %v1085_v55 }
0x18b6   :  { %v1087_v38 = vadd.f32 %v2433_v51, %v1086_v48 }
0x18b8   :  { %v1091_v57 = vsel %vm1090_vm13, %v2433_v51, %v1087_v38 }
0x18b9   :  { %v1096_v58 = vsel %vm1093_vm14, %v1095_v54, %v1091_v57 }
0x18ba   :  { %v1098_v13 = vsel %vm2753_vm5, %v2435_v26, %v1096_v58 }
0x18bb   :  { %1101 = vrot.lane.b32.xlu0 %v1098_v13, %s2573_s3  ;;  %v1099_v62 = vmul.f32 %v1098_v13, %v1038_v9 }
0x192d   :  { %v1102_v61 = vpop.permute.xlu0 %1101 }
0x192e   :  { %v1104_v63 = vmul.f32 %v1102_v61, %v1098_v13 }
0x1930   :  { %1106 = vrot.lane.b32.xlu1 %v1104_v63, %s2574_s30 }
0x19a2   :  { %v1107_v33 = vpop.permute.xlu1 %1106 }
0x19a3   :  { %v1109_v0 = vadd.f32 %v1107_v33, %v1099_v62 }
0x19a5   :  { %2436 = vtanh.f32 %v1109_v0 }
0x19ab   :  { %v2437_v41 = vpop.eup %2436 }
0x19ac   :  { %1112 = vrot.lane.b32.xlu2 %v2437_v41, %s2573_s3 }
0x1a06   :  { %v1113_v3 = vpop.permute.xlu2 %1112 }
0x1a07   :  { %v3153_v4 = vmul.f32 %v1113_v3, %v1098_v13 }
0x1a09   :  { %1120 = vrot.lane.b32.xlu1 %v3153_v4, %s2573_s3  ;;  %1117 = vrot.lane.b32.xlu0 %v3153_v4, %s2574_s30 }
0x1a7b   :  { %v1121_v22 = vpop.permute.xlu1 %1120  ;;  %v3159_v23 = vpop.permute.xlu0 %1117 }
0x1a7c   :  { %v1123_v5 = vsel %vm236_vm15, %v3159_v23, %v1121_v22 }
0x1a7d   :  { %v1124_v6 = vsel %vm2768_vm0, %v1123_v5, 0.0 }
0x1a7e   :  { %2315 = vmatmul.msk.f32.vlgmr.msrb.gmra.mxu3 %vm166_vm2, %v1124_v6 }
0x1b01   :  { %v1145_v52 = vpop.f32.mrf.mxu3 }
0x1b02   :  { %v1148_v60 = vadd.f32 %v1145_v52, %v3100_v35 }
0x1b04   :  { %v2316_v16 = vmul.f32 -1.442695, %v1148_v60 }
0x1b06   :  { %2438 = vpow2.f32 %v2316_v16 }
0x1b0c   :  { %v2439_v29 = vpop.eup %2438 }
0x1b0d   :  { %v1153_v47 = vadd.f32 1.0, %v2439_v29 }
0x1b0f   :  { %2440 = vrcp.f32 %v1153_v47  ;;  %v1165_v12 = vand.u32 2147483648, %v1153_v47  ;;  %v1163_v17 = vand.u32 2147483647, %v1153_v47  ;;  %vm1159_vm4 = vweird.f32 %v1153_v47 }
0x1b10   :  { %2442 = vtanh.f32 %v1148_v60 }
0x1b11   :  { %v1166_v19 = vor.u32 1.1754944e-38, %v1165_v12  ;;  %vm1164_vm7 = vcmp.eq.f32.partialorder %v1163_v17, 8.507059e+37 }
0x1b15   :  { %v2441_v7 = vpop.eup %2440 }
0x1b16   :  { %v1155_v8 = vmul.f32 %v2441_v7, %v1153_v47  ;;  %vm1160_vm3 = vweird.f32 %v2441_v7  ;;  %v2443_v35 = vpop.eup %2442 }
0x1b17   :  { %vm1161_vm6 = vmor %vm1159_vm4, %vm1160_vm3 }
0x1b18   :  { %v1156_v10 = vsub.f32 1.0, %v1155_v8 }
0x1b1a   :  { %v1157_v15 = vmul.f32 %v2441_v7, %v1156_v10 }
0x1b1c   :  { %v1158_v37 = vadd.f32 %v2441_v7, %v1157_v15 }
0x1b1e   :  { %v1162_v20 = vsel %vm1161_vm6, %v2441_v7, %v1158_v37 }
0x1b1f   :  { %v1167_v21 = vsel %vm1164_vm7, %v1166_v19, %v1162_v20 }
0x1b20   :  { %v1169_v24 = vsel %vm2753_vm5, %v2443_v35, %v1167_v21 }
0x1b21   :  { %1172 = vrot.lane.b32.xlu2 %v1169_v24, %s2573_s3  ;;  %v1170_v28 = vmul.f32 %v1169_v24, %v1109_v0 }
0x1b7b   :  { %v1173_v25 = vpop.permute.xlu2 %1172 }
0x1b7c   :  { %v1175_v9 = vmul.f32 %v1173_v25, %v1169_v24 }
0x1b7e   :  { %1177 = vrot.lane.b32.xlu0 %v1175_v9, %s2574_s30 }
0x1bf0   :  { %v1178_v30 = vpop.permute.xlu0 %1177 }
0x1bf1   :  { %v1180_v32 = vadd.f32 %v1178_v30, %v1170_v28 }
0x1bf3   :  { %2444 = vtanh.f32 %v1180_v32 }
0x1bf9   :  { %v2445_v45 = vpop.eup %2444 }
0x1bfa   :  { %1183 = vrot.lane.b32.xlu1 %v2445_v45, %s2573_s3 }
0x1c6c   :  { %v1184_v43 = vpop.permute.xlu1 %1183 }
0x1c6d   :  { %v3172_v44 = vmul.f32 %v1184_v43, %v1169_v24 }
0x1c6f   :  { %1191 = vrot.lane.b32.xlu0 %v3172_v44, %s2573_s3  ;;  %1188 = vrot.lane.b32.xlu2 %v3172_v44, %s2574_s30 }
0x1cc9   :  { %v3178_v36 = vpop.permute.xlu2 %1188 }
0x1ce1   :  { %v1192_v46 = vpop.permute.xlu0 %1191 }
0x1ce2   :  { %v1194_v49 = vsel %vm236_vm15, %v3178_v36, %v1192_v46 }
0x1ce3   :  { %v1195_v50 = vsel %vm2768_vm0, %v1194_v49, 0.0 }
0x1ce4   :  { %2317 = vmatmul.msk.f32.vlgmr.msra.gmra.mxu0 %vm166_vm2, %v1195_v50 }
0x1d61   :  { %v1216_v51 = vpop.f32.mrf.mxu0 }
0x1d62   :  { %v1219_v53 = vadd.f32 %v1216_v51, %v3095_v27 }
0x1d64   :  { %v2318_v55 = vmul.f32 -1.442695, %v1219_v53 }
0x1d66   :  { %2446 = vpow2.f32 %v2318_v55 }
0x1d6c   :  { %v2447_v56 = vpop.eup %2446 }
0x1d6d   :  { %v1224_v48 = vadd.f32 1.0, %v2447_v56 }
0x1d6f   :  { %2448 = vrcp.f32 %v1224_v48  ;;  %v1236_v57 = vand.u32 2147483648, %v1224_v48  ;;  %v1234_v58 = vand.u32 2147483647, %v1224_v48  ;;  %vm1230_vm9 = vweird.f32 %v1224_v48 }
0x1d70   :  { %2450 = vtanh.f32 %v1219_v53 }
0x1d71   :  { %v1237_v61 = vor.u32 1.1754944e-38, %v1236_v57  ;;  %vm1235_vm13 = vcmp.eq.f32.partialorder %v1234_v58, 8.507059e+37 }
0x1d75   :  { %v2449_v18 = vpop.eup %2448 }
0x1d76   :  { %v1226_v38 = vmul.f32 %v2449_v18, %v1224_v48  ;;  %vm1231_vm8 = vweird.f32 %v2449_v18  ;;  %v2451_v27 = vpop.eup %2450 }
0x1d77   :  { %vm1232_vm12 = vmor %vm1230_vm9, %vm1231_vm8 }
0x1d78   :  { %v1227_v54 = vsub.f32 1.0, %v1226_v38 }
0x1d7a   :  { %v1228_v26 = vmul.f32 %v2449_v18, %v1227_v54 }
0x1d7c   :  { %v1229_v13 = vadd.f32 %v2449_v18, %v1228_v26 }
0x1d7e   :  { %v1233_v63 = vsel %vm1232_vm12, %v2449_v18, %v1229_v13 }
0x1d7f   :  { %v1238_v62 = vsel %vm1235_vm13, %v1237_v61, %v1233_v63 }
0x1d80   :  { %v1240_v33 = vsel %vm2753_vm5, %v2451_v27, %v1238_v62 }
0x1d81   :  { %1243 = vrot.lane.b32.xlu1 %v1240_v33, %s2573_s3  ;;  %v1241_v3 = vmul.f32 %v1240_v33, %v1180_v32 }
0x1df3   :  { %v1244_v0 = vpop.permute.xlu1 %1243 }
0x1df4   :  { %v1246_v41 = vmul.f32 %v1244_v0, %v1240_v33 }
0x1df6   :  { %1248 = vrot.lane.b32.xlu2 %v1246_v41, %s2574_s30 }
0x1e50   :  { %v1249_v22 = vpop.permute.xlu2 %1248 }
0x1e51   :  { %v1251_v5 = vadd.f32 %v1249_v22, %v1241_v3 }
0x1e53   :  { %2452 = vtanh.f32 %v1251_v5 }
0x1e59   :  { %v2453_v6 = vpop.eup %2452 }
0x1e5a   :  { %1254 = vrot.lane.b32.xlu0 %v2453_v6, %s2573_s3 }
0x1ecc   :  { %v1255_v52 = vpop.permute.xlu0 %1254 }
0x1ecd   :  { %v3191_v60 = vmul.f32 %v1255_v52, %v1240_v33 }
0x1ecf   :  { %1262 = vrot.lane.b32.xlu2 %v3191_v60, %s2573_s3  ;;  %1259 = vrot.lane.b32.xlu1 %v3191_v60, %s2574_s30 }
0x1f29   :  { %v1263_v16 = vpop.permute.xlu2 %1262 }
0x1f41   :  { %v3197_v29 = vpop.permute.xlu1 %1259 }
0x1f42   :  { %v1265_v47 = vsel %vm236_vm15, %v3197_v29, %v1263_v16 }
0x1f43   :  { %v1266_v7 = vsel %vm2768_vm0, %v1265_v47, 0.0 }
0x1f44   :  { %2319 = vmatmul.msk.f32.vlgmr.msra.gmra.mxu1 %vm166_vm2, %v1266_v7 }
0x1fc1   :  { %v1287_v8 = vpop.f32.mrf.mxu1 }
0x1fc2   :  { %v1290_v10 = vadd.f32 %v1287_v8, %v3103_v39 }
0x1fc4   :  { %v2320_v12 = vmul.f32 -1.442695, %v1290_v10 }
0x1fc6   :  { %2454 = vpow2.f32 %v2320_v12 }
0x1fcc   :  { %v2455_v15 = vpop.eup %2454 }
0x1fcd   :  { %v1295_v17 = vadd.f32 1.0, %v2455_v15 }
0x1fcf   :  { %2456 = vrcp.f32 %v1295_v17  ;;  %v1307_v35 = vand.u32 2147483648, %v1295_v17  ;;  %v1305_v24 = vand.u32 2147483647, %v1295_v17  ;;  %vm1301_vm3 = vweird.f32 %v1295_v17 }
0x1fd0   :  { %2458 = vtanh.f32 %v1290_v10 }
0x1fd1   :  { %v1308_v9 = vor.u32 1.1754944e-38, %v1307_v35  ;;  %vm1306_vm6 = vcmp.eq.f32.partialorder %v1305_v24, 8.507059e+37 }
0x1fd5   :  { %v2457_v37 = vpop.eup %2456 }
0x1fd6   :  { %v1297_v19 = vmul.f32 %v2457_v37, %v1295_v17  ;;  %vm1302_vm14 = vweird.f32 %v2457_v37  ;;  %v2459_v39 = vpop.eup %2458 }
0x1fd7   :  { %vm1303_vm4 = vmor %vm1301_vm3, %vm1302_vm14 }
0x1fd8   :  { %v1298_v20 = vsub.f32 1.0, %v1297_v19 }
0x1fda   :  { %v1299_v21 = vmul.f32 %v2457_v37, %v1298_v20 }
0x1fdc   :  { %v1300_v25 = vadd.f32 %v2457_v37, %v1299_v21 }
0x1fde   :  { %v1304_v28 = vsel %vm1303_vm4, %v2457_v37, %v1300_v25 }
0x1fdf   :  { %v1309_v30 = vsel %vm1306_vm6, %v1308_v9, %v1304_v28 }
0x1fe0   :  { %v1311_v32 = vsel %vm2753_vm5, %v2459_v39, %v1309_v30 }
0x1fe1   :  { %1314 = vrot.lane.b32.xlu0 %v1311_v32, %s2573_s3  ;;  %v1312_v46 = vmul.f32 %v1311_v32, %v1251_v5 }
0x2053   :  { %v1315_v45 = vpop.permute.xlu0 %1314 }
0x2054   :  { %v1317_v43 = vmul.f32 %v1315_v45, %v1311_v32 }
0x2056   :  { %1319 = vrot.lane.b32.xlu1 %v1317_v43, %s2574_s30 }
0x20c8   :  { %v1320_v49 = vpop.permute.xlu1 %1319 }
0x20c9   :  { %v1322_v50 = vadd.f32 %v1320_v49, %v1312_v46 }
0x20cb   :  { %2460 = vtanh.f32 %v1322_v50 }
0x20d1   :  { %v2461_v51 = vpop.eup %2460 }
0x20d2   :  { %1325 = vrot.lane.b32.xlu2 %v2461_v51, %s2573_s3 }
0x212c   :  { %v1326_v53 = vpop.permute.xlu2 %1325 }
0x212d   :  { %v3210_v55 = vmul.f32 %v1326_v53, %v1311_v32 }
0x212f   :  { %1333 = vrot.lane.b32.xlu1 %v3210_v55, %s2573_s3  ;;  %1330 = vrot.lane.b32.xlu0 %v3210_v55, %s2574_s30 }
0x21a1   :  { %v1334_v56 = vpop.permute.xlu1 %1333  ;;  %v3216_v48 = vpop.permute.xlu0 %1330 }
0x21a2   :  { %v1336_v18 = vsel %vm236_vm15, %v3216_v48, %v1334_v56 }
0x21a3   :  { %v1337_v38 = vsel %vm2768_vm0, %v1336_v18, 0.0  ;;  %v1487_v18 = vrot.slane %v3191_v60, 2 }
0x21a4   :  { %2321 = vmatmul.msk.f32.vlgmr.msra.gmra.mxu2 %vm166_vm2, %v1337_v38  ;;  %v1492_v38 = vrot.slane %v3172_v44, 2  ;;  %v1502_v44 = vrot.slane %v3134_v31, 2  ;;  %v1554_v31 = vld [vmem:[%s3597_s7 + $0x78] sm:$0xff] }
0x21a5   :  { %1606 = vmatpush.msrb.mxu1 %v1554_v31 }
0x2227   :  { %v1358_v54 = vpop.f32.mrf.mxu2 }
0x2228   :  { %v1361_v57 = vadd.f32 %v1358_v54, %v3106_v40 }
0x222a   :  { %v2322_v26 = vmul.f32 -1.442695, %v1361_v57 }
0x222c   :  { %2462 = vpow2.f32 %v2322_v26  ;;  %v1482_v26 = vrot.slane %v3210_v55, 2 }
0x2232   :  { %v2463_v58 = vpop.eup %2462 }
0x2233   :  { %v1366_v13 = vadd.f32 1.0, %v2463_v58  ;;  %v1497_v58 = vrot.slane %v3153_v4, 2  ;;  %v1510_v4 = vrot.slane %v3116_v1, 2  ;;  %v1552_v1 = vld [vmem:[%s3597_s7 + $0x68] sm:$0xff] }
0x2234   :  { %1607 = vmatpush.msrb.mxu1 %v1552_v1 }
0x2235   :  { %2464 = vrcp.f32 %v1366_v13  ;;  %v1378_v62 = vand.u32 2147483648, %v1366_v13  ;;  %v1376_v0 = vand.u32 2147483647, %v1366_v13  ;;  %vm1372_vm8 = vweird.f32 %v1366_v13 }
0x2236   :  { %2466 = vtanh.f32 %v1361_v57 }
0x2237   :  { %v1379_v3 = vor.u32 1.1754944e-38, %v1378_v62  ;;  %vm1377_vm12 = vcmp.eq.f32.partialorder %v1376_v0, 8.507059e+37  ;;  %v1551_v0 = vld [vmem:[%s3597_s7 + $0x60] sm:$0xff] }
0x223b   :  { %v2465_v61 = vpop.eup %2464 }
0x223c   :  { %v1368_v63 = vmul.f32 %v2465_v61, %v1366_v13  ;;  %vm1373_vm7 = vweird.f32 %v2465_v61  ;;  %v2467_v40 = vpop.eup %2466 }
0x223d   :  { %vm1374_vm9 = vmor %vm1372_vm8, %vm1373_vm7 }
0x223e   :  { %v1369_v27 = vsub.f32 1.0, %v1368_v63 }
0x2240   :  { %v1370_v33 = vmul.f32 %v2465_v61, %v1369_v27 }
0x2242   :  { %v1371_v41 = vadd.f32 %v2465_v61, %v1370_v33  ;;  %v1553_v33 = vld [vmem:[%s3597_s7 + $0x70] sm:$0xff] }
0x2243   :  { %1583 = vmatpush.msrb.mxu0 %v1553_v33 }
0x2244   :  { %v1375_v22 = vsel %vm1374_vm9, %v2465_v61, %v1371_v41  ;;  %v1549_v41 = vld [vmem:[%s3597_s7 + $0x50] sm:$0xff] }
0x2245   :  { %v1380_v5 = vsel %vm1377_vm12, %v1379_v3, %v1375_v22  ;;  %v1550_v3 = vld [vmem:[%s3597_s7 + $0x58] sm:$0xff]  ;;  %1584 = vmatpush.msrb.mxu0 %v1551_v0 }
0x2246   :  { %v1382_v6 = vsel %vm2753_vm5, %v2467_v40, %v1380_v5  ;;  %v3280_v22 = vld [vmem:[%s3598_s8 + $0x38] sm:$0xff]  ;;  %v3285_v40 = vld [vmem:[%s3598_s8 + $0x30] sm:$0xff]  ;;  %v1547_v5 = vld [vmem:[%s3597_s7 + $0x40] sm:$0xff]  ;;  %1608 = vmatpush.msrb.mxu1 %v1550_v3 }
0x2247   :  { %1385 = vrot.lane.b32.xlu2 %v1382_v6, %s2573_s3  ;;  %v1383_v47 = vmul.f32 %v1382_v6, %v1322_v50  ;;  %1665 = vmatpush.msrb.mxu2 %v3280_v22 }
0x2248   :  { %1736 = vmatpush.msrb.mxu3 %v3280_v22  ;;  %1585 = vmatpush.msrb.mxu0 %v1549_v41 }
0x2249   :  { %1666 = vmatpush.msrb.mxu2 %v3285_v40 }
0x224a   :  { %1737 = vmatpush.msrb.mxu3 %v3285_v40  ;;  %1586 = vmatpush.msrb.mxu0 %v1547_v5 }
0x22a1   :  { %v1386_v52 = vpop.permute.xlu2 %1385 }
0x22a2   :  { %v1388_v16 = vmul.f32 %v1386_v52, %v1382_v6  ;;  %v1545_v52 = vld [vmem:[%s3597_s7 + $0x30] sm:$0xff] }
0x22a3   :  { %1587 = vmatpush.msrb.mxu0 %v1545_v52 }
0x22a4   :  { %1390 = vrot.lane.b32.xlu0 %v1388_v16, %s2574_s30  ;;  %v1546_v16 = vld [vmem:[%s3597_s7 + $0x38] sm:$0xff] }
0x2316   :  { %v1391_v7 = vpop.permute.xlu0 %1390 }
0x2317   :  { %v1393_v8 = vadd.f32 %v1391_v7, %v1383_v47  ;;  %v1543_v47 = vld [vmem:[%s3597_s7 + $0x20] sm:$0xff]  ;;  %v1544_v7 = vld [vmem:[%s3597_s7 + $0x28] sm:$0xff] }
0x2318   :  { %1588 = vmatpush.msrb.mxu0 %v1543_v47 }
0x2319   :  { %2468 = vtanh.f32 %v1393_v8 }
0x231f   :  { %v2469_v10 = vpop.eup %2468 }
0x2320   :  { %1396 = vrot.lane.b32.xlu1 %v2469_v10, %s2573_s3  ;;  %v1541_v10 = vld [vmem:[%s3597_s7 + $0x10] sm:$0xff] }
0x2321   :  { %1589 = vmatpush.msrb.mxu0 %v1541_v10 }
0x2392   :  { %v1397_v12 = vpop.permute.xlu1 %1396 }
0x2393   :  { %v1399_v15 = vmul.f32 %v1397_v12, %v1382_v6  ;;  %v1548_v6 = vld [vmem:[%s3597_s7 + $0x48] sm:$0xff]  ;;  %v1542_v12 = vld [vmem:[%s3597_s7 + $0x18] sm:$0xff] }
0x2394   :  { %1609 = vmatpush.msrb.mxu1 %v1548_v6 }
0x2395   :  { %1404 = vrot.lane.b32.xlu0 %v1399_v15, %s2573_s3  ;;  %1401 = vrot.lane.b32.xlu2 %v1399_v15, %s2574_s30  ;;  %v1477_v56 = vrot.slane %v1399_v15, 2  ;;  %v3325_v15 = vld [vmem:[%s3598_s8 + $0x20] sm:$0xff] }
0x2396   :  { %1610 = vmatpush.msrb.mxu1 %v1546_v16 }
0x2398   :  { %1611 = vmatpush.msrb.mxu1 %v1544_v7 }
0x239a   :  { %1612 = vmatpush.msrb.mxu1 %v1542_v12 }
0x23ef   :  { %v3231_v17 = vpop.permute.xlu2 %1401 }
0x2407   :  { %v1405_v37 = vpop.permute.xlu0 %1404 }
0x2408   :  { %v1407_v19 = vsel %vm236_vm15, %v3231_v17, %v1405_v37  ;;  %v1539_v37 = vld [vmem:[%s3597_s7] sm:$0xff] }
0x2409   :  { %v1408_v20 = vsel %vm2768_vm0, %v1407_v19, 0.0  ;;  %v1540_v19 = vld [vmem:[%s3597_s7 + $0x8] sm:$0xff]  ;;  %1590 = vmatpush.msrb.mxu0 %v1539_v37 }
0x240a   :  { %2323 = vmatmul.msk.f32.vlgmr.msra.gmra.mxu3 %vm166_vm2, %v1408_v20  ;;  %1613 = vmatpush.msrb.mxu1 %v1540_v19  ;;  %v3338_v20 = vld [vmem:[%s3598_s8 + $0x18] sm:$0xff] }
0x240b   :  { %1807 = vmatpush.msra.mxu0 %v3280_v22 }
0x240c   :  { %1878 = vmatpush.msra.mxu1 %v3280_v22 }
0x240d   :  { %1808 = vmatpush.msra.mxu0 %v3285_v40 }
0x240e   :  { %1879 = vmatpush.msra.mxu1 %v3285_v40 }
0x248d   :  { %v1429_v35 = vpop.f32.mrf.mxu3 }
0x248e   :  { %v1432_v21 = vadd.f32 %v1429_v35, %v3109_v42  ;;  %v3343_v35 = vld [vmem:[%s3598_s8 + $0x10] sm:$0xff] }
0x2490   :  { %v2324_v24 = vmul.f32 -1.442695, %v1432_v21 }
0x2492   :  { %2470 = vpow2.f32 %v2324_v24  ;;  %v3362_v24 = vld [vmem:[%s3598_s8] sm:$0xff] }
0x2498   :  { %v2471_v25 = vpop.eup %2470 }
0x2499   :  { %v1437_v9 = vadd.f32 1.0, %v2471_v25 }
0x249b   :  { %2472 = vrcp.f32 %v1437_v9  ;;  %v1449_v32 = vand.u32 2147483648, %v1437_v9  ;;  %v1447_v43 = vand.u32 2147483647, %v1437_v9  ;;  %vm1443_vm14 = vweird.f32 %v1437_v9 }
0x249c   :  { %2474 = vtanh.f32 %v1432_v21  ;;  %v3354_v21 = vld [vmem:[%s3598_s8 + $0x8] sm:$0xff] }
0x249d   :  { %v1450_v49 = vor.u32 1.1754944e-38, %v1449_v32  ;;  %vm1448_vm4 = vcmp.eq.f32.partialorder %v1447_v43, 8.507059e+37 }
0x24a1   :  { %v2473_v28 = vpop.eup %2472 }
0x24a2   :  { %v1439_v39 = vmul.f32 %v2473_v28, %v1437_v9  ;;  %vm1444_vm13 = vweird.f32 %v2473_v28  ;;  %v2475_v42 = vpop.eup %2474 }
0x24a3   :  { %vm1445_vm3 = vmor %vm1443_vm14, %vm1444_vm13 }
0x24a4   :  { %v1440_v30 = vsub.f32 1.0, %v1439_v39 }
0x24a6   :  { %v1441_v45 = vmul.f32 %v2473_v28, %v1440_v30 }
0x24a8   :  { %v1442_v46 = vadd.f32 %v2473_v28, %v1441_v45 }
0x24aa   :  { %v1446_v50 = vsel %vm1445_vm3, %v2473_v28, %v1442_v46 }
0x24ab   :  { %v1451_v51 = vsel %vm1448_vm4, %v1450_v49, %v1446_v50 }
0x24ac   :  { %v1453_v53 = vsel %vm2753_vm5, %v2475_v42, %v1451_v51 }
0x24ad   :  { %1456 = vrot.lane.b32.xlu1 %v1453_v53, %s2573_s3  ;;  %v1454_v13 = vmul.f32 %v1453_v53, %v1393_v8  ;;  %v3312_v8 = vld [vmem:[%s3598_s8 + $0x28] sm:$0xff] }
0x24ae   :  { %1667 = vmatpush.msrb.mxu2 %v3312_v8  ;;  %1738 = vmatpush.msrb.mxu3 %v3312_v8 }
0x24af   :  { %1809 = vmatpush.msra.mxu0 %v3312_v8  ;;  %1880 = vmatpush.msra.mxu1 %v3312_v8 }
0x24b0   :  { %1668 = vmatpush.msrb.mxu2 %v3325_v15  ;;  %1739 = vmatpush.msrb.mxu3 %v3325_v15 }
0x24b1   :  { %1810 = vmatpush.msra.mxu0 %v3325_v15  ;;  %1881 = vmatpush.msra.mxu1 %v3325_v15 }
0x24b2   :  { %1669 = vmatpush.msrb.mxu2 %v3338_v20  ;;  %1740 = vmatpush.msrb.mxu3 %v3338_v20 }
0x24b3   :  { %1811 = vmatpush.msra.mxu0 %v3338_v20  ;;  %1882 = vmatpush.msra.mxu1 %v3338_v20 }
0x24b4   :  { %1670 = vmatpush.msrb.mxu2 %v3343_v35  ;;  %1741 = vmatpush.msrb.mxu3 %v3343_v35 }
0x24b5   :  { %1478 = vrot.lane.b32.xlu1 %v1477_v56, %s2573_s3  ;;  %1812 = vmatpush.msra.mxu0 %v3343_v35 }
0x24b6   :  { %1671 = vmatpush.msrb.mxu2 %v3354_v21  ;;  %1742 = vmatpush.msrb.mxu3 %v3354_v21 }
0x24b7   :  { %1883 = vmatpush.msra.mxu1 %v3343_v35  ;;  %1813 = vmatpush.msra.mxu0 %v3354_v21 }
0x24b8   :  { %1672 = vmatpush.msrb.mxu2 %v3362_v24  ;;  %1743 = vmatpush.msrb.mxu3 %v3362_v24 }
0x24b9   :  { %1673 = vmatmul.f32.vlgmr.msrb.gmra.mxu2 %v2572_v14  ;;  %1884 = vmatpush.msra.mxu1 %v3354_v21 }
0x24ba   :  { %1949 = vmatpush.msra.mxu2 %v3280_v22  ;;  %2020 = vmatpush.msra.mxu3 %v3280_v22 }
0x24bb   :  { %1814 = vmatpush.msra.mxu0 %v3362_v24  ;;  %1885 = vmatpush.msra.mxu1 %v3362_v24 }
0x24bc   :  { %1950 = vmatpush.msra.mxu2 %v3285_v40  ;;  %2021 = vmatpush.msra.mxu3 %v3285_v40 }
0x24bd   :  { %1488 = vrot.lane.b32.xlu1 %v1487_v18, %s2573_s3 }
0x24be   :  { %1951 = vmatpush.msra.mxu2 %v3312_v8  ;;  %2022 = vmatpush.msra.mxu3 %v3312_v8 }
0x24c0   :  { %1952 = vmatpush.msra.mxu2 %v3325_v15  ;;  %2023 = vmatpush.msra.mxu3 %v3325_v15 }
0x24c2   :  { %1953 = vmatpush.msra.mxu2 %v3338_v20  ;;  %2024 = vmatpush.msra.mxu3 %v3338_v20 }
0x24c4   :  { %1954 = vmatpush.msra.mxu2 %v3343_v35  ;;  %2025 = vmatpush.msra.mxu3 %v3343_v35 }
0x24c5   :  { %1493 = vrot.lane.b32.xlu1 %v1492_v38, %s2573_s3 }
0x24c6   :  { %1955 = vmatpush.msra.mxu2 %v3354_v21  ;;  %2026 = vmatpush.msra.mxu3 %v3354_v21 }
0x24c8   :  { %1956 = vmatpush.msra.mxu2 %v3362_v24  ;;  %2027 = vmatpush.msra.mxu3 %v3362_v24 }
0x24ca   :  { %2245 = vmatpush.msrb.mxu2 %v2229_v59 }
0x251f   :  { %v1457_v54 = vpop.permute.xlu1 %1456 }
0x2520   :  { %v1459_v57 = vmul.f32 %v1457_v54, %v1453_v53 }
0x2522   :  { %1461 = vrot.lane.b32.xlu2 %v1459_v57, %s2574_s30 }
0x2527   :  { %v1479_v25 = vpop.permute.xlu1 %1478 }
0x2528   :  { %v1481_v39 = vsel %vm236_vm15, %v3140_v34, %v1479_v25 }
0x2529   :  { %v1516_v45 = vrot.slane %v1481_v39, 6 }
0x252a   :  { %1483 = vrot.lane.b32.xlu2 %v1482_v26, %s2573_s3 }
0x252f   :  { %v1489_v28 = vpop.permute.xlu1 %1488 }
0x2530   :  { %v1491_v32 = vsel %vm236_vm15, %v3178_v36, %v1489_v28 }
0x2531   :  { %v1522_v42 = vrot.slane %v1491_v32, 2 }
0x2532   :  { %1498 = vrot.lane.b32.xlu2 %v1497_v58, %s2573_s3 }
0x2537   :  { %v1494_v56 = vpop.permute.xlu1 %1493 }
0x253c   :  { %v1674_v6 = vpop.f32.mrf.mxu2 }
0x257c   :  { %v1462_v60 = vpop.permute.xlu2 %1461 }
0x257d   :  { %v1464_v61 = vadd.f32 %v1462_v60, %v1454_v13 }
0x257f   :  { %2476 = vtanh.f32 %v1464_v61 }
0x2584   :  { %v1484_v14 = vpop.permute.xlu2 %1483 }
0x2585   :  { %v2477_v63 = vpop.eup %2476  ;;  %v1486_v30 = vsel %vm236_vm15, %v3159_v23, %v1484_v14 }
0x2586   :  { %1467 = vrot.lane.b32.xlu0 %v2477_v63, %s2573_s3  ;;  %v1519_v49 = vrot.slane %v1486_v30, 4 }
0x258c   :  { %v1499_v43 = vpop.permute.xlu2 %1498 }
0x258d   :  { %v1501_v34 = vsel %vm236_vm15, %v3216_v48, %v1499_v43 }
0x258e   :  { %1503 = vrot.lane.b32.xlu0 %v1502_v44, %s2573_s3  ;;  %v1525_v18 = vrot.slane %v1501_v34, 6 }
0x25f8   :  { %v1468_v27 = vpop.permute.xlu0 %1467 }
0x25f9   :  { %v1470_v62 = vmul.f32 %v1468_v27, %v1453_v53 }
0x25fb   :  { %v1472_v55 = vrot.slane %v1470_v62, 2  ;;  %1507 = vrot.lane.b32.xlu2 %v1470_v62, %s2574_s30 }
0x25fd   :  { %1473 = vrot.lane.b32.xlu0 %v1472_v55, %s2573_s3 }
0x2600   :  { %v1504_v9 = vpop.permute.xlu0 %1503 }
0x2601   :  { %v1506_v23 = vsel %vm236_vm15, %v3231_v17, %v1504_v9  ;;  %v1496_v17 = vsel %vm236_vm15, %v3197_v29, %v1494_v56  ;;  %v1563_v29 = vld [vmem:[%s3599_s9] sm:$0x3] }
0x2602   :  { %v1536_v26 = vsel %vm132_vm1, %v1496_v17, %v1525_v18  ;;  %v1566_v60 = vperm.slane %v1563_v29, 1  ;;  %v1565_v44 = vperm.slane %v1563_v29, 0 }
0x2605   :  { %1511 = vrot.lane.b32.xlu0 %v1510_v4, %s2573_s3 }
0x2655   :  { %v1508_v38 = vpop.permute.xlu2 %1507 }
0x266f   :  { %v1474_v46 = vpop.permute.xlu0 %1473 }
0x2670   :  { %v1476_v50 = vsel %vm236_vm15, %v3122_v2, %v1474_v46  ;;  %v1528_v2 = vrot.slane %v1506_v23, 4 }
0x2671   :  { %v1533_v51 = vsel %vm132_vm1, %v1476_v50, %v1516_v45 }
0x2672   :  { %v1534_v53 = vsel %vm790_vm11, %v1533_v51, %v1519_v49  ;;  %v1537_v58 = vsel %vm790_vm11, %v1536_v26, %v1528_v2 }
0x2673   :  { %v1535_v36 = vsel %vm792_vm10, %v1534_v53, %v1522_v42 }
0x2674   :  { %2325 = vmatmul.msk.f32.vlgmr.msrb.gmra.mxu0 %vm166_vm2, %v1535_v36  ;;  %2327 = vmatmul.msk.f32.vlgmr.msrb.gmra.mxu1 %vm166_vm2, %v1535_v36 }
0x2675   :  { %2091 = vmatpush.msrb.mxu0 %v3280_v22  ;;  %2162 = vmatpush.msrb.mxu1 %v3280_v22 }
0x2677   :  { %v1512_v48 = vpop.permute.xlu0 %1511  ;;  %2092 = vmatpush.msrb.mxu0 %v3285_v40  ;;  %2163 = vmatpush.msrb.mxu1 %v3285_v40 }
0x2678   :  { %v1514_v54 = vsel %vm236_vm15, %v1508_v38, %v1512_v48 }
0x2679   :  { %v1531_v57 = vrot.slane %v1514_v54, 2  ;;  %2093 = vmatpush.msrb.mxu0 %v3312_v8  ;;  %2164 = vmatpush.msrb.mxu1 %v3312_v8 }
0x267b   :  { %v1538_v13 = vsel %vm792_vm10, %v1537_v58, %v1531_v57  ;;  %2094 = vmatpush.msrb.mxu0 %v3325_v15  ;;  %2165 = vmatpush.msrb.mxu1 %v3325_v15 }
0x267c   :  { %2326 = vmatmul.msk.f32.gmra.mxu0 %vm166_vm2, %v1538_v13  ;;  %2328 = vmatmul.msk.f32.gmra.mxu1 %vm166_vm2, %v1538_v13 }
0x267d   :  { %2095 = vmatpush.msrb.mxu0 %v3338_v20  ;;  %2166 = vmatpush.msrb.mxu1 %v3338_v20 }
0x267f   :  { %2096 = vmatpush.msrb.mxu0 %v3343_v35  ;;  %2167 = vmatpush.msrb.mxu1 %v3343_v35 }
0x2681   :  { %2097 = vmatpush.msrb.mxu0 %v3354_v21  ;;  %2168 = vmatpush.msrb.mxu1 %v3354_v21 }
0x2683   :  { %2098 = vmatpush.msrb.mxu0 %v3362_v24  ;;  %2169 = vmatpush.msrb.mxu1 %v3362_v24 }
0x26f1   :  { %v1592_v61 = vpop.f32.mrf.mxu0  ;;  %v1615_v63 = vpop.f32.mrf.mxu1 }
0x26f2   :  { %v1616_v27 = vadd.f32 %v1615_v63, %v1566_v60  ;;  %v1593_v62 = vadd.f32 %v1592_v61, %v1565_v44 }
0x26f4   :  { %v1626_v0 = vrot.slane %v1593_v62, 2  ;;  %v1631_v1 = vrot.slane %v1593_v62, 4  ;;  %v1634_v41 = vrot.slane %v1593_v62, 6  ;;  %v1640_v3 = vrot.slane %v1616_v27, 4 }
0x26f5   :  { %v1646_v22 = vrot.slane %v1616_v27, 2  ;;  %v1654_v40 = vrot.slane %v1616_v27, 6 }
0x26f9   :  { %v1595_v55 = vpop.f32.mrf.mxu0  ;;  %v1618_v4 = vpop.f32.mrf.mxu1 }
0x26fa   :  { %v1596_v33 = vadd.f32 %v1595_v55, %v1565_v44  ;;  %v1619_v31 = vadd.f32 %v1618_v4, %v1566_v60 }
0x26fc   :  { %v1622_v5 = vrot.slane %v1619_v31, 4  ;;  %v1628_v52 = vrot.slane %v1619_v31, 2  ;;  %v3441_v16 = vsel %vm132_vm1, %v1631_v1, %v1619_v31  ;;  %v1636_v47 = vrot.slane %v1619_v31, 6 }
0x26fd   :  { %v3444_v7 = vsel %vm132_vm1, %v1596_v33, %v1640_v3  ;;  %v1644_v8 = vrot.slane %v1596_v33, 2  ;;  %v1649_v10 = vrot.slane %v1596_v33, 4  ;;  %v1652_v12 = vrot.slane %v1596_v33, 6 }
0x26fe   :  { %v1624_v15 = vsel %vm132_vm1, %v1593_v62, %v1622_v5  ;;  %v1630_v37 = vsel %vm132_vm1, %v1626_v0, %v1628_v52  ;;  %v3449_v19 = vsel %vm132_vm1, %v1634_v41, %v1636_v47 }
0x26ff   :  { %v1677_v20 = vadd.f32 %v1674_v6, %v1624_v15  ;;  %v3452_v35 = vsel %vm132_vm1, %v1644_v8, %v1646_v22  ;;  %v3455_v21 = vsel %vm132_vm1, %v1649_v10, %v1616_v27  ;;  %v3458_v24 = vsel %vm132_vm1, %v1652_v12, %v1654_v40 }
0x2701   :  { %v2329_v25 = vmul.f32 -1.442695, %v1677_v20 }
0x2703   :  { %2478 = vpow2.f32 %v2329_v25 }
0x2709   :  { %v2479_v14 = vpop.eup %2478 }
0x270a   :  { %v1682_v9 = vadd.f32 1.0, %v2479_v14 }
0x270c   :  { %2480 = vrcp.f32 %v1682_v9  ;;  %v1694_v32 = vand.u32 2147483648, %v1682_v9  ;;  %v1692_v43 = vand.u32 2147483647, %v1682_v9  ;;  %vm1688_vm11 = vweird.f32 %v1682_v9 }
0x270d   :  { %2482 = vtanh.f32 %v1677_v20 }
0x270e   :  { %v1695_v49 = vor.u32 1.1754944e-38, %v1694_v32  ;;  %vm1693_vm1 = vcmp.eq.f32.partialorder %v1692_v43, 8.507059e+37 }
0x2712   :  { %v2481_v28 = vpop.eup %2480 }
0x2713   :  { %v1684_v39 = vmul.f32 %v2481_v28, %v1682_v9  ;;  %vm1689_vm10 = vweird.f32 %v2481_v28  ;;  %v2483_v42 = vpop.eup %2482 }
0x2714   :  { %vm1690_vm6 = vmor %vm1688_vm11, %vm1689_vm10 }
0x2715   :  { %v1685_v30 = vsub.f32 1.0, %v1684_v39 }
0x2717   :  { %v1686_v45 = vmul.f32 %v2481_v28, %v1685_v30 }
0x2719   :  { %v1687_v46 = vadd.f32 %v2481_v28, %v1686_v45 }
0x271b   :  { %v1691_v50 = vsel %vm1690_vm6, %v2481_v28, %v1687_v46 }
0x271c   :  { %v1696_v51 = vsel %vm1693_vm1, %v1695_v49, %v1691_v50 }
0x271d   :  { %v1698_v34 = vsel %vm2753_vm5, %v2483_v42, %v1696_v51 }
0x271e   :  { %1701 = vrot.lane.b32.xlu1 %v1698_v34, %s2573_s3  ;;  %v1699_v36 = vmul.f32 0.0, %v1698_v34 }
0x2790   :  { %v1702_v53 = vpop.permute.xlu1 %1701 }
0x2791   :  { %v1704_v23 = vmul.f32 %v1702_v53, %v1698_v34 }
0x2793   :  { %1706 = vrot.lane.b32.xlu2 %v1704_v23, %s2574_s30 }
0x27ed   :  { %v1707_v56 = vpop.permute.xlu2 %1706 }
0x27ee   :  { %v1709_v18 = vadd.f32 %v1707_v56, %v1699_v36 }
0x27f0   :  { %2484 = vtanh.f32 %v1709_v18 }
0x27f6   :  { %v2485_v2 = vpop.eup %2484 }
0x27f7   :  { %1712 = vrot.lane.b32.xlu0 %v2485_v2, %s2573_s3 }
0x2869   :  { %v1713_v38 = vpop.permute.xlu0 %1712 }
0x286a   :  { %v3465_v48 = vmul.f32 %v1713_v38, %v1698_v34 }
0x286c   :  { %1720 = vrot.lane.b32.xlu2 %v3465_v48, %s2573_s3  ;;  %1717 = vrot.lane.b32.xlu1 %v3465_v48, %s2574_s30 }
0x28c6   :  { %v1721_v17 = vpop.permute.xlu2 %1720 }
0x28de   :  { %v1718_v54 = vpop.permute.xlu1 %1717 }
0x28df   :  { %v1723_v57 = vsel %vm236_vm15, %v1718_v54, %v1721_v17 }
0x28e0   :  { %v1724_v26 = vsel %vm2768_vm0, %v1723_v57, 0.0 }
0x28e1   :  { %2330 = vmatmul.msk.f32.vlgmr.msrb.gmra.mxu3 %vm166_vm2, %v1724_v26 }
0x2964   :  { %v1745_v58 = vpop.f32.mrf.mxu3 }
0x2965   :  { %v1748_v13 = vadd.f32 %v1745_v58, %v1630_v37 }
0x2967   :  { %v2331_v29 = vmul.f32 -1.442695, %v1748_v13 }
0x2969   :  { %2486 = vpow2.f32 %v2331_v29 }
0x296f   :  { %v2487_v60 = vpop.eup %2486 }
0x2970   :  { %v1753_v61 = vadd.f32 1.0, %v2487_v60 }
0x2972   :  { %2488 = vrcp.f32 %v1753_v61  ;;  %v1765_v62 = vand.u32 2147483648, %v1753_v61  ;;  %v1763_v4 = vand.u32 2147483647, %v1753_v61  ;;  %vm1759_vm8 = vweird.f32 %v1753_v61 }
0x2973   :  { %2490 = vtanh.f32 %v1748_v13 }
0x2974   :  { %v1766_v31 = vor.u32 1.1754944e-38, %v1765_v62  ;;  %vm1764_vm12 = vcmp.eq.f32.partialorder %v1763_v4, 8.507059e+37 }
0x2978   :  { %v2489_v63 = vpop.eup %2488 }
0x2979   :  { %v1755_v44 = vmul.f32 %v2489_v63, %v1753_v61  ;;  %vm1760_vm7 = vweird.f32 %v2489_v63  ;;  %v2491_v1 = vpop.eup %2490 }
0x297a   :  { %vm1761_vm9 = vmor %vm1759_vm8, %vm1760_vm7 }
0x297b   :  { %v1756_v27 = vsub.f32 1.0, %v1755_v44 }
0x297d   :  { %v1757_v55 = vmul.f32 %v2489_v63, %v1756_v27 }
0x297f   :  { %v1758_v33 = vadd.f32 %v2489_v63, %v1757_v55 }
0x2981   :  { %v1762_v0 = vsel %vm1761_vm9, %v2489_v63, %v1758_v33 }
0x2982   :  { %v1767_v41 = vsel %vm1764_vm12, %v1766_v31, %v1762_v0 }
0x2983   :  { %v1769_v3 = vsel %vm2753_vm5, %v2491_v1, %v1767_v41 }
0x2984   :  { %1772 = vrot.lane.b32.xlu0 %v1769_v3, %s2573_s3  ;;  %v1770_v5 = vmul.f32 %v1769_v3, %v1709_v18 }
0x29f6   :  { %v1773_v22 = vpop.permute.xlu0 %1772 }
0x29f7   :  { %v1775_v40 = vmul.f32 %v1773_v22, %v1769_v3 }
0x29f9   :  { %1777 = vrot.lane.b32.xlu1 %v1775_v40, %s2574_s30 }
0x2a6b   :  { %v1778_v6 = vpop.permute.xlu1 %1777 }
0x2a6c   :  { %v1780_v52 = vadd.f32 %v1778_v6, %v1770_v5 }
0x2a6e   :  { %2492 = vtanh.f32 %v1780_v52 }
0x2a74   :  { %v2493_v47 = vpop.eup %2492 }
0x2a75   :  { %1783 = vrot.lane.b32.xlu2 %v2493_v47, %s2573_s3 }
0x2acf   :  { %v1784_v8 = vpop.permute.xlu2 %1783 }
0x2ad0   :  { %v1786_v10 = vmul.f32 %v1784_v8, %v1769_v3 }
0x2ad2   :  { %1791 = vrot.lane.b32.xlu1 %v1786_v10, %s2573_s3  ;;  %1788 = vrot.lane.b32.xlu0 %v1786_v10, %s2574_s30 }
0x2b44   :  { %v1792_v12 = vpop.permute.xlu1 %1791  ;;  %v1789_v15 = vpop.permute.xlu0 %1788 }
0x2b45   :  { %v1794_v37 = vsel %vm236_vm15, %v1789_v15, %v1792_v12 }
0x2b46   :  { %v1795_v20 = vsel %vm2768_vm0, %v1794_v37, 0.0 }
0x2b47   :  { %2332 = vmatmul.msk.f32.vlgmr.msra.gmra.mxu0 %vm166_vm2, %v1795_v20 }
0x2bc4   :  { %v1816_v25 = vpop.f32.mrf.mxu0 }
0x2bc5   :  { %v1819_v14 = vadd.f32 %v1816_v25, %v3441_v16 }
0x2bc7   :  { %v2333_v9 = vmul.f32 -1.442695, %v1819_v14 }
0x2bc9   :  { %2494 = vpow2.f32 %v2333_v9 }
0x2bcf   :  { %v2495_v28 = vpop.eup %2494 }
0x2bd0   :  { %v1824_v39 = vadd.f32 1.0, %v2495_v28 }
0x2bd2   :  { %2496 = vrcp.f32 %v1824_v39  ;;  %v1836_v43 = vand.u32 2147483648, %v1824_v39  ;;  %v1834_v49 = vand.u32 2147483647, %v1824_v39  ;;  %vm1830_vm14 = vweird.f32 %v1824_v39 }
0x2bd3   :  { %2498 = vtanh.f32 %v1819_v14 }
0x2bd4   :  { %v1837_v42 = vor.u32 1.1754944e-38, %v1836_v43  ;;  %vm1835_vm4 = vcmp.eq.f32.partialorder %v1834_v49, 8.507059e+37 }
0x2bd8   :  { %v2497_v30 = vpop.eup %2496 }
0x2bd9   :  { %v1826_v32 = vmul.f32 %v2497_v30, %v1824_v39  ;;  %vm1831_vm13 = vweird.f32 %v2497_v30  ;;  %v2499_v16 = vpop.eup %2498 }
0x2bda   :  { %vm1832_vm3 = vmor %vm1830_vm14, %vm1831_vm13 }
0x2bdb   :  { %v1827_v45 = vsub.f32 1.0, %v1826_v32 }
0x2bdd   :  { %v1828_v46 = vmul.f32 %v2497_v30, %v1827_v45 }
0x2bdf   :  { %v1829_v50 = vadd.f32 %v2497_v30, %v1828_v46 }
0x2be1   :  { %v1833_v51 = vsel %vm1832_vm3, %v2497_v30, %v1829_v50 }
0x2be2   :  { %v1838_v34 = vsel %vm1835_vm4, %v1837_v42, %v1833_v51 }
0x2be3   :  { %v1840_v53 = vsel %vm2753_vm5, %v2499_v16, %v1838_v34 }
0x2be4   :  { %1843 = vrot.lane.b32.xlu2 %v1840_v53, %s2573_s3  ;;  %v1841_v56 = vmul.f32 %v1840_v53, %v1780_v52 }
0x2c3e   :  { %v1844_v23 = vpop.permute.xlu2 %1843 }
0x2c3f   :  { %v1846_v36 = vmul.f32 %v1844_v23, %v1840_v53 }
0x2c41   :  { %1848 = vrot.lane.b32.xlu0 %v1846_v36, %s2574_s30 }
0x2cb3   :  { %v1849_v18 = vpop.permute.xlu0 %1848 }
0x2cb4   :  { %v1851_v2 = vadd.f32 %v1849_v18, %v1841_v56 }
0x2cb6   :  { %2500 = vtanh.f32 %v1851_v2 }
0x2cbc   :  { %v2501_v38 = vpop.eup %2500 }
0x2cbd   :  { %1854 = vrot.lane.b32.xlu1 %v2501_v38, %s2573_s3 }
0x2d2f   :  { %v1855_v17 = vpop.permute.xlu1 %1854 }
0x2d30   :  { %v1857_v54 = vmul.f32 %v1855_v17, %v1840_v53 }
0x2d32   :  { %1862 = vrot.lane.b32.xlu0 %v1857_v54, %s2573_s3  ;;  %1859 = vrot.lane.b32.xlu2 %v1857_v54, %s2574_s30 }
0x2d8c   :  { %v1860_v57 = vpop.permute.xlu2 %1859 }
0x2da4   :  { %v1863_v26 = vpop.permute.xlu0 %1862 }
0x2da5   :  { %v1865_v58 = vsel %vm236_vm15, %v1860_v57, %v1863_v26 }
0x2da6   :  { %v1866_v13 = vsel %vm2768_vm0, %v1865_v58, 0.0 }
0x2da7   :  { %2334 = vmatmul.msk.f32.vlgmr.msra.gmra.mxu1 %vm166_vm2, %v1866_v13 }
0x2e24   :  { %v1887_v29 = vpop.f32.mrf.mxu1 }
0x2e25   :  { %v1890_v60 = vadd.f32 %v1887_v29, %v3449_v19 }
0x2e27   :  { %v2335_v61 = vmul.f32 -1.442695, %v1890_v60 }
0x2e29   :  { %2502 = vpow2.f32 %v2335_v61 }
0x2e2f   :  { %v2503_v63 = vpop.eup %2502 }
0x2e30   :  { %v1895_v44 = vadd.f32 1.0, %v2503_v63 }
0x2e32   :  { %2504 = vrcp.f32 %v1895_v44  ;;  %v1907_v4 = vand.u32 2147483648, %v1895_v44  ;;  %v1905_v31 = vand.u32 2147483647, %v1895_v44  ;;  %vm1901_vm11 = vweird.f32 %v1895_v44 }
0x2e33   :  { %2506 = vtanh.f32 %v1890_v60 }
0x2e34   :  { %v1908_v1 = vor.u32 1.1754944e-38, %v1907_v4  ;;  %vm1906_vm1 = vcmp.eq.f32.partialorder %v1905_v31, 8.507059e+37 }
0x2e38   :  { %v2505_v27 = vpop.eup %2504 }
0x2e39   :  { %v1897_v62 = vmul.f32 %v2505_v27, %v1895_v44  ;;  %vm1902_vm10 = vweird.f32 %v2505_v27  ;;  %v2507_v19 = vpop.eup %2506 }
0x2e3a   :  { %vm1903_vm6 = vmor %vm1901_vm11, %vm1902_vm10 }
0x2e3b   :  { %v1898_v55 = vsub.f32 1.0, %v1897_v62 }
0x2e3d   :  { %v1899_v33 = vmul.f32 %v2505_v27, %v1898_v55 }
0x2e3f   :  { %v1900_v0 = vadd.f32 %v2505_v27, %v1899_v33 }
0x2e41   :  { %v1904_v41 = vsel %vm1903_vm6, %v2505_v27, %v1900_v0 }
0x2e42   :  { %v1909_v3 = vsel %vm1906_vm1, %v1908_v1, %v1904_v41 }
0x2e43   :  { %v1911_v22 = vsel %vm2753_vm5, %v2507_v19, %v1909_v3 }
0x2e44   :  { %1914 = vrot.lane.b32.xlu1 %v1911_v22, %s2573_s3  ;;  %v1912_v6 = vmul.f32 %v1911_v22, %v1851_v2 }
0x2eb6   :  { %v1915_v40 = vpop.permute.xlu1 %1914 }
0x2eb7   :  { %v1917_v5 = vmul.f32 %v1915_v40, %v1911_v22 }
0x2eb9   :  { %1919 = vrot.lane.b32.xlu2 %v1917_v5, %s2574_s30 }
0x2f13   :  { %v1920_v52 = vpop.permute.xlu2 %1919 }
0x2f14   :  { %v1922_v47 = vadd.f32 %v1920_v52, %v1912_v6 }
0x2f16   :  { %2508 = vtanh.f32 %v1922_v47 }
0x2f1c   :  { %v2509_v8 = vpop.eup %2508 }
0x2f1d   :  { %1925 = vrot.lane.b32.xlu0 %v2509_v8, %s2573_s3 }
0x2f8f   :  { %v1926_v10 = vpop.permute.xlu0 %1925 }
0x2f90   :  { %v1928_v12 = vmul.f32 %v1926_v10, %v1911_v22 }
0x2f92   :  { %1933 = vrot.lane.b32.xlu2 %v1928_v12, %s2573_s3  ;;  %1930 = vrot.lane.b32.xlu1 %v1928_v12, %s2574_s30 }
0x2fec   :  { %v1934_v15 = vpop.permute.xlu2 %1933 }
0x3004   :  { %v1931_v37 = vpop.permute.xlu1 %1930 }
0x3005   :  { %v1936_v20 = vsel %vm236_vm15, %v1931_v37, %v1934_v15 }
0x3006   :  { %v1937_v25 = vsel %vm2768_vm0, %v1936_v20, 0.0 }
0x3007   :  { %2336 = vmatmul.msk.f32.vlgmr.msra.gmra.mxu2 %vm166_vm2, %v1937_v25 }
0x308a   :  { %v1958_v14 = vpop.f32.mrf.mxu2 }
0x308b   :  { %v1961_v9 = vadd.f32 %v1958_v14, %v3444_v7 }
0x308d   :  { %v2337_v28 = vmul.f32 -1.442695, %v1961_v9 }
0x308f   :  { %2510 = vpow2.f32 %v2337_v28 }
0x3095   :  { %v2511_v39 = vpop.eup %2510 }
0x3096   :  { %v1966_v30 = vadd.f32 1.0, %v2511_v39 }
0x3098   :  { %2512 = vrcp.f32 %v1966_v30  ;;  %v1978_v46 = vand.u32 2147483648, %v1966_v30  ;;  %v1976_v50 = vand.u32 2147483647, %v1966_v30  ;;  %vm1972_vm8 = vweird.f32 %v1966_v30 }
0x3099   :  { %2514 = vtanh.f32 %v1961_v9 }
0x309a   :  { %v1979_v51 = vor.u32 1.1754944e-38, %v1978_v46  ;;  %vm1977_vm12 = vcmp.eq.f32.partialorder %v1976_v50, 8.507059e+37 }
0x309e   :  { %v2513_v32 = vpop.eup %2512 }
0x309f   :  { %v1968_v45 = vmul.f32 %v2513_v32, %v1966_v30  ;;  %vm1973_vm7 = vweird.f32 %v2513_v32  ;;  %v2515_v7 = vpop.eup %2514 }
0x30a0   :  { %vm1974_vm9 = vmor %vm1972_vm8, %vm1973_vm7 }
0x30a1   :  { %v1969_v43 = vsub.f32 1.0, %v1968_v45 }
0x30a3   :  { %v1970_v49 = vmul.f32 %v2513_v32, %v1969_v43 }
0x30a5   :  { %v1971_v42 = vadd.f32 %v2513_v32, %v1970_v49 }
0x30a7   :  { %v1975_v16 = vsel %vm1974_vm9, %v2513_v32, %v1971_v42 }
0x30a8   :  { %v1980_v34 = vsel %vm1977_vm12, %v1979_v51, %v1975_v16 }
0x30a9   :  { %v1982_v53 = vsel %vm2753_vm5, %v2515_v7, %v1980_v34 }
0x30aa   :  { %1985 = vrot.lane.b32.xlu0 %v1982_v53, %s2573_s3  ;;  %v1983_v56 = vmul.f32 %v1982_v53, %v1922_v47 }
0x311c   :  { %v1986_v23 = vpop.permute.xlu0 %1985 }
0x311d   :  { %v1988_v36 = vmul.f32 %v1986_v23, %v1982_v53 }
0x311f   :  { %1990 = vrot.lane.b32.xlu1 %v1988_v36, %s2574_s30 }
0x3191   :  { %v1991_v18 = vpop.permute.xlu1 %1990 }
0x3192   :  { %v1993_v2 = vadd.f32 %v1991_v18, %v1983_v56 }
0x3194   :  { %2516 = vtanh.f32 %v1993_v2 }
0x319a   :  { %v2517_v38 = vpop.eup %2516 }
0x319b   :  { %1996 = vrot.lane.b32.xlu2 %v2517_v38, %s2573_s3 }
0x31f5   :  { %v1997_v17 = vpop.permute.xlu2 %1996 }
0x31f6   :  { %v1999_v54 = vmul.f32 %v1997_v17, %v1982_v53 }
0x31f8   :  { %2004 = vrot.lane.b32.xlu1 %v1999_v54, %s2573_s3  ;;  %2001 = vrot.lane.b32.xlu0 %v1999_v54, %s2574_s30 }
0x326a   :  { %v2005_v57 = vpop.permute.xlu1 %2004  ;;  %v2002_v26 = vpop.permute.xlu0 %2001 }
0x326b   :  { %v2007_v58 = vsel %vm236_vm15, %v2002_v26, %v2005_v57 }
0x326c   :  { %v2008_v13 = vsel %vm2768_vm0, %v2007_v58, 0.0 }
0x326d   :  { %2338 = vmatmul.msk.f32.vlgmr.msra.gmra.mxu3 %vm166_vm2, %v2008_v13 }
0x32f0   :  { %v2029_v29 = vpop.f32.mrf.mxu3 }
0x32f1   :  { %v2032_v60 = vadd.f32 %v2029_v29, %v3452_v35 }
0x32f3   :  { %v2339_v61 = vmul.f32 -1.442695, %v2032_v60 }
0x32f5   :  { %2518 = vpow2.f32 %v2339_v61 }
0x32fb   :  { %v2519_v63 = vpop.eup %2518 }
0x32fc   :  { %v2037_v44 = vadd.f32 1.0, %v2519_v63 }
0x32fe   :  { %2520 = vrcp.f32 %v2037_v44  ;;  %v2049_v4 = vand.u32 2147483648, %v2037_v44  ;;  %v2047_v31 = vand.u32 2147483647, %v2037_v44  ;;  %vm2043_vm14 = vweird.f32 %v2037_v44 }
0x32ff   :  { %2522 = vtanh.f32 %v2032_v60 }
0x3300   :  { %v2050_v1 = vor.u32 1.1754944e-38, %v2049_v4  ;;  %vm2048_vm4 = vcmp.eq.f32.partialorder %v2047_v31, 8.507059e+37 }
0x3304   :  { %v2521_v27 = vpop.eup %2520 }
0x3305   :  { %v2039_v62 = vmul.f32 %v2521_v27, %v2037_v44  ;;  %vm2044_vm13 = vweird.f32 %v2521_v27  ;;  %v2523_v35 = vpop.eup %2522 }
0x3306   :  { %vm2045_vm3 = vmor %vm2043_vm14, %vm2044_vm13 }
0x3307   :  { %v2040_v55 = vsub.f32 1.0, %v2039_v62 }
0x3309   :  { %v2041_v33 = vmul.f32 %v2521_v27, %v2040_v55 }
0x330b   :  { %v2042_v0 = vadd.f32 %v2521_v27, %v2041_v33 }
0x330d   :  { %v2046_v41 = vsel %vm2045_vm3, %v2521_v27, %v2042_v0 }
0x330e   :  { %v2051_v19 = vsel %vm2048_vm4, %v2050_v1, %v2046_v41 }
0x330f   :  { %v2053_v3 = vsel %vm2753_vm5, %v2523_v35, %v2051_v19  ;;  %v2217_v19 = vrot.slane %v3465_v48, 2  ;;  %v2227_v48 = vld [vmem:[%s3600_s10 + $0x28] sm:$0xff] }
0x3310   :  { %2056 = vrot.lane.b32.xlu2 %v2053_v3, %s2573_s3  ;;  %v2054_v5 = vmul.f32 %v2053_v3, %v1993_v2 }
0x336a   :  { %v2057_v22 = vpop.permute.xlu2 %2056 }
0x336b   :  { %v2059_v40 = vmul.f32 %v2057_v22, %v2053_v3 }
0x336d   :  { %2061 = vrot.lane.b32.xlu0 %v2059_v40, %s2574_s30 }
0x33df   :  { %v2062_v6 = vpop.permute.xlu0 %2061 }
0x33e0   :  { %v2064_v52 = vadd.f32 %v2062_v6, %v2054_v5  ;;  %v2228_v6 = vld [vmem:[%s3600_s10 + $0x30] sm:$0xff] }
0x33e1   :  { %2246 = vmatpush.msrb.mxu2 %v2228_v6 }
0x33e2   :  { %2524 = vtanh.f32 %v2064_v52 }
0x33e3   :  { %2247 = vmatpush.msrb.mxu2 %v2227_v48 }
0x33e8   :  { %v2525_v47 = vpop.eup %2524 }
0x33e9   :  { %2067 = vrot.lane.b32.xlu1 %v2525_v47, %s2573_s3  ;;  %v2225_v47 = vld [vmem:[%s3600_s10 + $0x18] sm:$0xff] }
0x345b   :  { %v2068_v8 = vpop.permute.xlu1 %2067 }
0x345c   :  { %v2070_v10 = vmul.f32 %v2068_v8, %v2053_v3  ;;  %v2224_v8 = vld [vmem:[%s3600_s10 + $0x10] sm:$0xff] }
0x345e   :  { %2075 = vrot.lane.b32.xlu0 %v2070_v10, %s2573_s3  ;;  %2072 = vrot.lane.b32.xlu2 %v2070_v10, %s2574_s30  ;;  %v2223_v10 = vld [vmem:[%s3600_s10 + $0x8] sm:$0xff] }
0x34b8   :  { %v2073_v12 = vpop.permute.xlu2 %2072 }
0x34d0   :  { %v2076_v15 = vpop.permute.xlu0 %2075 }
0x34d1   :  { %v2078_v37 = vsel %vm236_vm15, %v2073_v12, %v2076_v15 }
0x34d2   :  { %v2079_v20 = vsel %vm2768_vm0, %v2078_v37, 0.0  ;;  %v2222_v37 = vld [vmem:[%s3600_s10] sm:$0xff] }
0x34d3   :  { %2340 = vmatmul.msk.f32.vlgmr.msrb.gmra.mxu0 %vm166_vm2, %v2079_v20 }
0x3550   :  { %v2100_v25 = vpop.f32.mrf.mxu0 }
0x3551   :  { %v2103_v14 = vadd.f32 %v2100_v25, %v3455_v21 }
0x3553   :  { %v2341_v9 = vmul.f32 -1.442695, %v2103_v14 }
0x3555   :  { %2526 = vpow2.f32 %v2341_v9  ;;  %v2349_v9 = vld [vmem:[%s3601_s11] ss:$0 sm:$0xff] }
0x355b   :  { %v2527_v28 = vpop.eup %2526 }
0x355c   :  { %v2108_v39 = vadd.f32 1.0, %v2527_v28 }
0x355e   :  { %2528 = vrcp.f32 %v2108_v39  ;;  %v2120_v43 = vand.u32 2147483648, %v2108_v39  ;;  %v2118_v49 = vand.u32 2147483647, %v2108_v39  ;;  %vm2114_vm11 = vweird.f32 %v2108_v39 }
0x355f   :  { %2530 = vtanh.f32 %v2103_v14 }
0x3560   :  { %v2121_v42 = vor.u32 1.1754944e-38, %v2120_v43  ;;  %vm2119_vm1 = vcmp.eq.f32.partialorder %v2118_v49, 8.507059e+37 }
0x3564   :  { %v2529_v30 = vpop.eup %2528 }
0x3565   :  { %v2110_v32 = vmul.f32 %v2529_v30, %v2108_v39  ;;  %vm2115_vm10 = vweird.f32 %v2529_v30  ;;  %v2531_v21 = vpop.eup %2530 }
0x3566   :  { %vm2116_vm6 = vmor %vm2114_vm11, %vm2115_vm10 }
0x3567   :  { %v2111_v45 = vsub.f32 1.0, %v2110_v32 }
0x3569   :  { %v2112_v46 = vmul.f32 %v2529_v30, %v2111_v45 }
0x356b   :  { %v2113_v50 = vadd.f32 %v2529_v30, %v2112_v46 }
0x356d   :  { %v2117_v51 = vsel %vm2116_vm6, %v2529_v30, %v2113_v50 }
0x356e   :  { %v2122_v16 = vsel %vm2119_vm1, %v2121_v42, %v2117_v51 }
0x356f   :  { %v2124_v7 = vsel %vm2753_vm5, %v2531_v21, %v2122_v16 }
0x3570   :  { %2127 = vrot.lane.b32.xlu1 %v2124_v7, %s2573_s3  ;;  %v2125_v23 = vmul.f32 %v2124_v7, %v2064_v52  ;;  %v2226_v52 = vld [vmem:[%s3600_s10 + $0x20] sm:$0xff]  ;;  %s2575_s10 = smov [#allocation2]  }
0x3571   :  { %2248 = vmatpush.msrb.mxu2 %v2226_v52 }
0x3573   :  { %2249 = vmatpush.msrb.mxu2 %v2225_v47 }
0x3575   :  { %2250 = vmatpush.msrb.mxu2 %v2224_v8 }
0x3577   :  { %2251 = vmatpush.msrb.mxu2 %v2223_v10 }
0x3579   :  { %2252 = vmatpush.msrb.mxu2 %v2222_v37 }
0x35e2   :  { %v2128_v34 = vpop.permute.xlu1 %2127 }
0x35e3   :  { %v2130_v53 = vmul.f32 %v2128_v34, %v2124_v7 }
0x35e5   :  { %2132 = vrot.lane.b32.xlu2 %v2130_v53, %s2574_s30 }
0x363f   :  { %v2133_v36 = vpop.permute.xlu2 %2132 }
0x3640   :  { %v2135_v56 = vadd.f32 %v2133_v36, %v2125_v23 }
0x3642   :  { %2532 = vtanh.f32 %v2135_v56 }
0x3648   :  { %v2533_v18 = vpop.eup %2532 }
0x3649   :  { %2138 = vrot.lane.b32.xlu0 %v2533_v18, %s2573_s3 }
0x36bb   :  { %v2139_v2 = vpop.permute.xlu0 %2138 }
0x36bc   :  { %v2141_v38 = vmul.f32 %v2139_v2, %v2124_v7 }
0x36be   :  { %2146 = vrot.lane.b32.xlu2 %v2141_v38, %s2573_s3  ;;  %2143 = vrot.lane.b32.xlu1 %v2141_v38, %s2574_s30 }
0x3718   :  { %v2147_v17 = vpop.permute.xlu2 %2146 }
0x3730   :  { %v2144_v54 = vpop.permute.xlu1 %2143 }
0x3731   :  { %v2149_v57 = vsel %vm236_vm15, %v2144_v54, %v2147_v17 }
0x3732   :  { %v2150_v26 = vsel %vm2768_vm0, %v2149_v57, 0.0 }
0x3733   :  { %2342 = vmatmul.msk.f32.vlgmr.msrb.gmra.mxu1 %vm166_vm2, %v2150_v26 }
0x37b0   :  { %v2171_v58 = vpop.f32.mrf.mxu1 }
0x37b1   :  { %v2174_v13 = vadd.f32 %v2171_v58, %v3458_v24 }
0x37b3   :  { %v2343_v29 = vmul.f32 -1.442695, %v2174_v13 }
0x37b5   :  { %2534 = vpow2.f32 %v2343_v29 }
0x37bb   :  { %v2535_v60 = vpop.eup %2534 }
0x37bc   :  { %v2179_v61 = vadd.f32 1.0, %v2535_v60 }
0x37be   :  { %2536 = vrcp.f32 %v2179_v61  ;;  %v2191_v62 = vand.u32 2147483648, %v2179_v61  ;;  %v2189_v4 = vand.u32 2147483647, %v2179_v61  ;;  %vm2185_vm0 = vweird.f32 %v2179_v61 }
0x37bf   :  { %2538 = vtanh.f32 %v2174_v13 }
0x37c0   :  { %v2192_v33 = vor.u32 1.1754944e-38, %v2191_v62  ;;  %vm2190_vm9 = vcmp.eq.f32.partialorder %v2189_v4, 8.507059e+37 }
0x37c4   :  { %v2537_v63 = vpop.eup %2536 }
0x37c5   :  { %v2181_v44 = vmul.f32 %v2537_v63, %v2179_v61  ;;  %vm2186_vm7 = vweird.f32 %v2537_v63  ;;  %v2539_v24 = vpop.eup %2538 }
0x37c6   :  { %vm2187_vm8 = vmor %vm2185_vm0, %vm2186_vm7 }
0x37c7   :  { %v2182_v27 = vsub.f32 1.0, %v2181_v44 }
0x37c9   :  { %v2183_v55 = vmul.f32 %v2537_v63, %v2182_v27 }
0x37cb   :  { %v2184_v11 = vadd.f32 %v2537_v63, %v2183_v55 }
0x37cd   :  { %v2188_v31 = vsel %vm2187_vm8, %v2537_v63, %v2184_v11 }
0x37ce   :  { %v2193_v0 = vsel %vm2190_vm9, %v2192_v33, %v2188_v31 }
0x37cf   :  { %v2195_v1 = vsel %vm2753_vm5, %v2539_v24, %v2193_v0  ;;  %vm2257_vm5 = vcmask 74752  }
0x37d0   :  { %2198 = vrot.lane.b32.xlu0 %v2195_v1, %s2573_s3  ;;  %v2196_v3 = vmul.f32 %v2195_v1, %v2135_v56 }
0x3842   :  { %v2199_v41 = vpop.permute.xlu0 %2198 }
0x3843   :  { %v2201_v35 = vmul.f32 %v2199_v41, %v2195_v1 }
0x3845   :  { %2203 = vrot.lane.b32.xlu1 %v2201_v35, %s2574_s30 }
0x384d   :  { %2218 = vrot.lane.b32.xlu1 %v2217_v19, %s2573_s3 }
0x38b7   :  { %v2204_v22 = vpop.permute.xlu1 %2203 }
0x38b8   :  { %v2206_v40 = vadd.f32 %v2204_v22, %v2196_v3 }
0x38ba   :  { %2540 = vtanh.f32 %v2206_v40 }
0x38bf   :  { %v2219_v20 = vpop.permute.xlu1 %2218 }
0x38c0   :  { %v2541_v5 = vpop.eup %2540 }
0x38c1   :  { %2209 = vrot.lane.b32.xlu2 %v2541_v5, %s2573_s3 }
0x391b   :  { %v2210_v12 = vpop.permute.xlu2 %2209 }
0x391c   :  { %v2212_v15 = vmul.f32 %v2210_v12, %v2195_v1 }
0x391e   :  { %2214 = vrot.lane.b32.xlu0 %v2212_v15, %s2574_s30  ;;  %s2276_s30 = sshll.u32 %s2575_s10, 4  ;;  %s2277_s30 = int_to_ptr.vmem [resolvable:$true] %s2276_s30 }
0x3990   :  { %v2215_v25 = vpop.permute.xlu0 %2214 }
0x3991   :  { %v2221_v14 = vsel %vm236_vm15, %v2215_v25, %v2219_v20 }
0x3992   :  { %2344 = vmatmul.msk.f32.vlgmr.msrb.gmra.mxu2 %vm166_vm2, %v2221_v14 }
0x3a15   :  { %v2254_v28 = vpop.f32.mrf.mxu2 }
0x3a16   :  { %v2255_v39 = vadd.f32 %v2349_v9, %v2254_v28 }
0x3a18   :  { %v2258_v30 = vsel %vm2257_vm5, %v2255_v39, -inf }
0x3a19   :  { %2259 = vmax.xlane.f32.xlu2 %v2258_v30 }
0x3a8c   :  { %v2260_v32 = vpop.xlane.xlu2 %2259 }
0x3a8d   :  { %v2261_v45 = vsub.f32 %v2255_v39, %v2260_v32 }
0x3a8f   :  { %v2262_v43 = vmul.f32 1.442695, %v2261_v45 }
0x3a91   :  { %2542 = vpow2.f32 %v2262_v43 }
0x3a97   :  { %v2543_v46 = vpop.eup %2542 }
0x3a98   :  { %v2264_v49 = vsel %vm2257_vm5, %v2543_v46, 0.0 }
0x3a99   :  { %2265 = vadd.xlane.f32.xlu0 %v2264_v49 }
0x3b0c   :  { %v2266_v50 = vpop.xlane.xlu0 %2265 }
0x3b0d   :  { %2544 = vlog2.f32 %v2266_v50 }
0x3b13   :  { %v2545_v42 = vpop.eup %2544 }
0x3b14   :  { %v2268_v51 = vmul.f32 0.6931472, %v2545_v42 }
0x3b16   :  { %v2269_v21 = vsub.f32 %v2261_v45, %v2268_v51 }
0x3b18   :  { %2270 = vst.msk [vmem:[#allocation2] sm:$0x3] %vm2257_vm5, %v2269_v21 }
0x3b19   :  { %2281 = dma.vmem_to_hbm [thread:$0]  %s2277_s30, 32, %s2279_s18, [#allocation3]  }
0x3b1a   :  { %2570 = dma.done.wait [#allocation3], 32  }
0x3b1b   :  { %2571 = vsyncadd [#allocation3], 4294967264 }
0x3b1c   :  { %2286 = vsyncpa [#allocation3], 1 }

</bundles_post_ra>
